<compile_context>
chip_gen: v6e
topology: v6e:2x2x1
jax: 0.10.0
libtpu: 0.0.40
codegen_flags: <defaults>
</compile_context>

<pallas_src>
import functools

import jax
import jax.numpy as jnp
from jax.experimental import pallas as pl
from jax.experimental.pallas import tpu as pltpu

EPS = 1e-5
LANE = 128
MM_DTYPE = jnp.bfloat16            # MXU operand dtype (accumulation is f32)


def _vmem_limit_bytes():
    """Generation-aware scoped-VMEM cap: ~75% of physical VMEM
    (≈96 MiB on v5e/v6e, ≈48 MiB on v7x); safe fallback if query fails."""
    cap = 64 * 1024 * 1024
    try:
        info = pltpu.get_tpu_info()
        cap = int(getattr(info, "vmem_capacity_bytes", cap)) or cap
    except Exception:
        pass
    return int(cap * 3 // 4)


_VMEM_LIMIT = _vmem_limit_bytes()


# ---------------------------------------------------------------------------
# small helpers
# ---------------------------------------------------------------------------
def _round_up_lanes(c):
    return ((c + LANE - 1) // LANE) * LANE


def _pad_last(a, to):
    pad = to - a.shape[-1]
    if pad == 0:
        return a
    cfg = [(0, 0)] * (a.ndim - 1) + [(0, pad)]
    return jnp.pad(a, cfg)


def _pad_conv3x3(w_hwio, ci_to, co_to):
    return jnp.pad(w_hwio, ((0, 0), (0, 0),
                            (0, ci_to - w_hwio.shape[2]),
                            (0, co_to - w_hwio.shape[3])))


def _row_align(dtype):
    """Sublane packing requirement for the second-to-last block dim."""
    return {2: 16, 1: 32}.get(jnp.dtype(dtype).itemsize, 8)


def _pick_m_tile(m, pref, align=8):
    """Largest row tile <= pref that divides m and is `align`-row aligned.
    Falls back to the full dimension (always a legal block; acceptable for
    the activation sizes this block sees)."""
    if m <= pref:
        return m
    if m % align == 0:
        start = pref - pref % align
        for t in range(start, align - 1, -align):
            if m % t == 0:
                return t
    return m


def _pick_row_band(h, w):
    """Rows per 3x3-conv program: TH*W up to ~1024 (amortizes per-step
    overhead), >= 2 bands per image when possible, and TH*W a multiple of 8
    so output row blocks stay (8,128)-aligned."""
    cands = [t for t in (64, 32, 16, 8, 4, 2, 1)
             if h % t == 0 and t * w <= 1024 and (t * w) % 8 == 0]
    multi = [t for t in cands if h // t >= 2]
    pool = multi or cands
    if not pool:
        assert (h * w) % 8 == 0, "H*W must be a multiple of 8"
        return h
    return max(pool)


# ---------------------------------------------------------------------------
# Kernel 1: per-channel sum / sum-of-squares (tiled reduction over rows)
# ---------------------------------------------------------------------------
def _bn_stats_kernel(x_ref, s_ref):
    x = x_ref[...].astype(jnp.float32)
    tile = jnp.concatenate(
        [jnp.sum(x, axis=0, keepdims=True),
         jnp.sum(x * x, axis=0, keepdims=True)], axis=0)      # (2, Cp)

    @pl.when(pl.program_id(0) == 0)
    def _():
        s_ref[...] = tile

    @pl.when(pl.program_id(0) != 0)
    def _():
        s_ref[...] = s_ref[...] + tile


def bn_stats(x_flat):
    m, cp = x_flat.shape
    tm = _pick_m_tile(m, 1024, _row_align(x_flat.dtype))
    return pl.pallas_call(
        _bn_stats_kernel,
        out_shape=jax.ShapeDtypeStruct((2, cp), jnp.float32),
        grid=(m // tm,),
        in_specs=[pl.BlockSpec((tm, cp), lambda i: (i, 0))],
        out_specs=pl.BlockSpec((2, cp), lambda i: (0, 0)),
        compiler_params=pltpu.CompilerParams(
            dimension_semantics=("arbitrary",),
            vmem_limit_bytes=_VMEM_LIMIT),
    )(x_flat)


def _affine_from_stats(stats, gamma, beta, count, cp):
    """Training-mode BN folded into per-channel scale/shift (f32)."""
    g = _pad_last(gamma.reshape(1, -1), cp)[0]
    b = _pad_last(beta.reshape(1, -1), cp)[0]
    mean = stats[0] / count
    var = jnp.maximum(stats[1] / count - mean * mean, 0.0)    # biased variance
    scale = g * jax.lax.rsqrt(var + EPS)
    shift = b - mean * scale
    return scale.reshape(1, cp), shift.reshape(1, cp)


def _bn_affine(x_flat, gamma, beta, count=None):
    m, cp = x_flat.shape
    stats = bn_stats(x_flat)
    return _affine_from_stats(stats, gamma, beta,
                              m if count is None else count, cp)


# ---------------------------------------------------------------------------
# Kernel 2: standalone BN affine (+ optional ReLU), tiled over rows
# ---------------------------------------------------------------------------
def _bn_apply_kernel(x_ref, scale_ref, shift_ref, o_ref, *, apply_relu):
    y = x_ref[...].astype(jnp.float32) * scale_ref[...] + shift_ref[...]
    if apply_relu:
        y = jnp.maximum(y, 0.0)
    o_ref[...] = y.astype(o_ref.dtype)


def bn_apply(x_flat, scale, shift, *, apply_relu):
    m, cp = x_flat.shape
    tm = _pick_m_tile(m, 1024, _row_align(x_flat.dtype))
    kernel = functools.partial(_bn_apply_kernel, apply_relu=apply_relu)
    return pl.pallas_call(
        kernel,
        out_shape=jax.ShapeDtypeStruct((m, cp), jnp.float32),
        grid=(m // tm,),
        in_specs=[
            pl.BlockSpec((tm, cp), lambda i: (i, 0)),
            pl.BlockSpec((1, cp), lambda i: (0, 0)),
            pl.BlockSpec((1, cp), lambda i: (0, 0)),
        ],
        out_specs=pl.BlockSpec((tm, cp), lambda i: (i, 0)),
        compiler_params=pltpu.CompilerParams(
            dimension_semantics=("parallel",),
            vmem_limit_bytes=_VMEM_LIMIT),
    )(x_flat, scale, shift)


# ---------------------------------------------------------------------------
# Kernel 3: 1x1 conv (channel matmul) with BN affine (+optional ReLU) fused
# in as a prologue and the NEXT BN's sum/sum^2 fused as an epilogue.
# Output stored in bf16 (its only consumer is a bf16 MXU matmul).
# ---------------------------------------------------------------------------
def _bn_relu_conv1x1_kernel(x_ref, scale_ref, shift_ref, w_ref, b_ref,
                            o_ref, stats_ref, *, apply_relu):
    y = x_ref[...].astype(jnp.float32) * scale_ref[...] + shift_ref[...]
    if apply_relu:
        y = jnp.maximum(y, 0.0)
    out = jnp.dot(y.astype(MM_DTYPE), w_ref[...],
                  preferred_element_type=jnp.float32) + b_ref[...]
    o_ref[...] = out.astype(o_ref.dtype)

    # fused epilogue: per-channel sums of the f32 result for the next BN
    # (removes a whole extra HBM pass over h1).
    tile = jnp.concatenate(
        [jnp.sum(out, axis=0, keepdims=True),
         jnp.sum(out * out, axis=0, keepdims=True)], axis=0)

    @pl.when(pl.program_id(0) == 0)
    def _():
        stats_ref[...] = tile

    @pl.when(pl.program_id(0) != 0)
    def _():
        stats_ref[...] = stats_ref[...] + tile


def conv1x1_bn_relu(x_flat, scale, shift, w, bias, *, apply_relu):
    m, cip = x_flat.shape
    cop = w.shape[1]
    tm = _pick_m_tile(m, 512, _row_align(MM_DTYPE))   # bf16 output blocks
    kernel = functools.partial(_bn_relu_conv1x1_kernel, apply_relu=apply_relu)
    return pl.pallas_call(
        kernel,
        out_shape=(jax.ShapeDtypeStruct((m, cop), MM_DTYPE),
                   jax.ShapeDtypeStruct((2, cop), jnp.float32)),
        grid=(m // tm,),
        in_specs=[
            pl.BlockSpec((tm, cip), lambda i: (i, 0)),
            pl.BlockSpec((1, cip), lambda i: (0, 0)),
            pl.BlockSpec((1, cip), lambda i: (0, 0)),
            pl.BlockSpec((cip, cop), lambda i: (0, 0)),
            pl.BlockSpec((1, cop), lambda i: (0, 0)),
        ],
        out_specs=(pl.BlockSpec((tm, cop), lambda i: (i, 0)),
                   pl.BlockSpec((2, cop), lambda i: (0, 0))),
        compiler_params=pltpu.CompilerParams(
            # resident stats accumulator -> sequential grid iteration
            dimension_semantics=("arbitrary",),
            vmem_limit_bytes=_VMEM_LIMIT),
    )(x_flat, scale, shift, w.astype(MM_DTYPE), bias)


# ---------------------------------------------------------------------------
# Kernel 4: 3x3 conv (stride 1, pad 1) with BN affine (+optional ReLU) fused
# in.  Grid = (batch, row-band); one im2col matmul (TH*W, 9*Cip)@(9*Cip, Cop)
# per program; cast to bf16 BEFORE im2col; optional fused next-BN stats.
# ---------------------------------------------------------------------------
def _make_conv3x3_kernel(TH, W, apply_relu, emit_stats):
    def kernel(x_ref, scale_ref, shift_ref, w_ref, b_ref, o_ref, *rest):
        band_id = pl.program_id(1)
        r0 = pl.multiple_of(band_id * TH, TH)          # first padded row
        band = x_ref[0, pl.ds(r0, TH + 2)].astype(jnp.float32)  # (TH+2,W+2,C)

        # fused BN affine (+ReLU) prologue
        y = (band * scale_ref[...].reshape(1, 1, -1)
             + shift_ref[...].reshape(1, 1, -1))
        if apply_relu:
            y = jnp.maximum(y, 0.0)

        # Re-zero the conv's zero padding (the BN affine overwrote it).  The
        # side columns are always halo; the top/bottom halo rows are real
        # image rows except on the first/last band.
        is_top = band_id == 0
        is_bot = band_id == pl.num_programs(1) - 1
        row = jax.lax.broadcasted_iota(jnp.int32, (TH + 2, W + 2, 1), 0)
        col = jax.lax.broadcasted_iota(jnp.int32, (TH + 2, W + 2, 1), 1)
        bad = ((col < 1) | (col > W)
               | ((row == 0) & is_top) | ((row == TH + 1) & is_bot))
        # cast to the MXU dtype BEFORE im2col so the patches temp is bf16
        y = jnp.where(bad, 0.0, y).astype(MM_DTYPE)

        # im2col over the 9 taps -> one large-K MXU matmul
        taps = [y[ky:ky + TH, kx:kx + W, :]
                for ky in range(3) for kx in range(3)]
        patches = jnp.concatenate(taps, axis=-1).reshape(TH * W, -1)
        out = jnp.dot(patches, w_ref[...],
                      preferred_element_type=jnp.float32) + b_ref[...]
        o_ref[...] = out.astype(o_ref.dtype)

        if emit_stats:
            stats_ref = rest[0]
            tile = jnp.concatenate(
                [jnp.sum(out, axis=0, keepdims=True),
                 jnp.sum(out * out, axis=0, keepdims=True)], axis=0)
            first = jnp.logical_and(pl.program_id(0) == 0, band_id == 0)

            @pl.when(first)
            def _():
                stats_ref[...] = tile

            @pl.when(jnp.logical_not(first))
            def _():
                stats_ref[...] = stats_ref[...] + tile

    return kernel


def conv3x3_bn_relu(x_pad_nhwc, scale, shift, w_hwio, bias, *,
                    apply_relu, emit_stats=False):
    """3x3/stride-1/pad-1 conv of BN-affine(+ReLU)(x).
    x_pad_nhwc: (N, H+2, W+2, Cip), spatially zero-padded, f32 or bf16."""
    n, hp2, wp2, cip = x_pad_nhwc.shape
    h, w = hp2 - 2, wp2 - 2
    cop = w_hwio.shape[-1]
    th = _pick_row_band(h, w)
    n_bands = h // th
    assert (th * w) % 8 == 0, "output row block must be 8-row aligned"
    w_flat = w_hwio.reshape(9 * cip, cop).astype(MM_DTYPE)    # K = 9*Cip
    kernel = _make_conv3x3_kernel(th, w, apply_relu, emit_stats)

    out_shape = jax.ShapeDtypeStruct((n * h * w, cop), jnp.float32)
    out_spec = pl.BlockSpec((th * w, cop), lambda b, r: (b * n_bands + r, 0))
    if emit_stats:
        out_shape = (out_shape, jax.ShapeDtypeStruct((2, cop), jnp.float32))
        out_spec = (out_spec, pl.BlockSpec((2, cop), lambda b, r: (0, 0)))
        sem = ("arbitrary", "arbitrary")   # resident stats accumulator
    else:
        sem = ("parallel", "parallel")

    return pl.pallas_call(
        kernel,
        out_shape=out_shape,
        grid=(n, n_bands),
        in_specs=[
            # whole padded image; constant over band axis -> DMA'd once per n
            pl.BlockSpec((1, hp2, wp2, cip), lambda b, r: (b, 0, 0, 0)),
            pl.BlockSpec((1, cip), lambda b, r: (0, 0)),
            pl.BlockSpec((1, cip), lambda b, r: (0, 0)),
            pl.BlockSpec((9 * cip, cop), lambda b, r: (0, 0)),
            pl.BlockSpec((1, cop), lambda b, r: (0, 0)),
        ],
        out_specs=out_spec,
        compiler_params=pltpu.CompilerParams(
            dimension_semantics=sem,
            vmem_limit_bytes=_VMEM_LIMIT),
    )(x_pad_nhwc, scale, shift, w_flat, bias)


# ---------------------------------------------------------------------------
# BottleNeck forward (all four B_mode / P_block branches)
# ---------------------------------------------------------------------------
def bottleneck_forward(x_nchw, params, *, B_mode, P_block):
    n, c, h, w = x_nchw.shape
    m = n * h * w
    cp = _round_up_lanes(c)

    if not B_mode:
        if not P_block:
            k = params["conv_b"].shape[0]
            kp = _round_up_lanes(k)
            # Single host preamble: NCHW->NHWC, channel pad, 3x3 spatial pad.
            xpad = jnp.pad(jnp.transpose(x_nchw, (0, 2, 3, 1)),
                           ((0, 0), (1, 1), (1, 1), (0, cp - c)))
            # BN stats straight from the padded copy: zero padding adds
            # nothing to the sums; divide by the true element count m.
            sc, sh = _bn_affine(xpad.reshape(-1, cp),
                                params["bn_g"], params["bn_b"], count=m)
            wpad = _pad_conv3x3(params["conv_w"], cp, kp)
            bpad = _pad_last(params["conv_b"].reshape(1, -1), kp)
            out_flat = conv3x3_bn_relu(xpad, sc, sh, wpad, bpad,
                                       apply_relu=True)
        else:
            # The torch forward overwrites the conv result with bn2(x); the
            # bn1/relu/conv chain is dead code, so it is skipped entirely.
            # (Only shape-valid when k == in_channels, as in the torch module.)
            k = params["bn2_g"].shape[0]
            x_flat = _pad_last(jnp.transpose(x_nchw, (0, 2, 3, 1)),
                               cp).reshape(m, cp)
            sc, sh = _bn_affine(x_flat, params["bn2_g"], params["bn2_b"])
            out_flat = bn_apply(x_flat, sc, sh, apply_relu=False)
    else:
        k4 = params["conv1_b"].shape[0]
        k = params["conv2_b"].shape[0]
        c4p, kp = _round_up_lanes(k4), _round_up_lanes(k)
        x_flat = _pad_last(jnp.transpose(x_nchw, (0, 2, 3, 1)),
                           cp).reshape(m, cp)

        # stage 1: bn1 (+ReLU unless P_block) fused into the 1x1 conv; its
        # epilogue also emits bn2's sum/sum^2 (no separate stats pass on h1).
        sc1, sh1 = _bn_affine(x_flat, params["bn1_g"], params["bn1_b"])
        w1 = jnp.pad(params["conv1_w"], ((0, cp - c), (0, c4p - k4)))
        b1 = _pad_last(params["conv1_b"].reshape(1, -1), c4p)
        h1, stats2 = conv1x1_bn_relu(x_flat, sc1, sh1, w1, b1,
                                     apply_relu=not P_block)   # h1 is bf16

        # stage 2: bn2 + ReLU fused into the 3x3 conv (bf16 padded input).
        sc2, sh2 = _affine_from_stats(stats2, params["bn2_g"],
                                      params["bn2_b"], m, c4p)
        h1_pad = jnp.pad(h1.reshape(n, h, w, c4p),
                         ((0, 0), (1, 1), (1, 1), (0, 0)))
        w2 = _pad_conv3x3(params["conv2_w"], c4p, kp)
        b2 = _pad_last(params["conv2_b"].reshape(1, -1), kp)
        if P_block:
            out_flat, stats3 = conv3x3_bn_relu(h1_pad, sc2, sh2, w2, b2,
                                               apply_relu=True,
                                               emit_stats=True)
            sc3, sh3 = _affine_from_stats(stats3, params["bn3_g"],
                                          params["bn3_b"], m, kp)
            out_flat = bn_apply(out_flat, sc3, sh3, apply_relu=False)
        else:
            out_flat = conv3x3_bn_relu(h1_pad, sc2, sh2, w2, b2,
                                       apply_relu=True)

    out = out_flat.reshape(n, h, w, -1)[..., :k]
    out_nchw = jnp.transpose(out, (0, 3, 1, 2))
    return jnp.concatenate([x_nchw, out_nchw], axis=1)


# ---------------------------------------------------------------------------
# Deterministic parameter init (BN defaults: gamma=1, beta=0).
# 3x3 conv weights stored HWIO; 1x1 conv weights stored (Ci, Co).
# ---------------------------------------------------------------------------
def init_params(key, in_channels, k, B_mode, P_block):
    ks = jax.random.split(key, 4)
    ones = lambda c: jnp.ones((c,), jnp.float32)
    zeros = lambda c: jnp.zeros((c,), jnp.float32)
    p = {}
    if not B_mode:
        p["conv_w"] = 0.1 * jax.random.normal(ks[0], (3, 3, in_channels, k),
                                              jnp.float32)
        p["conv_b"] = 0.01 * jax.random.normal(ks[1], (k,), jnp.float32)
        if not P_block:
            p["bn_g"], p["bn_b"] = ones(in_channels), zeros(in_channels)
        else:
            p["bn1_g"], p["bn1_b"] = ones(in_channels), zeros(in_channels)
            p["bn2_g"], p["bn2_b"] = ones(k), zeros(k)
    else:
        p["bn1_g"], p["bn1_b"] = ones(in_channels), zeros(in_channels)
        p["conv1_w"] = 0.1 * jax.random.normal(ks[0], (in_channels, 4 * k),
                                               jnp.float32)
        p["conv1_b"] = 0.01 * jax.random.normal(ks[1], (4 * k,), jnp.float32)
        p["bn2_g"], p["bn2_b"] = ones(4 * k), zeros(4 * k)
        p["conv2_w"] = 0.1 * jax.random.normal(ks[2], (3, 3, 4 * k, k),
                                               jnp.float32)
        p["conv2_b"] = 0.01 * jax.random.normal(ks[3], (k,), jnp.float32)
        if P_block:
            p["bn3_g"], p["bn3_b"] = ones(k), zeros(k)
    return p


# ---------------------------------------------------------------------------
# Pure-JAX reference mirroring the PyTorch forward (all branches)
# ---------------------------------------------------------------------------
def reference_forward(x_nchw, p, *, B_mode, P_block):
    x = jnp.transpose(x_nchw, (0, 2, 3, 1))          # NHWC

    def bn(v, g, b):
        mean = v.mean(axis=(0, 1, 2), keepdims=True)
        var = v.var(axis=(0, 1, 2), keepdims=True)   # biased
        return (v - mean) * jax.lax.rsqrt(var + EPS) * g + b

    def conv3(v, wt, b):
        return jax.lax.conv_general_dilated(
            v, wt, (1, 1), "SAME",
            dimension_numbers=("NHWC", "HWIO", "NHWC")) + b

    if not B_mode:
        if not P_block:
            out = conv3(jax.nn.relu(bn(x, p["bn_g"], p["bn_b"])),
                        p["conv_w"], p["conv_b"])
        else:
            out = bn(x, p["bn2_g"], p["bn2_b"])      # conv result is discarded
    else:
        v = bn(x, p["bn1_g"], p["bn1_b"])
        if not P_block:
            v = jax.nn.relu(v)
        v = jnp.einsum("nhwc,cd->nhwd", v, p["conv1_w"]) + p["conv1_b"]
        v = jax.nn.relu(bn(v, p["bn2_g"], p["bn2_b"]))
        v = conv3(v, p["conv2_w"], p["conv2_b"])
        if P_block:
            v = bn(v, p["bn3_g"], p["bn3_b"])
        out = v
    out = jnp.transpose(out, (0, 3, 1, 2))
    return jnp.concatenate([x_nchw, out], axis=1)


if __name__ == "__main__":
    key = jax.random.PRNGKey(0)
    kx, kparam = jax.random.split(key)

    N, Cin, H, W = 2, 4, 16, 16
    k = 4
    x = jax.random.normal(kx, (N, Cin, H, W), jnp.float32)

    # bf16 MXU operands / bf16 h1 -> loose tolerance for the matmul branches;
    # the pure BN branch (no matmul, all f32) is checked tightly.
    cases = [
        (True, False, 1e-1),     # canonical DenseNet bottleneck
        (True, True, 1e-1),
        (False, False, 1e-1),
        (False, True, 1e-3),
    ]
    for B_mode, P_block, tol in cases:
        params = init_params(kparam, Cin, k, B_mode, P_block)
        fwd = jax.jit(functools.partial(bottleneck_forward,
                                        B_mode=B_mode, P_block=P_block))
        out = jax.block_until_ready(fwd(x, params))
        assert out.shape == (N, Cin + k, H, W), (B_mode, P_block, out.shape)
        ref = jax.block_until_ready(
            reference_forward(x, params, B_mode=B_mode, P_block=P_block))
        err = float(jnp.max(jnp.abs(out - ref)))
        assert err < tol, (B_mode, P_block, err)

    print("KERNEL_OK")
</pallas_src>

<mosaic_0001>
module attributes {stable_mosaic.version = 11 : i64} {
  func.func @_bn_stats_kernel(%arg0: i32, %arg1: memref<512x128xf32, #tpu.memory_space<vmem>>, %arg2: memref<2x128xf32, #tpu.memory_space<vmem>>) attributes {dimension_semantics = [#tpu.dimension_semantics<arbitrary>], iteration_bounds = array<i64: 1>, scalar_prefetch = 0 : i64, scratch_operands = 0 : i64, tpu.core_type = #tpu.core_type<tc>, window_params = [{transform_indices = @transform_0, window_bounds = array<i64: 512, 128>}, {pipeline_mode = #tpu.pipeline_mode<synchronous>, transform_indices = @transform_1, window_bounds = array<i64: 2, 128>}]} {
    %c0 = arith.constant 0 : index
    %c0_0 = arith.constant 0 : index
    %0 = vector.load %arg1[%c0, %c0_0] : memref<512x128xf32, #tpu.memory_space<vmem>>, vector<512x128xf32>
    %cst = arith.constant dense<0.000000e+00> : vector<128xf32>
    %1 = vector.multi_reduction <add>, %0, %cst [0] : vector<512x128xf32> to vector<128xf32>
    %2 = vector.shape_cast %1 : vector<128xf32> to vector<1x128xf32>
    %3 = arith.mulf %0, %0 : vector<512x128xf32>
    %cst_1 = arith.constant dense<0.000000e+00> : vector<128xf32>
    %4 = vector.multi_reduction <add>, %3, %cst_1 [0] : vector<512x128xf32> to vector<128xf32>
    %5 = vector.shape_cast %4 : vector<128xf32> to vector<1x128xf32>
    %6 = tpu.concatenate %2, %5 in 0 : vector<1x128xf32>, vector<1x128xf32> -> vector<2x128xf32>
    %c0_i32 = arith.constant 0 : i32
    %7 = arith.cmpi eq, %arg0, %c0_i32 : i32
    %8 = arith.extui %7 : i1 to i32
    %c0_i32_2 = arith.constant 0 : i32
    %9 = arith.cmpi ne, %8, %c0_i32_2 : i32
    scf.if %9 {
      %c0_5 = arith.constant 0 : index
      %c0_6 = arith.constant 0 : index
      %13 = vector.load %arg2[%c0_5, %c0_6] : memref<2x128xf32, #tpu.memory_space<vmem>>, vector<2x128xf32>
      tpu.vector_store %arg2[%c0_5, %c0_6], %6 {strides = array<i32>} : memref<2x128xf32, #tpu.memory_space<vmem>>, vector<2x128xf32>,
    } else {
    }
    %c0_i32_3 = arith.constant 0 : i32
    %10 = arith.cmpi ne, %arg0, %c0_i32_3 : i32
    %11 = arith.extui %10 : i1 to i32
    %c0_i32_4 = arith.constant 0 : i32
    %12 = arith.cmpi ne, %11, %c0_i32_4 : i32
    scf.if %12 {
      %c0_5 = arith.constant 0 : index
      %c0_6 = arith.constant 0 : index
      %13 = vector.load %arg2[%c0_5, %c0_6] : memref<2x128xf32, #tpu.memory_space<vmem>>, vector<2x128xf32>
      %14 = arith.addf %13, %6 : vector<2x128xf32>
      %c0_7 = arith.constant 0 : index
      %c0_8 = arith.constant 0 : index
      %15 = vector.load %arg2[%c0_7, %c0_8] : memref<2x128xf32, #tpu.memory_space<vmem>>, vector<2x128xf32>
      tpu.vector_store %arg2[%c0_7, %c0_8], %14 {strides = array<i32>} : memref<2x128xf32, #tpu.memory_space<vmem>>, vector<2x128xf32>,
    } else {
    }
    return
  }
  func.func @transform_0(%arg0: i32) -> (i32, i32) {
    %c0_i32 = arith.constant 0 : i32
    %c0_i32_0 = arith.constant 0 : i32
    return %arg0, %c0_i32 : i32, i32
  }
  func.func @transform_1(%arg0: i32) -> (i32, i32) {
    %c0_i32 = arith.constant 0 : i32
    %c0_i32_0 = arith.constant 0 : i32
    %c0_i32_1 = arith.constant 0 : i32
    return %c0_i32, %c0_i32_0 : i32, i32
  }
}

module attributes {stable_mosaic.version = 11 : i64} {
  func.func @_bn_relu_conv1x1_kernel(%arg0: i32, %arg1: memref<512x128xf32, #tpu.memory_space<vmem>>, %arg2: memref<1x128xf32, #tpu.memory_space<vmem>>, %arg3: memref<1x128xf32, #tpu.memory_space<vmem>>, %arg4: memref<128x128xbf16, #tpu.memory_space<vmem>>, %arg5: memref<1x128xf32, #tpu.memory_space<vmem>>, %arg6: memref<512x128xbf16, #tpu.memory_space<vmem>>, %arg7: memref<2x128xf32, #tpu.memory_space<vmem>>) attributes {dimension_semantics = [#tpu.dimension_semantics<arbitrary>], iteration_bounds = array<i64: 1>, scalar_prefetch = 0 : i64, scratch_operands = 0 : i64, tpu.core_type = #tpu.core_type<tc>, window_params = [{transform_indices = @transform_0, window_bounds = array<i64: 512, 128>}, {pipeline_mode = #tpu.pipeline_mode<synchronous>, transform_indices = @transform_1, window_bounds = array<i64: 1, 128>}, {pipeline_mode = #tpu.pipeline_mode<synchronous>, transform_indices = @transform_2, window_bounds = array<i64: 1, 128>}, {pipeline_mode = #tpu.pipeline_mode<synchronous>, transform_indices = @transform_3, window_bounds = array<i64: 128, 128>}, {pipeline_mode = #tpu.pipeline_mode<synchronous>, transform_indices = @transform_4, window_bounds = array<i64: 1, 128>}, {transform_indices = @transform_5, window_bounds = array<i64: 512, 128>}, {pipeline_mode = #tpu.pipeline_mode<synchronous>, transform_indices = @transform_6, window_bounds = array<i64: 2, 128>}]} {
    %c0 = arith.constant 0 : index
    %c0_0 = arith.constant 0 : index
    %0 = vector.load %arg1[%c0, %c0_0] : memref<512x128xf32, #tpu.memory_space<vmem>>, vector<512x128xf32>
    %c0_1 = arith.constant 0 : index
    %c0_2 = arith.constant 0 : index
    %1 = vector.load %arg2[%c0_1, %c0_2] : memref<1x128xf32, #tpu.memory_space<vmem>>, vector<1x128xf32>
    %2 = vector.broadcast %1 : vector<1x128xf32> to vector<512x128xf32>
    %3 = arith.mulf %0, %2 : vector<512x128xf32>
    %c0_3 = arith.constant 0 : index
    %c0_4 = arith.constant 0 : index
    %4 = vector.load %arg3[%c0_3, %c0_4] : memref<1x128xf32, #tpu.memory_space<vmem>>, vector<1x128xf32>
    %5 = vector.broadcast %4 : vector<1x128xf32> to vector<512x128xf32>
    %6 = arith.addf %3, %5 : vector<512x128xf32>
    %cst = arith.constant 0.000000e+00 : f32
    %7 = vector.broadcast %cst : f32 to vector<512x128xf32>
    %8 = arith.maximumf %6, %7 : vector<512x128xf32>
    %9 = arith.truncf %8 : vector<512x128xf32> to vector<512x128xbf16>
    %c0_5 = arith.constant 0 : index
    %c0_6 = arith.constant 0 : index
    %10 = vector.load %arg4[%c0_5, %c0_6] : memref<128x128xbf16, #tpu.memory_space<vmem>>, vector<128x128xbf16>
    %cst_7 = arith.constant dense<0.000000e+00> : vector<512x128xf32>
    %11 = tpu.matmul %9, %10, %cst_7 {dimension_numbers = #tpu.dot_dimension_numbers<[1], [0], [0], [1], [0, 0, 1, 1], [], []>} : vector<512x128xbf16>, vector<128x128xbf16>, vector<512x128xf32> -> vector<512x128xf32>
    %c0_8 = arith.constant 0 : index
    %c0_9 = arith.constant 0 : index
    %12 = vector.load %arg5[%c0_8, %c0_9] : memref<1x128xf32, #tpu.memory_space<vmem>>, vector<1x128xf32>
    %13 = vector.broadcast %12 : vector<1x128xf32> to vector<512x128xf32>
    %14 = arith.addf %11, %13 : vector<512x128xf32>
    %15 = arith.truncf %14 : vector<512x128xf32> to vector<512x128xbf16>
    %c0_10 = arith.constant 0 : index
    %c0_11 = arith.constant 0 : index
    %16 = vector.load %arg6[%c0_10, %c0_11] : memref<512x128xbf16, #tpu.memory_space<vmem>>, vector<512x128xbf16>
    tpu.vector_store %arg6[%c0_10, %c0_11], %15 {strides = array<i32>} : memref<512x128xbf16, #tpu.memory_space<vmem>>, vector<512x128xbf16>,
    %cst_12 = arith.constant dense<0.000000e+00> : vector<128xf32>
    %17 = vector.multi_reduction <add>, %14, %cst_12 [0] : vector<512x128xf32> to vector<128xf32>
    %18 = vector.shape_cast %17 : vector<128xf32> to vector<1x128xf32>
    %19 = arith.mulf %14, %14 : vector<512x128xf32>
    %cst_13 = arith.constant dense<0.000000e+00> : vector<128xf32>
    %20 = vector.multi_reduction <add>, %19, %cst_13 [0] : vector<512x128xf32> to vector<128xf32>
    %21 = vector.shape_cast %20 : vector<128xf32> to vector<1x128xf32>
    %22 = tpu.concatenate %18, %21 in 0 : vector<1x128xf32>, vector<1x128xf32> -> vector<2x128xf32>
    %c0_i32 = arith.constant 0 : i32
    %23 = arith.cmpi eq, %arg0, %c0_i32 : i32
    %24 = arith.extui %23 : i1 to i32
    %c0_i32_14 = arith.constant 0 : i32
    %25 = arith.cmpi ne, %24, %c0_i32_14 : i32
    scf.if %25 {
      %c0_17 = arith.constant 0 : index
      %c0_18 = arith.constant 0 : index
      %29 = vector.load %arg7[%c0_17, %c0_18] : memref<2x128xf32, #tpu.memory_space<vmem>>, vector<2x128xf32>
      tpu.vector_store %arg7[%c0_17, %c0_18], %22 {strides = array<i32>} : memref<2x128xf32, #tpu.memory_space<vmem>>, vector<2x128xf32>,
    } else {
    }
    %c0_i32_15 = arith.constant 0 : i32
    %26 = arith.cmpi ne, %arg0, %c0_i32_15 : i32
    %27 = arith.extui %26 : i1 to i32
    %c0_i32_16 = arith.constant 0 : i32
    %28 = arith.cmpi ne, %27, %c0_i32_16 : i32
    scf.if %28 {
      %c0_17 = arith.constant 0 : index
      %c0_18 = arith.constant 0 : index
      %29 = vector.load %arg7[%c0_17, %c0_18] : memref<2x128xf32, #tpu.memory_space<vmem>>, vector<2x128xf32>
      %30 = arith.addf %29, %22 : vector<2x128xf32>
      %c0_19 = arith.constant 0 : index
      %c0_20 = arith.constant 0 : index
      %31 = vector.load %arg7[%c0_19, %c0_20] : memref<2x128xf32, #tpu.memory_space<vmem>>, vector<2x128xf32>
      tpu.vector_store %arg7[%c0_19, %c0_20], %30 {strides = array<i32>} : memref<2x128xf32, #tpu.memory_space<vmem>>, vector<2x128xf32>,
    } else {
    }
    return
  }
  func.func @transform_0(%arg0: i32) -> (i32, i32) {
    %c0_i32 = arith.constant 0 : i32
    %c0_i32_0 = arith.constant 0 : i32
    return %arg0, %c0_i32 : i32, i32
  }
  func.func @transform_1(%arg0: i32) -> (i32, i32) {
    %c0_i32 = arith.constant 0 : i32
    %c0_i32_0 = arith.constant 0 : i32
    %c0_i32_1 = arith.constant 0 : i32
    return %c0_i32, %c0_i32_0 : i32, i32
  }
  func.func @transform_2(%arg0: i32) -> (i32, i32) {
    %c0_i32 = arith.constant 0 : i32
    %c0_i32_0 = arith.constant 0 : i32
    %c0_i32_1 = arith.constant 0 : i32
    return %c0_i32, %c0_i32_0 : i32, i32
  }
  func.func @transform_3(%arg0: i32) -> (i32, i32) {
    %c0_i32 = arith.constant 0 : i32
    %c0_i32_0 = arith.constant 0 : i32
    %c0_i32_1 = arith.constant 0 : i32
    return %c0_i32, %c0_i32_0 : i32, i32
  }
  func.func @transform_4(%arg0: i32) -> (i32, i32) {
    %c0_i32 = arith.constant 0 : i32
    %c0_i32_0 = arith.constant 0 : i32
    %c0_i32_1 = arith.constant 0 : i32
    return %c0_i32, %c0_i32_0 : i32, i32
  }
  func.func @transform_5(%arg0: i32) -> (i32, i32) {
    %c0_i32 = arith.constant 0 : i32
    %c0_i32_0 = arith.constant 0 : i32
    return %arg0, %c0_i32 : i32, i32
  }
  func.func @transform_6(%arg0: i32) -> (i32, i32) {
    %c0_i32 = arith.constant 0 : i32
    %c0_i32_0 = arith.constant 0 : i32
    %c0_i32_1 = arith.constant 0 : i32
    return %c0_i32, %c0_i32_0 : i32, i32
  }
}

module attributes {stable_mosaic.version = 11 : i64} {
  func.func @kernel(%arg0: i32, %arg1: i32, %arg2: memref<1x18x18x128xbf16, #tpu.memory_space<vmem>>, %arg3: memref<1x128xf32, #tpu.memory_space<vmem>>, %arg4: memref<1x128xf32, #tpu.memory_space<vmem>>, %arg5: memref<1152x128xbf16, #tpu.memory_space<vmem>>, %arg6: memref<1x128xf32, #tpu.memory_space<vmem>>, %arg7: memref<128x128xf32, #tpu.memory_space<vmem>>) attributes {dimension_semantics = [#tpu.dimension_semantics<parallel>, #tpu.dimension_semantics<parallel>], iteration_bounds = array<i64: 2, 2>, scalar_prefetch = 0 : i64, scratch_operands = 0 : i64, tpu.core_type = #tpu.core_type<tc>, window_params = [{transform_indices = @transform_0, window_bounds = array<i64: 1, 18, 18, 128>}, {pipeline_mode = #tpu.pipeline_mode<synchronous>, transform_indices = @transform_1, window_bounds = array<i64: 1, 128>}, {pipeline_mode = #tpu.pipeline_mode<synchronous>, transform_indices = @transform_2, window_bounds = array<i64: 1, 128>}, {pipeline_mode = #tpu.pipeline_mode<synchronous>, transform_indices = @transform_3, window_bounds = array<i64: 1152, 128>}, {pipeline_mode = #tpu.pipeline_mode<synchronous>, transform_indices = @transform_4, window_bounds = array<i64: 1, 128>}, {transform_indices = @transform_5, window_bounds = array<i64: 128, 128>}]} {
    %c8_i32 = arith.constant 8 : i32
    %0 = arith.muli %arg1, %c8_i32 : i32
    %1 = tpu.assume_multiple %0, 8 : i32
    %c0 = arith.constant 0 : index
    %2 = arith.index_cast %1 : i32 to index
    %c0_0 = arith.constant 0 : index
    %c0_1 = arith.constant 0 : index
    %3 = vector.load %arg2[%c0, %2, %c0_0, %c0_1] : memref<1x18x18x128xbf16, #tpu.memory_space<vmem>>, vector<1x10x18x128xbf16>
    %4 = vector.shape_cast %3 : vector<1x10x18x128xbf16> to vector<10x18x128xbf16>
    %5 = arith.extf %4 : vector<10x18x128xbf16> to vector<10x18x128xf32>
    %c0_2 = arith.constant 0 : index
    %c0_3 = arith.constant 0 : index
    %6 = vector.load %arg3[%c0_2, %c0_3] : memref<1x128xf32, #tpu.memory_space<vmem>>, vector<1x128xf32>
    %7 = vector.shape_cast %6 : vector<1x128xf32> to vector<1x1x128xf32>
    %8 = vector.broadcast %7 : vector<1x1x128xf32> to vector<10x18x128xf32>
    %9 = arith.mulf %5, %8 : vector<10x18x128xf32>
    %c0_4 = arith.constant 0 : index
    %c0_5 = arith.constant 0 : index
    %10 = vector.load %arg4[%c0_4, %c0_5] : memref<1x128xf32, #tpu.memory_space<vmem>>, vector<1x128xf32>
    %11 = vector.shape_cast %10 : vector<1x128xf32> to vector<1x1x128xf32>
    %12 = vector.broadcast %11 : vector<1x1x128xf32> to vector<10x18x128xf32>
    %13 = arith.addf %9, %12 : vector<10x18x128xf32>
    %cst = arith.constant 0.000000e+00 : f32
    %14 = vector.broadcast %cst : f32 to vector<10x18x128xf32>
    %15 = arith.maximumf %13, %14 : vector<10x18x128xf32>
    %c0_i32 = arith.constant 0 : i32
    %16 = arith.cmpi eq, %arg1, %c0_i32 : i32
    %c1_i32 = arith.constant 1 : i32
    %17 = arith.cmpi eq, %arg1, %c1_i32 : i32
    %18 = tpu.iota {dimensions = array<i32: 0>} : vector<10x18x1xi32>
    %19 = tpu.iota {dimensions = array<i32: 1>} : vector<10x18x1xi32>
    %c1_i32_6 = arith.constant 1 : i32
    %20 = vector.broadcast %c1_i32_6 : i32 to vector<10x18x1xi32>
    %21 = arith.cmpi slt, %19, %20 : vector<10x18x1xi32>
    %c16_i32 = arith.constant 16 : i32
    %22 = vector.broadcast %c16_i32 : i32 to vector<10x18x1xi32>
    %23 = arith.cmpi sgt, %19, %22 : vector<10x18x1xi32>
    %24 = arith.ori %21, %23 : vector<10x18x1xi1>
    %c0_i32_7 = arith.constant 0 : i32
    %25 = vector.broadcast %c0_i32_7 : i32 to vector<10x18x1xi32>
    %26 = arith.cmpi eq, %18, %25 : vector<10x18x1xi32>
    %27 = vector.broadcast %16 : i1 to vector<10x18x1xi1>
    %28 = arith.andi %26, %27 : vector<10x18x1xi1>
    %29 = arith.ori %24, %28 : vector<10x18x1xi1>
    %c9_i32 = arith.constant 9 : i32
    %30 = vector.broadcast %c9_i32 : i32 to vector<10x18x1xi32>
    %31 = arith.cmpi eq, %18, %30 : vector<10x18x1xi32>
    %32 = vector.broadcast %17 : i1 to vector<10x18x1xi1>
    %33 = arith.andi %31, %32 : vector<10x18x1xi1>
    %34 = arith.ori %29, %33 : vector<10x18x1xi1>
    %cst_8 = arith.constant 0.000000e+00 : f32
    %35 = vector.shape_cast %34 : vector<10x18x1xi1> to vector<10x18x1xi1>
    %36 = vector.broadcast %35 : vector<10x18x1xi1> to vector<10x18x128xi1>
    %37 = vector.broadcast %cst_8 : f32 to vector<10x18x128xf32>
    %38 = arith.select %36, %37, %15 : vector<10x18x128xi1>, vector<10x18x128xf32>
    %39 = arith.truncf %38 : vector<10x18x128xf32> to vector<10x18x128xbf16>
    %40 = vector.extract_strided_slice %39 {offsets = [0, 0, 0], sizes = [8, 16, 128], strides = [1, 1, 1]} : vector<10x18x128xbf16> to vector<8x16x128xbf16>
    %41 = vector.extract_strided_slice %39 {offsets = [0, 1, 0], sizes = [8, 16, 128], strides = [1, 1, 1]} : vector<10x18x128xbf16> to vector<8x16x128xbf16>
    %42 = vector.extract_strided_slice %39 {offsets = [0, 2, 0], sizes = [8, 16, 128], strides = [1, 1, 1]} : vector<10x18x128xbf16> to vector<8x16x128xbf16>
    %43 = vector.extract_strided_slice %39 {offsets = [1, 0, 0], sizes = [8, 16, 128], strides = [1, 1, 1]} : vector<10x18x128xbf16> to vector<8x16x128xbf16>
    %44 = vector.extract_strided_slice %39 {offsets = [1, 1, 0], sizes = [8, 16, 128], strides = [1, 1, 1]} : vector<10x18x128xbf16> to vector<8x16x128xbf16>
    %45 = vector.extract_strided_slice %39 {offsets = [1, 2, 0], sizes = [8, 16, 128], strides = [1, 1, 1]} : vector<10x18x128xbf16> to vector<8x16x128xbf16>
    %46 = vector.extract_strided_slice %39 {offsets = [2, 0, 0], sizes = [8, 16, 128], strides = [1, 1, 1]} : vector<10x18x128xbf16> to vector<8x16x128xbf16>
    %47 = vector.extract_strided_slice %39 {offsets = [2, 1, 0], sizes = [8, 16, 128], strides = [1, 1, 1]} : vector<10x18x128xbf16> to vector<8x16x128xbf16>
    %48 = vector.extract_strided_slice %39 {offsets = [2, 2, 0], sizes = [8, 16, 128], strides = [1, 1, 1]} : vector<10x18x128xbf16> to vector<8x16x128xbf16>
    %49 = tpu.concatenate %40, %41, %42, %43, %44, %45, %46, %47, %48 in 2 : vector<8x16x128xbf16>, vector<8x16x128xbf16>, vector<8x16x128xbf16>, vector<8x16x128xbf16>, vector<8x16x128xbf16>, vector<8x16x128xbf16>, vector<8x16x128xbf16>, vector<8x16x128xbf16>, vector<8x16x128xbf16> -> vector<8x16x1152xbf16>
    %50 = vector.shape_cast %49 : vector<8x16x1152xbf16> to vector<128x1152xbf16>
    %c0_9 = arith.constant 0 : index
    %c0_10 = arith.constant 0 : index
    %51 = vector.load %arg5[%c0_9, %c0_10] : memref<1152x128xbf16, #tpu.memory_space<vmem>>, vector<1152x128xbf16>
    %cst_11 = arith.constant dense<0.000000e+00> : vector<128x128xf32>
    %52 = tpu.matmul %50, %51, %cst_11 {dimension_numbers = #tpu.dot_dimension_numbers<[1], [0], [0], [1], [0, 0, 1, 1], [], []>} : vector<128x1152xbf16>, vector<1152x128xbf16>, vector<128x128xf32> -> vector<128x128xf32>
    %c0_12 = arith.constant 0 : index
    %c0_13 = arith.constant 0 : index
    %53 = vector.load %arg6[%c0_12, %c0_13] : memref<1x128xf32, #tpu.memory_space<vmem>>, vector<1x128xf32>
    %54 = vector.broadcast %53 : vector<1x128xf32> to vector<128x128xf32>
    %55 = arith.addf %52, %54 : vector<128x128xf32>
    %c0_14 = arith.constant 0 : index
    %c0_15 = arith.constant 0 : index
    %56 = vector.load %arg7[%c0_14, %c0_15] : memref<128x128xf32, #tpu.memory_space<vmem>>, vector<128x128xf32>
    tpu.vector_store %arg7[%c0_14, %c0_15], %55 {strides = array<i32>} : memref<128x128xf32, #tpu.memory_space<vmem>>, vector<128x128xf32>,
    return
  }
  func.func @transform_0(%arg0: i32, %arg1: i32) -> (i32, i32, i32, i32) {
    %c0_i32 = arith.constant 0 : i32
    %c0_i32_0 = arith.constant 0 : i32
    %c0_i32_1 = arith.constant 0 : i32
    %c0_i32_2 = arith.constant 0 : i32
    return %arg0, %c0_i32, %c0_i32_0, %c0_i32_1 : i32, i32, i32, i32
  }
  func.func @transform_1(%arg0: i32, %arg1: i32) -> (i32, i32) {
    %c0_i32 = arith.constant 0 : i32
    %c0_i32_0 = arith.constant 0 : i32
    %c0_i32_1 = arith.constant 0 : i32
    return %c0_i32, %c0_i32_0 : i32, i32
  }
  func.func @transform_2(%arg0: i32, %arg1: i32) -> (i32, i32) {
    %c0_i32 = arith.constant 0 : i32
    %c0_i32_0 = arith.constant 0 : i32
    %c0_i32_1 = arith.constant 0 : i32
    return %c0_i32, %c0_i32_0 : i32, i32
  }
  func.func @transform_3(%arg0: i32, %arg1: i32) -> (i32, i32) {
    %c0_i32 = arith.constant 0 : i32
    %c0_i32_0 = arith.constant 0 : i32
    %c0_i32_1 = arith.constant 0 : i32
    return %c0_i32, %c0_i32_0 : i32, i32
  }
  func.func @transform_4(%arg0: i32, %arg1: i32) -> (i32, i32) {
    %c0_i32 = arith.constant 0 : i32
    %c0_i32_0 = arith.constant 0 : i32
    %c0_i32_1 = arith.constant 0 : i32
    return %c0_i32, %c0_i32_0 : i32, i32
  }
  func.func @transform_5(%arg0: i32, %arg1: i32) -> (i32, i32) {
    %c2_i32 = arith.constant 2 : i32
    %0 = arith.muli %arg0, %c2_i32 : i32
    %1 = arith.addi %0, %arg1 : i32
    %c0_i32 = arith.constant 0 : i32
    %c0_i32_0 = arith.constant 0 : i32
    return %1, %c0_i32 : i32, i32
  }
}

</mosaic_0001>

<bundles_post_ra>
// kernel: bottleneck_forward.3
= control target key start
LH: loop header
LB: loop body
LE: loop exit
PB: predicated region body
PF: predicated region fallthrough
CT: control target
= control target key end

     0   :  { %vm274_vm0 = vcmask 1040384   ;;  %s497_s0 = inlined_call_operand.vmem [shape: f32[512,128], index: 0, kind: input, shape index: {}]   ;;  %s498_s1 = inlined_call_operand.vmem [shape: f32[2,128], index: 1, kind: output, shape index: {}]  }
   0x1   :  { %v8_v0 = vld [vmem:[%s497_s0] sm:$0xff]  ;;  %v9_v1 = vld [vmem:[%s497_s0 + $0x8] sm:$0xff]  ;;  %v10_v2 = vld [vmem:[%s497_s0 + $0x10] sm:$0xff] }
   0x2   :  { %v11_v3 = vld [vmem:[%s497_s0 + $0x18] sm:$0xff]  ;;  %v72_v4 = vadd.f32 %v9_v1, %v8_v0  ;;  %v141_v5 = vmul.f32 %v8_v0, %v8_v0  ;;  %v142_v6 = vmul.f32 %v9_v1, %v9_v1  ;;  %v143_v7 = vmul.f32 %v10_v2, %v10_v2  ;;  %v12_v8 = vld [vmem:[%s497_s0 + $0x20] sm:$0xff]  ;;  %v13_v12 = vld [vmem:[%s497_s0 + $0x28] sm:$0xff] }
   0x3   :  { %v144_v10 = vmul.f32 %v11_v3, %v11_v3  ;;  %v145_v14 = vmul.f32 %v12_v8, %v12_v8  ;;  %v14_v16 = vld [vmem:[%s497_s0 + $0x30] sm:$0xff]  ;;  %v146_v18 = vmul.f32 %v13_v12, %v13_v12  ;;  %v15_v20 = vld [vmem:[%s497_s0 + $0x38] sm:$0xff]  ;;  %v16_v24 = vld [vmem:[%s497_s0 + $0x40] sm:$0xff] }
   0x4   :  { %v73_v9 = vadd.f32 %v72_v4, %v10_v2  ;;  %v205_v11 = vadd.f32 %v142_v6, %v141_v5  ;;  %v147_v22 = vmul.f32 %v14_v16, %v14_v16  ;;  %v148_v26 = vmul.f32 %v15_v20, %v15_v20  ;;  %v17_v28 = vld [vmem:[%s497_s0 + $0x48] sm:$0xff]  ;;  %v18_v32 = vld [vmem:[%s497_s0 + $0x50] sm:$0xff]  ;;  %v19_v36 = vld [vmem:[%s497_s0 + $0x58] sm:$0xff] }
   0x5   :  { %v149_v30 = vmul.f32 %v16_v24, %v16_v24  ;;  %v150_v34 = vmul.f32 %v17_v28, %v17_v28  ;;  %v151_v38 = vmul.f32 %v18_v32, %v18_v32  ;;  %v20_v40 = vld [vmem:[%s497_s0 + $0x60] sm:$0xff]  ;;  %v152_v42 = vmul.f32 %v19_v36, %v19_v36  ;;  %v21_v44 = vld [vmem:[%s497_s0 + $0x68] sm:$0xff]  ;;  %v22_v48 = vld [vmem:[%s497_s0 + $0x70] sm:$0xff] }
   0x6   :  { %v74_v13 = vadd.f32 %v73_v9, %v11_v3  ;;  %v206_v15 = vadd.f32 %v205_v11, %v143_v7  ;;  %v153_v46 = vmul.f32 %v20_v40, %v20_v40  ;;  %v154_v50 = vmul.f32 %v21_v44, %v21_v44  ;;  %v23_v52 = vld [vmem:[%s497_s0 + $0x78] sm:$0xff]  ;;  %v24_v56 = vld [vmem:[%s497_s0 + $0x80] sm:$0xff]  ;;  %v25_v60 = vld [vmem:[%s497_s0 + $0x88] sm:$0xff] }
   0x7   :  { %v155_v54 = vmul.f32 %v22_v48, %v22_v48  ;;  %v156_v58 = vmul.f32 %v23_v52, %v23_v52  ;;  %v157_v62 = vmul.f32 %v24_v56, %v24_v56  ;;  %v26_v0 = vld [vmem:[%s497_s0 + $0x90] sm:$0xff]  ;;  %v158_v2 = vmul.f32 %v25_v60, %v25_v60  ;;  %v27_v4 = vld [vmem:[%s497_s0 + $0x98] sm:$0xff] }
   0x8   :  { %v75_v17 = vadd.f32 %v74_v13, %v12_v8  ;;  %v207_v19 = vadd.f32 %v206_v15, %v144_v10  ;;  %v159_v6 = vmul.f32 %v26_v0, %v26_v0  ;;  %v28_v8 = vld [vmem:[%s497_s0 + $0xa0] sm:$0xff]  ;;  %v160_v10 = vmul.f32 %v27_v4, %v27_v4 }
   0xa   :  { %v76_v21 = vadd.f32 %v75_v17, %v13_v12  ;;  %v208_v23 = vadd.f32 %v207_v19, %v145_v14  ;;  %v29_v12 = vld [vmem:[%s497_s0 + $0xa8] sm:$0xff]  ;;  %v161_v14 = vmul.f32 %v28_v8, %v28_v8 }
   0xc   :  { %v77_v25 = vadd.f32 %v76_v21, %v14_v16  ;;  %v209_v27 = vadd.f32 %v208_v23, %v146_v18  ;;  %v30_v16 = vld [vmem:[%s497_s0 + $0xb0] sm:$0xff]  ;;  %v162_v18 = vmul.f32 %v29_v12, %v29_v12 }
   0xe   :  { %v78_v29 = vadd.f32 %v77_v25, %v15_v20  ;;  %v210_v31 = vadd.f32 %v209_v27, %v147_v22  ;;  %v31_v20 = vld [vmem:[%s497_s0 + $0xb8] sm:$0xff]  ;;  %v163_v22 = vmul.f32 %v30_v16, %v30_v16 }
  0x10   :  { %v79_v33 = vadd.f32 %v78_v29, %v16_v24  ;;  %v211_v35 = vadd.f32 %v210_v31, %v148_v26  ;;  %v32_v24 = vld [vmem:[%s497_s0 + $0xc0] sm:$0xff]  ;;  %v164_v26 = vmul.f32 %v31_v20, %v31_v20 }
  0x12   :  { %v80_v37 = vadd.f32 %v79_v33, %v17_v28  ;;  %v212_v39 = vadd.f32 %v211_v35, %v149_v30  ;;  %v33_v28 = vld [vmem:[%s497_s0 + $0xc8] sm:$0xff]  ;;  %v165_v30 = vmul.f32 %v32_v24, %v32_v24 }
  0x14   :  { %v81_v41 = vadd.f32 %v80_v37, %v18_v32  ;;  %v213_v43 = vadd.f32 %v212_v39, %v150_v34  ;;  %v34_v32 = vld [vmem:[%s497_s0 + $0xd0] sm:$0xff]  ;;  %v166_v34 = vmul.f32 %v33_v28, %v33_v28 }
  0x16   :  { %v82_v45 = vadd.f32 %v81_v41, %v19_v36  ;;  %v214_v47 = vadd.f32 %v213_v43, %v151_v38  ;;  %v35_v36 = vld [vmem:[%s497_s0 + $0xd8] sm:$0xff]  ;;  %v167_v38 = vmul.f32 %v34_v32, %v34_v32 }
  0x18   :  { %v83_v49 = vadd.f32 %v82_v45, %v20_v40  ;;  %v215_v51 = vadd.f32 %v214_v47, %v152_v42  ;;  %v36_v40 = vld [vmem:[%s497_s0 + $0xe0] sm:$0xff]  ;;  %v168_v42 = vmul.f32 %v35_v36, %v35_v36 }
  0x1a   :  { %v84_v53 = vadd.f32 %v83_v49, %v21_v44  ;;  %v216_v55 = vadd.f32 %v215_v51, %v153_v46  ;;  %v37_v44 = vld [vmem:[%s497_s0 + $0xe8] sm:$0xff]  ;;  %v169_v46 = vmul.f32 %v36_v40, %v36_v40 }
  0x1c   :  { %v85_v57 = vadd.f32 %v84_v53, %v22_v48  ;;  %v217_v59 = vadd.f32 %v216_v55, %v154_v50  ;;  %v38_v48 = vld [vmem:[%s497_s0 + $0xf0] sm:$0xff]  ;;  %v170_v50 = vmul.f32 %v37_v44, %v37_v44 }
  0x1e   :  { %v86_v61 = vadd.f32 %v85_v57, %v23_v52  ;;  %v218_v63 = vadd.f32 %v217_v59, %v155_v54  ;;  %v39_v52 = vld [vmem:[%s497_s0 + $0xf8] sm:$0xff]  ;;  %v171_v54 = vmul.f32 %v38_v48, %v38_v48 }
  0x20   :  { %v87_v1 = vadd.f32 %v86_v61, %v24_v56  ;;  %v219_v3 = vadd.f32 %v218_v63, %v156_v58  ;;  %v40_v56 = vld [vmem:[%s497_s0 + $0x100] sm:$0xff]  ;;  %v172_v58 = vmul.f32 %v39_v52, %v39_v52 }
  0x22   :  { %v88_v5 = vadd.f32 %v87_v1, %v25_v60  ;;  %v220_v7 = vadd.f32 %v219_v3, %v157_v62  ;;  %v41_v60 = vld [vmem:[%s497_s0 + $0x108] sm:$0xff]  ;;  %v173_v62 = vmul.f32 %v40_v56, %v40_v56 }
  0x24   :  { %v89_v9 = vadd.f32 %v88_v5, %v26_v0  ;;  %v221_v11 = vadd.f32 %v220_v7, %v158_v2  ;;  %v42_v0 = vld [vmem:[%s497_s0 + $0x110] sm:$0xff]  ;;  %v174_v2 = vmul.f32 %v41_v60, %v41_v60 }
  0x26   :  { %v90_v13 = vadd.f32 %v89_v9, %v27_v4  ;;  %v222_v15 = vadd.f32 %v221_v11, %v159_v6  ;;  %v43_v4 = vld [vmem:[%s497_s0 + $0x118] sm:$0xff]  ;;  %v175_v6 = vmul.f32 %v42_v0, %v42_v0 }
  0x28   :  { %v91_v17 = vadd.f32 %v90_v13, %v28_v8  ;;  %v223_v19 = vadd.f32 %v222_v15, %v160_v10  ;;  %v44_v8 = vld [vmem:[%s497_s0 + $0x120] sm:$0xff]  ;;  %v176_v10 = vmul.f32 %v43_v4, %v43_v4 }
  0x2a   :  { %v92_v21 = vadd.f32 %v91_v17, %v29_v12  ;;  %v224_v23 = vadd.f32 %v223_v19, %v161_v14  ;;  %v45_v12 = vld [vmem:[%s497_s0 + $0x128] sm:$0xff]  ;;  %v177_v14 = vmul.f32 %v44_v8, %v44_v8 }
  0x2c   :  { %v93_v25 = vadd.f32 %v92_v21, %v30_v16  ;;  %v225_v27 = vadd.f32 %v224_v23, %v162_v18  ;;  %v46_v16 = vld [vmem:[%s497_s0 + $0x130] sm:$0xff]  ;;  %v178_v18 = vmul.f32 %v45_v12, %v45_v12 }
  0x2e   :  { %v94_v29 = vadd.f32 %v93_v25, %v31_v20  ;;  %v226_v31 = vadd.f32 %v225_v27, %v163_v22  ;;  %v47_v20 = vld [vmem:[%s497_s0 + $0x138] sm:$0xff]  ;;  %v179_v22 = vmul.f32 %v46_v16, %v46_v16 }
  0x30   :  { %v95_v33 = vadd.f32 %v94_v29, %v32_v24  ;;  %v227_v35 = vadd.f32 %v226_v31, %v164_v26  ;;  %v48_v24 = vld [vmem:[%s497_s0 + $0x140] sm:$0xff]  ;;  %v180_v26 = vmul.f32 %v47_v20, %v47_v20 }
  0x32   :  { %v96_v37 = vadd.f32 %v95_v33, %v33_v28  ;;  %v228_v39 = vadd.f32 %v227_v35, %v165_v30  ;;  %v49_v28 = vld [vmem:[%s497_s0 + $0x148] sm:$0xff]  ;;  %v181_v30 = vmul.f32 %v48_v24, %v48_v24 }
  0x34   :  { %v97_v41 = vadd.f32 %v96_v37, %v34_v32  ;;  %v229_v43 = vadd.f32 %v228_v39, %v166_v34  ;;  %v50_v32 = vld [vmem:[%s497_s0 + $0x150] sm:$0xff]  ;;  %v182_v34 = vmul.f32 %v49_v28, %v49_v28 }
  0x36   :  { %v98_v45 = vadd.f32 %v97_v41, %v35_v36  ;;  %v230_v47 = vadd.f32 %v229_v43, %v167_v38  ;;  %v51_v36 = vld [vmem:[%s497_s0 + $0x158] sm:$0xff]  ;;  %v183_v38 = vmul.f32 %v50_v32, %v50_v32 }
  0x38   :  { %v99_v49 = vadd.f32 %v98_v45, %v36_v40  ;;  %v231_v51 = vadd.f32 %v230_v47, %v168_v42  ;;  %v52_v40 = vld [vmem:[%s497_s0 + $0x160] sm:$0xff]  ;;  %v184_v42 = vmul.f32 %v51_v36, %v51_v36 }
  0x3a   :  { %v100_v53 = vadd.f32 %v99_v49, %v37_v44  ;;  %v232_v55 = vadd.f32 %v231_v51, %v169_v46  ;;  %v53_v44 = vld [vmem:[%s497_s0 + $0x168] sm:$0xff]  ;;  %v185_v46 = vmul.f32 %v52_v40, %v52_v40 }
  0x3c   :  { %v101_v57 = vadd.f32 %v100_v53, %v38_v48  ;;  %v233_v59 = vadd.f32 %v232_v55, %v170_v50  ;;  %v54_v48 = vld [vmem:[%s497_s0 + $0x170] sm:$0xff]  ;;  %v186_v50 = vmul.f32 %v53_v44, %v53_v44 }
  0x3e   :  { %v102_v61 = vadd.f32 %v101_v57, %v39_v52  ;;  %v234_v63 = vadd.f32 %v233_v59, %v171_v54  ;;  %v55_v52 = vld [vmem:[%s497_s0 + $0x178] sm:$0xff]  ;;  %v187_v54 = vmul.f32 %v54_v48, %v54_v48 }
  0x40   :  { %v103_v1 = vadd.f32 %v102_v61, %v40_v56  ;;  %v235_v3 = vadd.f32 %v234_v63, %v172_v58  ;;  %v56_v56 = vld [vmem:[%s497_s0 + $0x180] sm:$0xff]  ;;  %v188_v58 = vmul.f32 %v55_v52, %v55_v52 }
  0x42   :  { %v104_v5 = vadd.f32 %v103_v1, %v41_v60  ;;  %v236_v7 = vadd.f32 %v235_v3, %v173_v62  ;;  %v57_v60 = vld [vmem:[%s497_s0 + $0x188] sm:$0xff]  ;;  %v189_v62 = vmul.f32 %v56_v56, %v56_v56 }
  0x44   :  { %v105_v9 = vadd.f32 %v104_v5, %v42_v0  ;;  %v237_v11 = vadd.f32 %v236_v7, %v174_v2  ;;  %v58_v0 = vld [vmem:[%s497_s0 + $0x190] sm:$0xff]  ;;  %v190_v2 = vmul.f32 %v57_v60, %v57_v60 }
  0x46   :  { %v106_v13 = vadd.f32 %v105_v9, %v43_v4  ;;  %v238_v15 = vadd.f32 %v237_v11, %v175_v6  ;;  %v59_v4 = vld [vmem:[%s497_s0 + $0x198] sm:$0xff]  ;;  %v191_v6 = vmul.f32 %v58_v0, %v58_v0 }
  0x48   :  { %v107_v17 = vadd.f32 %v106_v13, %v44_v8  ;;  %v239_v19 = vadd.f32 %v238_v15, %v176_v10  ;;  %v60_v8 = vld [vmem:[%s497_s0 + $0x1a0] sm:$0xff]  ;;  %v192_v10 = vmul.f32 %v59_v4, %v59_v4 }
  0x4a   :  { %v108_v21 = vadd.f32 %v107_v17, %v45_v12  ;;  %v240_v23 = vadd.f32 %v239_v19, %v177_v14  ;;  %v61_v12 = vld [vmem:[%s497_s0 + $0x1a8] sm:$0xff]  ;;  %v193_v14 = vmul.f32 %v60_v8, %v60_v8 }
  0x4c   :  { %v109_v25 = vadd.f32 %v108_v21, %v46_v16  ;;  %v241_v27 = vadd.f32 %v240_v23, %v178_v18  ;;  %v62_v16 = vld [vmem:[%s497_s0 + $0x1b0] sm:$0xff]  ;;  %v194_v18 = vmul.f32 %v61_v12, %v61_v12 }
  0x4e   :  { %v110_v29 = vadd.f32 %v109_v25, %v47_v20  ;;  %v242_v31 = vadd.f32 %v241_v27, %v179_v22  ;;  %v63_v20 = vld [vmem:[%s497_s0 + $0x1b8] sm:$0xff]  ;;  %v195_v22 = vmul.f32 %v62_v16, %v62_v16 }
  0x50   :  { %v111_v33 = vadd.f32 %v110_v29, %v48_v24  ;;  %v243_v35 = vadd.f32 %v242_v31, %v180_v26  ;;  %v64_v24 = vld [vmem:[%s497_s0 + $0x1c0] sm:$0xff]  ;;  %v196_v26 = vmul.f32 %v63_v20, %v63_v20 }
  0x52   :  { %v112_v37 = vadd.f32 %v111_v33, %v49_v28  ;;  %v244_v39 = vadd.f32 %v243_v35, %v181_v30  ;;  %v65_v28 = vld [vmem:[%s497_s0 + $0x1c8] sm:$0xff]  ;;  %v197_v30 = vmul.f32 %v64_v24, %v64_v24 }
  0x54   :  { %v113_v41 = vadd.f32 %v112_v37, %v50_v32  ;;  %v245_v43 = vadd.f32 %v244_v39, %v182_v34  ;;  %v66_v32 = vld [vmem:[%s497_s0 + $0x1d0] sm:$0xff]  ;;  %v198_v34 = vmul.f32 %v65_v28, %v65_v28 }
  0x56   :  { %v114_v45 = vadd.f32 %v113_v41, %v51_v36  ;;  %v246_v47 = vadd.f32 %v245_v43, %v183_v38  ;;  %v67_v36 = vld [vmem:[%s497_s0 + $0x1d8] sm:$0xff]  ;;  %v199_v38 = vmul.f32 %v66_v32, %v66_v32 }
  0x58   :  { %v115_v49 = vadd.f32 %v114_v45, %v52_v40  ;;  %v247_v51 = vadd.f32 %v246_v47, %v184_v42  ;;  %v68_v40 = vld [vmem:[%s497_s0 + $0x1e0] sm:$0xff]  ;;  %v200_v42 = vmul.f32 %v67_v36, %v67_v36 }
  0x5a   :  { %v116_v53 = vadd.f32 %v115_v49, %v53_v44  ;;  %v248_v55 = vadd.f32 %v247_v51, %v185_v46  ;;  %v69_v44 = vld [vmem:[%s497_s0 + $0x1e8] sm:$0xff]  ;;  %v201_v46 = vmul.f32 %v68_v40, %v68_v40 }
  0x5c   :  { %v117_v57 = vadd.f32 %v116_v53, %v54_v48  ;;  %v249_v59 = vadd.f32 %v248_v55, %v186_v50  ;;  %v70_v48 = vld [vmem:[%s497_s0 + $0x1f0] sm:$0xff]  ;;  %v202_v50 = vmul.f32 %v69_v44, %v69_v44 }
  0x5e   :  { %v118_v61 = vadd.f32 %v117_v57, %v55_v52  ;;  %v250_v63 = vadd.f32 %v249_v59, %v187_v54  ;;  %v71_v52 = vld [vmem:[%s497_s0 + $0x1f8] sm:$0xff]  ;;  %v203_v54 = vmul.f32 %v70_v48, %v70_v48 }
  0x5f   :  { %v204_v57 = vmul.f32 %v71_v52, %v71_v52 }
  0x60   :  { %v119_v1 = vadd.f32 %v118_v61, %v56_v56  ;;  %v251_v3 = vadd.f32 %v250_v63, %v188_v58 }
  0x62   :  { %v120_v5 = vadd.f32 %v119_v1, %v57_v60  ;;  %v252_v7 = vadd.f32 %v251_v3, %v189_v62 }
  0x64   :  { %v121_v9 = vadd.f32 %v120_v5, %v58_v0  ;;  %v253_v11 = vadd.f32 %v252_v7, %v190_v2 }
  0x66   :  { %v122_v13 = vadd.f32 %v121_v9, %v59_v4  ;;  %v254_v15 = vadd.f32 %v253_v11, %v191_v6 }
  0x68   :  { %v123_v17 = vadd.f32 %v122_v13, %v60_v8  ;;  %v255_v19 = vadd.f32 %v254_v15, %v192_v10 }
  0x6a   :  { %v124_v21 = vadd.f32 %v123_v17, %v61_v12  ;;  %v256_v23 = vadd.f32 %v255_v19, %v193_v14 }
  0x6c   :  { %v125_v25 = vadd.f32 %v124_v21, %v62_v16  ;;  %v257_v27 = vadd.f32 %v256_v23, %v194_v18 }
  0x6e   :  { %v126_v29 = vadd.f32 %v125_v25, %v63_v20  ;;  %v258_v31 = vadd.f32 %v257_v27, %v195_v22 }
  0x70   :  { %v127_v33 = vadd.f32 %v126_v29, %v64_v24  ;;  %v259_v35 = vadd.f32 %v258_v31, %v196_v26 }
  0x72   :  { %v128_v37 = vadd.f32 %v127_v33, %v65_v28  ;;  %v260_v39 = vadd.f32 %v259_v35, %v197_v30 }
  0x74   :  { %v129_v41 = vadd.f32 %v128_v37, %v66_v32  ;;  %v261_v43 = vadd.f32 %v260_v39, %v198_v34 }
  0x76   :  { %v130_v45 = vadd.f32 %v129_v41, %v67_v36  ;;  %v262_v47 = vadd.f32 %v261_v43, %v199_v38 }
  0x78   :  { %v131_v49 = vadd.f32 %v130_v45, %v68_v40  ;;  %v263_v51 = vadd.f32 %v262_v47, %v200_v42 }
  0x7a   :  { %v132_v53 = vadd.f32 %v131_v49, %v69_v44  ;;  %v264_v55 = vadd.f32 %v263_v51, %v201_v46 }
  0x7c   :  { %v133_v56 = vadd.f32 %v132_v53, %v70_v48  ;;  %v265_v58 = vadd.f32 %v264_v55, %v202_v50 }
  0x7e   :  { %v134_v59 = vadd.f32 %v133_v56, %v71_v52  ;;  %v266_v60 = vadd.f32 %v265_v58, %v203_v54 }
  0x80   :  { %v135_v61 = vrot.slane %v134_v59, 4  ;;  %v267_v62 = vadd.f32 %v266_v60, %v204_v57 }
  0x82   :  { %v136_v63 = vadd.f32 %v135_v61, %v134_v59  ;;  %v268_v0 = vrot.slane %v267_v62, 4 }
  0x84   :  { %v137_v1 = vrot.slane %v136_v63, 2  ;;  %v269_v2 = vadd.f32 %v268_v0, %v267_v62 }
  0x86   :  { %v138_v3 = vadd.f32 %v137_v1, %v136_v63  ;;  %v270_v4 = vrot.slane %v269_v2, 2 }
  0x88   :  { %v139_v5 = vrot.slane %v138_v3, 1  ;;  %v271_v6 = vadd.f32 %v270_v4, %v269_v2 }
  0x8a   :  { %v140_v7 = vadd.f32 %v139_v5, %v138_v3  ;;  %v272_v8 = vrot.slane %v271_v6, 1 }
  0x8c   :  { %v273_v9 = vadd.f32 %v272_v8, %v271_v6 }
  0x8e   :  { %v275_v10 = vsel %vm274_vm0, %v140_v7, %v273_v9 }
  0x8f   :  { %280 = vst [vmem:[%s498_s1] sm:$0x3] %v275_v10 }

// kernel: bottleneck_forward.4
= control target key start
LH: loop header
LB: loop body
LE: loop exit
PB: predicated region body
PF: predicated region fallthrough
CT: control target
= control target key end

     0   :  { %vm1207_vm0 = vcmask 1040384   ;;  %s2555_s3 = inlined_call_operand.vmem [shape: bf16[128,128], index: 3, kind: input, shape index: {}]   ;;  %s2556_s0 = inlined_call_operand.vmem [shape: f32[512,128], index: 0, kind: input, shape index: {}]   ;;  %s2557_s1 = inlined_call_operand.vmem [shape: f32[1,128], index: 1, kind: input, shape index: {}]   ;;  %s2558_s2 = inlined_call_operand.vmem [shape: f32[1,128], index: 2, kind: input, shape index: {}]   ;;  %s2559_s4 = inlined_call_operand.vmem [shape: f32[1,128], index: 4, kind: input, shape index: {}]   ;;  %s2560_s5 = inlined_call_operand.vmem [shape: bf16[512,128], index: 5, kind: output, shape index: {0}]   ;;  %s2561_s6 = inlined_call_operand.vmem [shape: f32[2,128], index: 6, kind: output, shape index: {1}]  }
   0x1   :  { %v1695_v0 = vld [vmem:[%s2555_s3 + $0x38] sm:$0xff]   ;;  %v1696_v1 = vld [vmem:[%s2555_s3 + $0x30] sm:$0xff]   ;;  %v1697_v2 = vld [vmem:[%s2555_s3 + $0x28] sm:$0xff]  }
   0x2   :  { %1599 = vmatprep.subr.bf16.mxu0 %v1695_v0  ;;  %1679 = vmatprep.subr.bf16.mxu1 %v1695_v0  ;;  %v1698_v3 = vld [vmem:[%s2555_s3 + $0x20] sm:$0xff]   ;;  %v24_v5 = vld [vmem:[%s2556_s0 + $0x8] sm:$0xff]  ;;  %v25_v10 = vld [vmem:[%s2556_s0 + $0x10] sm:$0xff] }
   0x3   :  { %1600 = vmatpush3.bf16.msra.mxu0 %v1695_v0  ;;  %1687 = vmatpush3.bf16.msra.mxu1 %v1695_v0  ;;  %v23_v4 = vld [vmem:[%s2556_s0] sm:$0xff]  ;;  %v1774_v11 = vld [vmem:[%s2555_s3 + $0x18] sm:$0xff]   ;;  %v28_v16 = vld [vmem:[%s2556_s0 + $0x28] sm:$0xff] }
   0x4   :  { %1601 = vmatprep.subr.bf16.mxu0 %v1696_v1  ;;  %1680 = vmatprep.subr.bf16.mxu1 %v1696_v1  ;;  %v1759_v6 = vld [vmem:[%s2557_s1] ss:$0 sm:$0xff]  ;;  %v26_v14 = vld [vmem:[%s2556_s0 + $0x18] sm:$0xff]  ;;  %v29_v17 = vld [vmem:[%s2556_s0 + $0x30] sm:$0xff] }
   0x5   :  { %v94_v7 = vmul.f32 %v1759_v6, %v23_v4  ;;  %v95_v8 = vmul.f32 %v1759_v6, %v24_v5  ;;  %v1766_v9 = vld [vmem:[%s2558_s2] ss:$0 sm:$0xff]  ;;  %v30_v18 = vld [vmem:[%s2556_s0 + $0x38] sm:$0xff]  ;;  %v96_v21 = vmul.f32 %v1759_v6, %v25_v10  ;;  %v32_v23 = vld [vmem:[%s2556_s0 + $0x48] sm:$0xff]  ;;  %v97_v24 = vmul.f32 %v1759_v6, %v26_v14 }
   0x6   :  { %v27_v15 = vld [vmem:[%s2556_s0 + $0x20] sm:$0xff]  ;;  %v33_v26 = vld [vmem:[%s2556_s0 + $0x50] sm:$0xff]  ;;  %v34_v27 = vld [vmem:[%s2556_s0 + $0x58] sm:$0xff]  ;;  %v99_v29 = vmul.f32 %v1759_v6, %v28_v16  ;;  %v100_v30 = vmul.f32 %v1759_v6, %v29_v17  ;;  %v101_v31 = vmul.f32 %v1759_v6, %v30_v18  ;;  %v103_v36 = vmul.f32 %v1759_v6, %v32_v23 }
   0x7   :  { %1602 = vmatpush3.bf16.msra.mxu0 %v1696_v1  ;;  %1688 = vmatpush3.bf16.msra.mxu1 %v1696_v1  ;;  %v165_v12 = vadd.f32 %v1766_v9, %v94_v7  ;;  %v166_v13 = vadd.f32 %v1766_v9, %v95_v8  ;;  %v31_v22 = vld [vmem:[%s2556_s0 + $0x40] sm:$0xff]  ;;  %v98_v25 = vmul.f32 %v1759_v6, %v27_v15  ;;  %v36_v33 = vld [vmem:[%s2556_s0 + $0x68] sm:$0xff]  ;;  %v1700_v34 = vld [vmem:[%s2555_s3 + $0x10] sm:$0xff]  }
   0x8   :  { %1603 = vmatprep.subr.bf16.mxu0 %v1697_v2  ;;  %1681 = vmatprep.subr.bf16.mxu1 %v1697_v2  ;;  %v35_v32 = vld [vmem:[%s2556_s0 + $0x60] sm:$0xff]  ;;  %v102_v35 = vmul.f32 %v1759_v6, %v31_v22  ;;  %v167_v37 = vadd.f32 %v1766_v9, %v96_v21  ;;  %v104_v38 = vmul.f32 %v1759_v6, %v33_v26  ;;  %v37_v44 = vld [vmem:[%s2556_s0 + $0x70] sm:$0xff]  ;;  %v38_v48 = vld [vmem:[%s2556_s0 + $0x78] sm:$0xff] }
   0x9   :  { %v229_v19 = vmax.f32 %v165_v12, 0.0  ;;  %v230_v20 = vmax.f32 %v166_v13, 0.0  ;;  %v105_v39 = vmul.f32 %v1759_v6, %v34_v27  ;;  %v168_v40 = vadd.f32 %v1766_v9, %v97_v24  ;;  %v39_v49 = vld [vmem:[%s2556_s0 + $0x80] sm:$0xff]  ;;  %v1847_v50 = vld [vmem:[%s2555_s3 + $0x8] sm:$0xff]   ;;  %v41_v0 = vld [vmem:[%s2556_s0 + $0x90] sm:$0xff] }
   0xa   :  { %v169_v41 = vadd.f32 %v1766_v9, %v98_v25  ;;  %v106_v42 = vmul.f32 %v1759_v6, %v35_v32  ;;  %v107_v43 = vmul.f32 %v1759_v6, %v36_v33  ;;  %v170_v45 = vadd.f32 %v1766_v9, %v99_v29  ;;  %v40_v55 = vld [vmem:[%s2556_s0 + $0x88] sm:$0xff]  ;;  %v42_v5 = vld [vmem:[%s2556_s0 + $0x98] sm:$0xff]  ;;  %v1702_v7 = vld [vmem:[%s2555_s3] sm:$0xff]  }
   0xb   :  { %1604 = vmatpush3.bf16.msra.mxu0 %v1697_v2  ;;  %1689 = vmatpush3.bf16.msra.mxu1 %v1697_v2  ;;  %v293_v28 = vpack.c.bf16 %v230_v20, %v229_v19  ;;  %v171_v46 = vadd.f32 %v1766_v9, %v100_v30  ;;  %v172_v47 = vadd.f32 %v1766_v9, %v101_v31  ;;  %v231_v56 = vmax.f32 %v167_v37, 0.0  ;;  %v43_v13 = vld [vmem:[%s2556_s0 + $0xa0] sm:$0xff]  ;;  %v44_v18 = vld [vmem:[%s2556_s0 + $0xa8] sm:$0xff]  ;;  %v45_v25 = vld [vmem:[%s2556_s0 + $0xb0] sm:$0xff] }
   0xc   :  { %1605 = vmatprep.subr.bf16.mxu0 %v1698_v3  ;;  %1682 = vmatprep.subr.bf16.mxu1 %v1698_v3  ;;  %v173_v51 = vadd.f32 %v1766_v9, %v102_v35  ;;  %v174_v52 = vadd.f32 %v1766_v9, %v103_v36  ;;  %v175_v53 = vadd.f32 %v1766_v9, %v104_v38  ;;  %v232_v60 = vmax.f32 %v168_v40, 0.0  ;;  %v49_v30 = vld [vmem:[%s2556_s0 + $0xd0] sm:$0xff]  ;;  %v50_v31 = vld [vmem:[%s2556_s0 + $0xd8] sm:$0xff]  ;;  %v51_v37 = vld [vmem:[%s2556_s0 + $0xe0] sm:$0xff] }
   0xd   :  { %1615 = vmatprep.mubr.bf16.mxu0 %v293_v28  ;;  %v176_v54 = vadd.f32 %v1766_v9, %v105_v39  ;;  %v177_v57 = vadd.f32 %v1766_v9, %v106_v42  ;;  %v178_v58 = vadd.f32 %v1766_v9, %v107_v43  ;;  %v108_v59 = vmul.f32 %v1759_v6, %v37_v44  ;;  %v46_v36 = vld [vmem:[%s2556_s0 + $0xb8] sm:$0xff]  ;;  %v52_v38 = vld [vmem:[%s2556_s0 + $0xe8] sm:$0xff]  ;;  %v53_v43 = vld [vmem:[%s2556_s0 + $0xf0] sm:$0xff] }
   0xe   :  { %v233_v61 = vmax.f32 %v169_v41, 0.0  ;;  %v109_v62 = vmul.f32 %v1759_v6, %v38_v48  ;;  %v110_v63 = vmul.f32 %v1759_v6, %v39_v49  ;;  %v234_v1 = vmax.f32 %v170_v45, 0.0  ;;  %v54_v48 = vld [vmem:[%s2556_s0 + $0xf8] sm:$0xff] }
   0xf   :  { %1606 = vmatpush3.bf16.msra.mxu0 %v1698_v3  ;;  %1690 = vmatpush3.bf16.msra.mxu1 %v1698_v3  ;;  %v235_v2 = vmax.f32 %v171_v46, 0.0  ;;  %v236_v3 = vmax.f32 %v172_v47, 0.0  ;;  %v111_v4 = vmul.f32 %v1759_v6, %v40_v55  ;;  %v237_v8 = vmax.f32 %v173_v51, 0.0 }
  0x10   :  { %1607 = vmatprep.subr.bf16.mxu0 %v1774_v11  ;;  %1683 = vmatprep.subr.bf16.mxu1 %v1774_v11  ;;  %v238_v10 = vmax.f32 %v174_v52, 0.0  ;;  %v240_v12 = vmax.f32 %v176_v54, 0.0  ;;  %v241_v14 = vmax.f32 %v177_v57, 0.0  ;;  %v242_v15 = vmax.f32 %v178_v58, 0.0 }
  0x11   :  { %v1877_v16 = vadd.f32 %v1766_v9, %v108_v59  ;;  %v112_v17 = vmul.f32 %v1759_v6, %v41_v0  ;;  %v1884_v19 = vadd.f32 %v1766_v9, %v109_v62  ;;  %v1887_v20 = vadd.f32 %v1766_v9, %v110_v63  ;;  %v56_v62 = vld [vmem:[%s2556_s0 + $0x108] sm:$0xff] }
  0x12   :  { %v113_v21 = vmul.f32 %v1759_v6, %v42_v5  ;;  %v294_v22 = vpack.c.bf16 %v232_v60, %v231_v56  ;;  %v1892_v23 = vadd.f32 %v1766_v9, %v111_v4  ;;  %v114_v24 = vmul.f32 %v1759_v6, %v43_v13  ;;  %v58_v4 = vld [vmem:[%s2556_s0 + $0x118] sm:$0xff] }
  0x13   :  { %1608 = vmatpush3.bf16.msra.mxu0 %v1774_v11  ;;  %1691 = vmatpush3.bf16.msra.mxu1 %v1774_v11  ;;  %v239_v11 = vmax.f32 %v175_v53, 0.0  ;;  %v295_v26 = vpack.c.bf16 %v234_v1, %v233_v61  ;;  %v1899_v27 = vpack.c.bf16 %v236_v3, %v235_v2  ;;  %v1901_v28 = vpack.c.bf16 %v238_v10, %v237_v8  ;;  %v55_v53 = vld [vmem:[%s2556_s0 + $0x100] sm:$0xff]  ;;  %v57_v3 = vld [vmem:[%s2556_s0 + $0x110] sm:$0xff] }
  0x14   :  { %1609 = vmatprep.subr.bf16.mxu0 %v1700_v34  ;;  %1684 = vmatprep.subr.bf16.mxu1 %v1700_v34  ;;  %v115_v29 = vmul.f32 %v1759_v6, %v44_v18  ;;  %v1912_v33 = vpack.c.bf16 %v242_v15, %v241_v14  ;;  %v1916_v35 = vadd.f32 %v1766_v9, %v112_v17  ;;  %v244_v39 = vmax.f32 %v1884_v19, 0.0  ;;  %v61_v18 = vld [vmem:[%s2556_s0 + $0x130] sm:$0xff] }
  0x15   :  { %v1910_v32 = vpack.c.bf16 %v240_v12, %v239_v11  ;;  %v245_v40 = vmax.f32 %v1887_v20, 0.0  ;;  %v1930_v41 = vadd.f32 %v1766_v9, %v113_v21  ;;  %v116_v42 = vmul.f32 %v1759_v6, %v45_v25  ;;  %v59_v11 = vld [vmem:[%s2556_s0 + $0x120] sm:$0xff]  ;;  %v60_v12 = vld [vmem:[%s2556_s0 + $0x128] sm:$0xff] }
  0x16   :  { %v246_v44 = vmax.f32 %v1892_v23, 0.0  ;;  %v1939_v45 = vadd.f32 %v1766_v9, %v114_v24  ;;  %v120_v46 = vmul.f32 %v1759_v6, %v49_v30  ;;  %v121_v47 = vmul.f32 %v1759_v6, %v50_v31 }
  0x17   :  { %1610 = vmatpush3.bf16.msra.mxu0 %v1700_v34  ;;  %1692 = vmatpush3.bf16.msra.mxu1 %v1700_v34  ;;  %v243_v34 = vmax.f32 %v1877_v16, 0.0  ;;  %v1947_v49 = vadd.f32 %v1766_v9, %v115_v29  ;;  %v122_v51 = vmul.f32 %v1759_v6, %v51_v37  ;;  %v123_v52 = vmul.f32 %v1759_v6, %v52_v38  ;;  %v63_v37 = vld [vmem:[%s2556_s0 + $0x140] sm:$0xff]  ;;  %v78_v16 = vld [vmem:[%s2556_s0 + $0x1b8] sm:$0xff] }
  0x18   :  { %1611 = vmatprep.subr.bf16.mxu0 %v1847_v50  ;;  %1685 = vmatprep.subr.bf16.mxu1 %v1847_v50  ;;  %v247_v54 = vmax.f32 %v1916_v35, 0.0  ;;  %v191_v55 = vadd.f32 %v1766_v9, %v120_v46  ;;  %v192_v56 = vadd.f32 %v1766_v9, %v121_v47  ;;  %v124_v57 = vmul.f32 %v1759_v6, %v53_v43  ;;  %v47_v47 = vld [vmem:[%s2556_s0 + $0xc0] sm:$0xff]  ;;  %v73_v35 = vld [vmem:[%s2556_s0 + $0x190] sm:$0xff] }
  0x19   :  { %v248_v58 = vmax.f32 %v1930_v41, 0.0  ;;  %v193_v59 = vadd.f32 %v1766_v9, %v122_v51  ;;  %v194_v60 = vadd.f32 %v1766_v9, %v123_v52  ;;  %v125_v61 = vmul.f32 %v1759_v6, %v54_v48 }
  0x1a   :  { %v255_v63 = vmax.f32 %v191_v55, 0.0  ;;  %v256_v0 = vmax.f32 %v192_v56, 0.0  ;;  %v195_v1 = vadd.f32 %v1766_v9, %v124_v57  ;;  %v126_v2 = vmul.f32 %v1759_v6, %v55_v53  ;;  %v64_v55 = vld [vmem:[%s2556_s0 + $0x148] sm:$0xff] }
  0x1b   :  { %1612 = vmatpush3.bf16.msra.mxu0 %v1847_v50  ;;  %1693 = vmatpush3.bf16.msra.mxu1 %v1847_v50  ;;  %v1950_v50 = vmul.f32 %v1759_v6, %v46_v36  ;;  %v1977_v5 = vadd.f32 %v1766_v9, %v116_v42  ;;  %v258_v8 = vmax.f32 %v194_v60, 0.0  ;;  %v196_v10 = vadd.f32 %v1766_v9, %v125_v61  ;;  %v65_v61 = vld [vmem:[%s2556_s0 + $0x150] sm:$0xff] }
  0x1c   :  { %1613 = vmatprep.subr.bf16.mxu0 %v1702_v7  ;;  %1686 = vmatprep.subr.bf16.mxu1 %v1702_v7  ;;  %v1986_v13 = vpack.c.bf16 %v256_v0, %v255_v63  ;;  %v259_v14 = vmax.f32 %v195_v1, 0.0  ;;  %v127_v15 = vmul.f32 %v1759_v6, %v56_v62  ;;  %v197_v17 = vadd.f32 %v1766_v9, %v126_v2  ;;  %v66_v62 = vld [vmem:[%s2556_s0 + $0x158] sm:$0xff]  ;;  %v67_v2 = vld [vmem:[%s2556_s0 + $0x160] sm:$0xff] }
  0x1d   :  { %v128_v24 = vmul.f32 %v1759_v6, %v57_v3  ;;  %v129_v25 = vmul.f32 %v1759_v6, %v58_v4  ;;  %v130_v31 = vmul.f32 %v1759_v6, %v59_v11  ;;  %v131_v36 = vmul.f32 %v1759_v6, %v60_v12  ;;  %v68_v3 = vld [vmem:[%s2556_s0 + $0x168] sm:$0xff] }
  0x1e   :  { %v198_v29 = vadd.f32 %v1766_v9, %v127_v15  ;;  %v261_v30 = vmax.f32 %v197_v17, 0.0  ;;  %v132_v46 = vmul.f32 %v1759_v6, %v61_v18  ;;  %v134_v60 = vmul.f32 %v1759_v6, %v63_v37  ;;  %v70_v17 = vld [vmem:[%s2556_s0 + $0x178] sm:$0xff] }
  0x1f   :  { %1614 = vmatpush3.bf16.msra.mxu0 %v1702_v7  ;;  %1694 = vmatpush3.bf16.msra.mxu1 %v1702_v7  ;;  %v257_v7 = vmax.f32 %v193_v59, 0.0  ;;  %v199_v42 = vadd.f32 %v1766_v9, %v128_v24  ;;  %v200_v43 = vadd.f32 %v1766_v9, %v129_v25  ;;  %v201_v51 = vadd.f32 %v1766_v9, %v130_v31 }
  0x20   :  { %v262_v48 = vmax.f32 %v198_v29, 0.0  ;;  %v202_v52 = vadd.f32 %v1766_v9, %v131_v36  ;;  %v203_v59 = vadd.f32 %v1766_v9, %v132_v46  ;;  %v118_v4 = vmul.f32 %v1759_v6, %v47_v47  ;;  %v48_v29 = vld [vmem:[%s2556_s0 + $0xc8] sm:$0xff] }
  0x21   :  { %v1993_v21 = vpack.c.bf16 %v258_v8, %v257_v7  ;;  %v263_v56 = vmax.f32 %v199_v42, 0.0  ;;  %v264_v57 = vmax.f32 %v200_v43, 0.0  ;;  %v265_v0 = vmax.f32 %v201_v51, 0.0 }
  0x22   :  { %1616 = vmatmul.mubr.bf16.vlgmr.msra.gmra.mxu0 %v294_v22  ;;  %v260_v22 = vmax.f32 %v196_v10, 0.0  ;;  %v309_v63 = vpack.c.bf16 %v262_v48, %v261_v30  ;;  %v266_v1 = vmax.f32 %v202_v52, 0.0  ;;  %v135_v8 = vmul.f32 %v1759_v6, %v64_v55  ;;  %v69_v10 = vld [vmem:[%s2556_s0 + $0x170] sm:$0xff] }
  0x23   :  { %1619 = vmatprep.mubr.bf16.mxu0 %v295_v26  ;;  %v62_v26 = vld [vmem:[%s2556_s0 + $0x138] sm:$0xff]  ;;  %v310_v7 = vpack.c.bf16 %v264_v57, %v263_v56  ;;  %v267_v12 = vmax.f32 %v203_v59, 0.0  ;;  %v137_v15 = vmul.f32 %v1759_v6, %v66_v62  ;;  %v138_v24 = vmul.f32 %v1759_v6, %v67_v2 }
  0x24   :  { %v2006_v38 = vpack.c.bf16 %v260_v22, %v259_v14  ;;  %v133_v53 = vmul.f32 %v1759_v6, %v62_v26  ;;  %1647 = vmatprep.mubr.bf16.mxu1 %v309_v63  ;;  %v311_v11 = vpack.c.bf16 %v266_v1, %v265_v0  ;;  %v136_v14 = vmul.f32 %v1759_v6, %v65_v61  ;;  %v71_v26 = vld [vmem:[%s2556_s0 + $0x180] sm:$0xff] }
  0x25   :  { %1648 = vmatmul.mubr.bf16.vlgmr.msra.gmra.mxu1 %v310_v7  ;;  %v206_v22 = vadd.f32 %v1766_v9, %v135_v8  ;;  %v139_v25 = vmul.f32 %v1759_v6, %v68_v3  ;;  %v208_v36 = vadd.f32 %v1766_v9, %v137_v15  ;;  %v140_v37 = vmul.f32 %v1759_v6, %v69_v10  ;;  %v75_v3 = vld [vmem:[%s2556_s0 + $0x1a0] sm:$0xff]  ;;  %v80_v7 = vld [vmem:[%s2556_s0 + $0x1c8] sm:$0xff]  ;;  %v82_v15 = vld [vmem:[%s2556_s0 + $0x1d8] sm:$0xff] }
  0x26   :  { %1651 = vmatprep.mubr.bf16.mxu1 %v311_v11  ;;  %v207_v31 = vadd.f32 %v1766_v9, %v136_v14  ;;  %v209_v43 = vadd.f32 %v1766_v9, %v138_v24  ;;  %v141_v47 = vmul.f32 %v1759_v6, %v70_v17  ;;  %v249_v48 = vmax.f32 %v1939_v45, 0.0  ;;  %v76_v10 = vld [vmem:[%s2556_s0 + $0x1a8] sm:$0xff]  ;;  %v81_v14 = vld [vmem:[%s2556_s0 + $0x1d0] sm:$0xff] }
  0x27   :  { %v270_v42 = vmax.f32 %v206_v22, 0.0  ;;  %v210_v46 = vadd.f32 %v1766_v9, %v139_v25  ;;  %v250_v51 = vmax.f32 %v1947_v49, 0.0  ;;  %v2067_v52 = vadd.f32 %v1766_v9, %v1950_v50  ;;  %v83_v25 = vld [vmem:[%s2556_s0 + $0x1e0] sm:$0xff] }
  0x28   :  { %v119_v55 = vmul.f32 %v1759_v6, %v48_v29  ;;  %v271_v57 = vmax.f32 %v207_v31, 0.0  ;;  %v272_v59 = vmax.f32 %v208_v36, 0.0  ;;  %v273_v49 = vmax.f32 %v209_v43, 0.0 }
  0x29   :  { %v274_v61 = vmax.f32 %v210_v46, 0.0  ;;  %v2077_v50 = vadd.f32 %v1766_v9, %v140_v37  ;;  %v300_v62 = vpack.c.bf16 %v244_v39, %v243_v34  ;;  %v2094_v63 = vpack.c.bf16 %v248_v58, %v247_v54  ;;  %v79_v39 = vld [vmem:[%s2556_s0 + $0x1c0] sm:$0xff]  ;;  %v74_v54 = vld [vmem:[%s2556_s0 + $0x198] sm:$0xff]  ;;  %v85_v37 = vld [vmem:[%s2556_s0 + $0x1f0] sm:$0xff] }
  0x2a   :  { %1620 = vmatmul.mubr.bf16.gmra.mxu0 %v1899_v27  ;;  %v204_v27 = vadd.f32 %v1766_v9, %v133_v53  ;;  %v142_v53 = vmul.f32 %v1759_v6, %v71_v26  ;;  %v2097_v0 = vadd.f32 %v1766_v9, %v141_v47  ;;  %v251_v19 = vmax.f32 %v1977_v5, 0.0  ;;  %v84_v26 = vld [vmem:[%s2556_s0 + $0x1e8] sm:$0xff]  ;;  %v2198_v5 = vld [vmem:[%s2559_s4] ss:$0 sm:$0xff] }
  0x2b   :  { %1623 = vmatprep.mubr.bf16.mxu0 %v1901_v28  ;;  %v205_v28 = vadd.f32 %v1766_v9, %v134_v60  ;;  %v72_v60 = vld [vmem:[%s2556_s0 + $0x188] sm:$0xff]  ;;  %v2104_v20 = vadd.f32 %v1766_v9, %v118_v4  ;;  %v252_v41 = vmax.f32 %v2067_v52, 0.0  ;;  %v314_v1 = vpack.c.bf16 %v272_v59, %v271_v57 }
  0x2c   :  { %v268_v18 = vmax.f32 %v204_v27, 0.0  ;;  %v143_v23 = vmul.f32 %v1759_v6, %v72_v60  ;;  %v2108_v34 = vadd.f32 %v1766_v9, %v142_v53  ;;  %v315_v27 = vpack.c.bf16 %v274_v61, %v273_v49 }
  0x2d   :  { %v269_v30 = vmax.f32 %v205_v28, 0.0  ;;  %v275_v2 = vmax.f32 %v2077_v50, 0.0  ;;  %v149_v4 = vmul.f32 %v1759_v6, %v78_v16  ;;  %v276_v8 = vmax.f32 %v2097_v0, 0.0 }
  0x2e   :  { %v312_v56 = vpack.c.bf16 %v268_v18, %v267_v12  ;;  %v144_v28 = vmul.f32 %v1759_v6, %v73_v35  ;;  %v150_v12 = vmul.f32 %v1759_v6, %v79_v39  ;;  %v214_v17 = vadd.f32 %v1766_v9, %v143_v23 }
  0x2f   :  { %v313_v45 = vpack.c.bf16 %v270_v42, %v269_v30  ;;  %v277_v18 = vmax.f32 %v2108_v34, 0.0  ;;  %v145_v22 = vmul.f32 %v1759_v6, %v74_v54  ;;  %v220_v24 = vadd.f32 %v1766_v9, %v149_v4 }
  0x30   :  { %1652 = vmatmul.mubr.bf16.gmra.mxu1 %v312_v56  ;;  %v146_v29 = vmul.f32 %v1759_v6, %v75_v3  ;;  %v151_v31 = vmul.f32 %v1759_v6, %v80_v7  ;;  %v221_v36 = vadd.f32 %v1766_v9, %v150_v12  ;;  %v147_v42 = vmul.f32 %v1759_v6, %v76_v10 }
  0x31   :  { %1655 = vmatprep.mubr.bf16.mxu1 %v313_v45  ;;  %v284_v43 = vmax.f32 %v220_v24, 0.0  ;;  %v152_v46 = vmul.f32 %v1759_v6, %v81_v14  ;;  %v153_v47 = vmul.f32 %v1759_v6, %v82_v15  ;;  %v155_v56 = vmul.f32 %v1759_v6, %v84_v26 }
  0x32   :  { %1624 = vmatmul.mubr.bf16.gmra.mxu0 %v1910_v32  ;;  %v77_v32 = vld [vmem:[%s2556_s0 + $0x1b0] sm:$0xff]  ;;  %v285_v53 = vmax.f32 %v221_v36, 0.0  ;;  %v156_v45 = vmul.f32 %v1759_v6, %v85_v37  ;;  %v253_v54 = vmax.f32 %v2104_v20, 0.0  ;;  %v217_v12 = vadd.f32 %v1766_v9, %v146_v29 }
  0x33   :  { %1627 = vmatprep.mubr.bf16.mxu0 %v1912_v33  ;;  %v301_v33 = vpack.c.bf16 %v246_v44, %v245_v40  ;;  %v2116_v40 = vpack.c.bf16 %v250_v51, %v249_v48  ;;  %v2120_v44 = vadd.f32 %v1766_v9, %v119_v55  ;;  %v148_v58 = vmul.f32 %v1759_v6, %v77_v32  ;;  %v86_v48 = vld [vmem:[%s2556_s0 + $0x1f8] sm:$0xff] }
  0x34   :  { %v222_v51 = vadd.f32 %v1766_v9, %v151_v31  ;;  %v154_v55 = vmul.f32 %v1759_v6, %v83_v25  ;;  %v223_v59 = vadd.f32 %v1766_v9, %v152_v46  ;;  %v224_v60 = vadd.f32 %v1766_v9, %v153_v47 }
  0x35   :  { %v219_v11 = vadd.f32 %v1766_v9, %v148_v58  ;;  %v226_v50 = vadd.f32 %v1766_v9, %v155_v56  ;;  %v157_v32 = vmul.f32 %v1759_v6, %v86_v48  ;;  %v227_v16 = vadd.f32 %v1766_v9, %v156_v45 }
  0x36   :  { %v286_v49 = vmax.f32 %v222_v51, 0.0  ;;  %v225_v61 = vadd.f32 %v1766_v9, %v154_v55  ;;  %v288_v0 = vmax.f32 %v224_v60, 0.0  ;;  %v316_v58 = vpack.c.bf16 %v276_v8, %v275_v2 }
  0x37   :  { %v283_v30 = vmax.f32 %v219_v11, 0.0  ;;  %v290_v35 = vmax.f32 %v226_v50, 0.0  ;;  %v228_v39 = vadd.f32 %v1766_v9, %v157_v32  ;;  %v291_v3 = vmax.f32 %v227_v16, 0.0 }
  0x38   :  { %1656 = vmatmul.mubr.bf16.gmra.mxu1 %v314_v1  ;;  %v321_v23 = vpack.c.bf16 %v286_v49, %v285_v53  ;;  %v289_v34 = vmax.f32 %v225_v61, 0.0  ;;  %v215_v6 = vadd.f32 %v1766_v9, %v144_v28  ;;  %v254_v10 = vmax.f32 %v2120_v44, 0.0 }
  0x39   :  { %v320_v57 = vpack.c.bf16 %v284_v43, %v283_v30  ;;  %1659 = vmatprep.mubr.bf16.mxu1 %v315_v27  ;;  %v216_v27 = vadd.f32 %v1766_v9, %v145_v22  ;;  %v292_v7 = vmax.f32 %v228_v39, 0.0  ;;  %v218_v20 = vadd.f32 %v1766_v9, %v147_v42 }
  0x3a   :  { %1628 = vmatmul.mubr.bf16.gmra.mxu0 %v300_v62  ;;  %v278_v62 = vmax.f32 %v214_v17, 0.0  ;;  %v323_v4 = vpack.c.bf16 %v290_v35, %v289_v34  ;;  %v279_v8 = vmax.f32 %v215_v6, 0.0  ;;  %v305_v14 = vpack.c.bf16 %v254_v10, %v253_v54 }
  0x3b   :  { %1631 = vmatprep.mubr.bf16.mxu0 %v301_v33  ;;  %v287_v33 = vmax.f32 %v223_v59, 0.0  ;;  %v324_v2 = vpack.c.bf16 %v292_v7, %v291_v3  ;;  %v280_v28 = vmax.f32 %v216_v27, 0.0  ;;  %v281_v15 = vmax.f32 %v217_v12, 0.0 }
  0x3c   :  { %v317_v11 = vpack.c.bf16 %v278_v62, %v277_v18 }
  0x3d   :  { %v322_v1 = vpack.c.bf16 %v288_v0, %v287_v33  ;;  %v318_v44 = vpack.c.bf16 %v280_v28, %v279_v8 }
  0x40   :  { %1660 = vmatmul.mubr.bf16.gmra.mxu1 %v316_v58 }
  0x41   :  { %1663 = vmatprep.mubr.bf16.mxu1 %v317_v11 }
  0x42   :  { %1632 = vmatmul.mubr.bf16.gmra.mxu0 %v2094_v63  ;;  %v304_v63 = vpack.c.bf16 %v252_v41, %v251_v19 }
  0x43   :  { %1635 = vmatprep.mubr.bf16.mxu0 %v2116_v40  ;;  %v282_v40 = vmax.f32 %v218_v20, 0.0 }
  0x45   :  { %v319_v17 = vpack.c.bf16 %v282_v40, %v281_v15 }
  0x48   :  { %1664 = vmatmul.mubr.bf16.gmra.mxu1 %v318_v44 }
  0x49   :  { %1667 = vmatprep.mubr.bf16.mxu1 %v319_v17 }
  0x4a   :  { %1636 = vmatmul.mubr.bf16.gmra.mxu0 %v304_v63 }
  0x4b   :  { %1639 = vmatprep.mubr.bf16.mxu0 %v305_v14 }
  0x50   :  { %1668 = vmatmul.mubr.bf16.gmra.mxu1 %v320_v57 }
  0x51   :  { %1671 = vmatprep.mubr.bf16.mxu1 %v321_v23 }
  0x52   :  { %1640 = vmatmul.mubr.bf16.gmra.mxu0 %v1986_v13 }
  0x53   :  { %1643 = vmatprep.mubr.bf16.mxu0 %v1993_v21 }
  0x58   :  { %1672 = vmatmul.mubr.bf16.gmra.mxu1 %v322_v1 }
  0x59   :  { %1675 = vmatprep.mubr.bf16.mxu1 %v323_v4 }
  0x5a   :  { %1644 = vmatmul.mubr.bf16.gmra.mxu0 %v2006_v38 }
  0x60   :  { %1676 = vmatmul.mubr.bf16.gmra.mxu1 %v324_v2 }
  0xe2   :  { %v1617_v9 = vpop.f32.mrf.mxu0 }
  0xe3   :  { %v439_v41 = vadd.f32 %v1617_v9, %v2198_v5 }
  0xe4   :  { %v430_v52 = vpop.f32.mrf.mxu0 }
  0xe5   :  { %v431_v13 = vadd.f32 %v2198_v5, %v430_v52  ;;  %v1076_v36 = vmul.f32 %v439_v41, %v439_v41  ;;  %v1649_v48 = vpop.f32.mrf.mxu1 }
  0xe6   :  { %v1618_v19 = vpop.f32.mrf.mxu0  ;;  %v2214_v50 = vadd.f32 %v1649_v48, %v2198_v5 }
  0xe7   :  { %v442_v21 = vadd.f32 %v1618_v19, %v2198_v5  ;;  %v1074_v25 = vmul.f32 %v431_v13, %v431_v13  ;;  %v558_v60 = vpop.f32.mrf.mxu1 }
  0xe8   :  { %v433_v18 = vpop.f32.mrf.mxu0  ;;  %v2224_v54 = vadd.f32 %v2198_v5, %v558_v60 }
  0xe9   :  { %v1376_v22 = vpack.c.bf16 %v442_v21, %v439_v41  ;;  %v434_v38 = vadd.f32 %v2198_v5, %v433_v18  ;;  %v1077_v46 = vmul.f32 %v442_v21, %v442_v21  ;;  %v1650_v33 = vpop.f32.mrf.mxu1 }
  0xea   :  { %v1621_v24 = vpop.f32.mrf.mxu0  ;;  %v2221_v16 = vadd.f32 %v1650_v33, %v2198_v5 }
  0xeb   :  { %1528 = vst [vmem:[%s2560_s5 + $0x8] sm:$0xff] %v1376_v22   ;;  %v1371_v26 = vpack.c.bf16 %v434_v38, %v431_v13  ;;  %v1005_v29 = vadd.f32 %v434_v38, %v431_v13  ;;  %v1075_v30 = vmul.f32 %v434_v38, %v434_v38  ;;  %v455_v53 = vadd.f32 %v1621_v24, %v2198_v5  ;;  %v561_v58 = vpop.f32.mrf.mxu1 }
  0xec   :  { %v446_v31 = vpop.f32.mrf.mxu0  ;;  %v1456_v3 = vpack.c.bf16 %v2221_v16, %v2214_v50  ;;  %v2233_v10 = vadd.f32 %v2198_v5, %v561_v58 }
  0xed   :  { %1372 = vst [vmem:[%s2560_s5] sm:$0xff] %v1371_v26   ;;  %v1006_v37 = vadd.f32 %v1005_v29, %v439_v41  ;;  %v1138_v42 = vadd.f32 %v1075_v30, %v1074_v25  ;;  %v447_v43 = vadd.f32 %v2198_v5, %v446_v31  ;;  %v1080_v1 = vmul.f32 %v455_v53, %v455_v53 }
  0xee   :  { %v1622_v47 = vpop.f32.mrf.mxu0  ;;  %1544 = vst [vmem:[%s2560_s5 + $0x88] sm:$0xff] %v1456_v3   ;;  %v1451_v14 = vpack.c.bf16 %v2233_v10, %v2224_v54 }
  0xef   :  { %v1139_v51 = vadd.f32 %v1138_v42, %v1076_v36  ;;  %v1007_v55 = vadd.f32 %v1006_v37, %v442_v21  ;;  %v458_v56 = vadd.f32 %v1622_v47, %v2198_v5  ;;  %v1078_v57 = vmul.f32 %v447_v43, %v447_v43 }
  0xf0   :  { %v449_v59 = vpop.f32.mrf.mxu0  ;;  %v1653_v11 = vpop.f32.mrf.mxu1  ;;  %1543 = vst [vmem:[%s2560_s5 + $0x80] sm:$0xff] %v1451_v14  }
  0xf1   :  { %v1008_v45 = vadd.f32 %v1007_v55, %v447_v43  ;;  %v1140_v49 = vadd.f32 %v1139_v51, %v1077_v46  ;;  %v1386_v61 = vpack.c.bf16 %v458_v56, %v455_v53  ;;  %v450_v32 = vadd.f32 %v2198_v5, %v449_v59 }
  0xf2   :  { %v1625_v62 = vpop.f32.mrf.mxu0  ;;  %v1081_v2 = vmul.f32 %v458_v56, %v458_v56  ;;  %v574_v15 = vpop.f32.mrf.mxu1  ;;  %v2244_v17 = vadd.f32 %v1653_v11, %v2198_v5 }
  0xf3   :  { %v1141_v0 = vadd.f32 %v1140_v49, %v1078_v57  ;;  %1530 = vst [vmem:[%s2560_s5 + $0x18] sm:$0xff] %v1386_v61   ;;  %v1381_v23 = vpack.c.bf16 %v450_v32, %v447_v43  ;;  %v1009_v34 = vadd.f32 %v1008_v45, %v450_v32  ;;  %v1079_v35 = vmul.f32 %v450_v32, %v450_v32 }
  0xf4   :  { %v462_v39 = vpop.f32.mrf.mxu0  ;;  %v471_v12 = vadd.f32 %v1625_v62, %v2198_v5  ;;  %v1654_v13 = vpop.f32.mrf.mxu1  ;;  %v2256_v26 = vadd.f32 %v2198_v5, %v574_v15 }
  0xf5   :  { %1529 = vst [vmem:[%s2560_s5 + $0x10] sm:$0xff] %v1381_v23   ;;  %v1010_v6 = vadd.f32 %v1009_v34, %v455_v53  ;;  %v1142_v27 = vadd.f32 %v1141_v0, %v1079_v35  ;;  %v463_v4 = vadd.f32 %v2198_v5, %v462_v39  ;;  %v2253_v22 = vadd.f32 %v1654_v13, %v2198_v5 }
  0xf6   :  { %v1626_v7 = vpop.f32.mrf.mxu0  ;;  %v577_v29 = vpop.f32.mrf.mxu1  ;;  %v1084_v30 = vmul.f32 %v471_v12, %v471_v12 }
  0xf7   :  { %v474_v20 = vadd.f32 %v1626_v7, %v2198_v5  ;;  %v1143_v63 = vadd.f32 %v1142_v27, %v1080_v1  ;;  %v1011_v8 = vadd.f32 %v1010_v6, %v458_v56  ;;  %v1082_v52 = vmul.f32 %v463_v4, %v463_v4 }
  0xf8   :  { %v465_v28 = vpop.f32.mrf.mxu0  ;;  %v1466_v31 = vpack.c.bf16 %v2253_v22, %v2244_v17  ;;  %v2265_v46 = vadd.f32 %v2198_v5, %v577_v29  ;;  %v1657_v47 = vpop.f32.mrf.mxu1 }
  0xf9   :  { %v1396_v40 = vpack.c.bf16 %v474_v20, %v471_v12  ;;  %v466_v44 = vadd.f32 %v2198_v5, %v465_v28  ;;  %v1012_v9 = vadd.f32 %v1011_v8, %v463_v4  ;;  %v1144_v19 = vadd.f32 %v1143_v63, %v1081_v2 }
  0xfa   :  { %v1629_v41 = vpop.f32.mrf.mxu0  ;;  %1546 = vst [vmem:[%s2560_s5 + $0x98] sm:$0xff] %v1466_v31   ;;  %v1085_v53 = vmul.f32 %v474_v20, %v474_v20  ;;  %v1461_v59 = vpack.c.bf16 %v2265_v46, %v2256_v26  ;;  %v590_v60 = vpop.f32.mrf.mxu1  ;;  %v2276_v61 = vadd.f32 %v1657_v47, %v2198_v5 }
  0xfb   :  { %1532 = vst [vmem:[%s2560_s5 + $0x28] sm:$0xff] %v1396_v40   ;;  %v1391_v21 = vpack.c.bf16 %v466_v44, %v463_v4  ;;  %v1083_v18 = vmul.f32 %v466_v44, %v466_v44  ;;  %v1145_v38 = vadd.f32 %v1144_v19, %v1082_v52  ;;  %v1013_v24 = vadd.f32 %v1012_v9, %v466_v44 }
  0xfc   :  { %v478_v25 = vpop.f32.mrf.mxu0  ;;  %v487_v48 = vadd.f32 %v1629_v41, %v2198_v5  ;;  %1545 = vst [vmem:[%s2560_s5 + $0x90] sm:$0xff] %v1461_v59   ;;  %v1658_v23 = vpop.f32.mrf.mxu1  ;;  %v2288_v6 = vadd.f32 %v2198_v5, %v590_v60 }
  0xfd   :  { %1531 = vst [vmem:[%s2560_s5 + $0x20] sm:$0xff] %v1391_v21   ;;  %v1014_v36 = vadd.f32 %v1013_v24, %v471_v12  ;;  %v1146_v37 = vadd.f32 %v1145_v38, %v1083_v18  ;;  %v479_v42 = vadd.f32 %v2198_v5, %v478_v25  ;;  %v2285_v39 = vadd.f32 %v1658_v23, %v2198_v5 }
  0xfe   :  { %v1630_v43 = vpop.f32.mrf.mxu0  ;;  %v593_v27 = vpop.f32.mrf.mxu1  ;;  %v1088_v4 = vmul.f32 %v487_v48, %v487_v48 }
  0xff   :  { %v490_v51 = vadd.f32 %v1630_v43, %v2198_v5  ;;  %v1147_v55 = vadd.f32 %v1146_v37, %v1084_v30  ;;  %v1015_v56 = vadd.f32 %v1014_v36, %v474_v20  ;;  %v1086_v62 = vmul.f32 %v479_v42, %v479_v42 }
 0x100   :  { %v481_v57 = vpop.f32.mrf.mxu0  ;;  %v1476_v7 = vpack.c.bf16 %v2285_v39, %v2276_v61  ;;  %v2297_v63 = vadd.f32 %v2198_v5, %v593_v27  ;;  %v1661_v8 = vpop.f32.mrf.mxu1 }
 0x101   :  { %v1406_v45 = vpack.c.bf16 %v490_v51, %v487_v48  ;;  %v482_v49 = vadd.f32 %v2198_v5, %v481_v57  ;;  %v1016_v32 = vadd.f32 %v1015_v56, %v479_v42  ;;  %v1148_v33 = vadd.f32 %v1147_v55, %v1085_v53 }
 0x102   :  { %v1633_v0 = vpop.f32.mrf.mxu0  ;;  %1548 = vst [vmem:[%s2560_s5 + $0xa8] sm:$0xff] %v1476_v7   ;;  %v1089_v15 = vmul.f32 %v490_v51, %v490_v51  ;;  %v1471_v52 = vpack.c.bf16 %v2297_v63, %v2288_v6  ;;  %v606_v19 = vpop.f32.mrf.mxu1  ;;  %v2308_v21 = vadd.f32 %v1661_v8, %v2198_v5 }
 0x103   :  { %1534 = vst [vmem:[%s2560_s5 + $0x38] sm:$0xff] %v1406_v45   ;;  %v1401_v34 = vpack.c.bf16 %v482_v49, %v479_v42  ;;  %v1087_v35 = vmul.f32 %v482_v49, %v482_v49  ;;  %v1149_v58 = vadd.f32 %v1148_v33, %v1086_v62  ;;  %v1017_v1 = vadd.f32 %v1016_v32, %v482_v49 }
 0x104   :  { %v494_v3 = vpop.f32.mrf.mxu0  ;;  %v503_v28 = vadd.f32 %v1633_v0, %v2198_v5  ;;  %1547 = vst [vmem:[%s2560_s5 + $0xa0] sm:$0xff] %v1471_v52   ;;  %v1662_v29 = vpop.f32.mrf.mxu1  ;;  %v2320_v47 = vadd.f32 %v2198_v5, %v606_v19 }
 0x105   :  { %1533 = vst [vmem:[%s2560_s5 + $0x30] sm:$0xff] %v1401_v34   ;;  %v1018_v11 = vadd.f32 %v1017_v1, %v487_v48  ;;  %v1150_v12 = vadd.f32 %v1149_v58, %v1087_v35  ;;  %v495_v20 = vadd.f32 %v2198_v5, %v494_v3  ;;  %v2317_v36 = vadd.f32 %v1662_v29, %v2198_v5 }
 0x106   :  { %v1634_v2 = vpop.f32.mrf.mxu0  ;;  %v609_v48 = vpop.f32.mrf.mxu1 }
 0x107   :  { %v506_v14 = vadd.f32 %v1634_v2, %v2198_v5  ;;  %v1151_v40 = vadd.f32 %v1150_v12, %v1088_v4  ;;  %v1019_v44 = vadd.f32 %v1018_v11, %v490_v51  ;;  %v1090_v38 = vmul.f32 %v495_v20, %v495_v20 }
 0x108   :  { %v497_v9 = vpop.f32.mrf.mxu0  ;;  %v1092_v51 = vmul.f32 %v503_v28, %v503_v28  ;;  %v1486_v53 = vpack.c.bf16 %v2317_v36, %v2308_v21  ;;  %v2329_v60 = vadd.f32 %v2198_v5, %v609_v48  ;;  %v1665_v45 = vpop.f32.mrf.mxu1 }
 0x109   :  { %v1416_v41 = vpack.c.bf16 %v506_v14, %v503_v28  ;;  %v498_v13 = vadd.f32 %v2198_v5, %v497_v9  ;;  %v1020_v18 = vadd.f32 %v1019_v44, %v495_v20  ;;  %v1152_v24 = vadd.f32 %v1151_v40, %v1089_v15 }
 0x10a   :  { %v1637_v25 = vpop.f32.mrf.mxu0  ;;  %1550 = vst [vmem:[%s2560_s5 + $0xb8] sm:$0xff] %v1486_v53   ;;  %v1093_v62 = vmul.f32 %v506_v14, %v506_v14  ;;  %v1481_v34 = vpack.c.bf16 %v2329_v60, %v2320_v47  ;;  %v622_v35 = vpop.f32.mrf.mxu1  ;;  %v2340_v3 = vadd.f32 %v1665_v45, %v2198_v5 }
 0x10b   :  { %1536 = vst [vmem:[%s2560_s5 + $0x48] sm:$0xff] %v1416_v41   ;;  %v1411_v30 = vpack.c.bf16 %v498_v13, %v495_v20  ;;  %v1091_v31 = vmul.f32 %v498_v13, %v498_v13  ;;  %v1153_v37 = vadd.f32 %v1152_v24, %v1090_v38  ;;  %v1021_v42 = vadd.f32 %v1020_v18, %v498_v13 }
 0x10c   :  { %v510_v43 = vpop.f32.mrf.mxu0  ;;  %v519_v49 = vadd.f32 %v1637_v25, %v2198_v5  ;;  %1549 = vst [vmem:[%s2560_s5 + $0xb0] sm:$0xff] %v1481_v34   ;;  %v1666_v12 = vpop.f32.mrf.mxu1  ;;  %v2352_v40 = vadd.f32 %v2198_v5, %v622_v35 }
 0x10d   :  { %1535 = vst [vmem:[%s2560_s5 + $0x40] sm:$0xff] %v1411_v30   ;;  %v1022_v55 = vadd.f32 %v1021_v42, %v503_v28  ;;  %v1154_v56 = vadd.f32 %v1153_v37, %v1091_v31  ;;  %v511_v57 = vadd.f32 %v2198_v5, %v510_v43  ;;  %v2349_v8 = vadd.f32 %v1666_v12, %v2198_v5 }
 0x10e   :  { %v1638_v59 = vpop.f32.mrf.mxu0  ;;  %v625_v44 = vpop.f32.mrf.mxu1  ;;  %v1096_v9 = vmul.f32 %v519_v49, %v519_v49 }
 0x10f   :  { %v522_v32 = vadd.f32 %v1638_v59, %v2198_v5  ;;  %v1155_v33 = vadd.f32 %v1154_v56, %v1092_v51  ;;  %v1023_v0 = vadd.f32 %v1022_v55, %v506_v14  ;;  %v1094_v4 = vmul.f32 %v511_v57, %v511_v57 }
 0x110   :  { %v513_v23 = vpop.f32.mrf.mxu0  ;;  %v1496_v52 = vpack.c.bf16 %v2349_v8, %v2340_v3  ;;  %v2361_v38 = vadd.f32 %v2198_v5, %v625_v44  ;;  %v1669_v24 = vpop.f32.mrf.mxu1 }
 0x111   :  { %v1426_v58 = vpack.c.bf16 %v522_v32, %v519_v49  ;;  %v514_v1 = vadd.f32 %v2198_v5, %v513_v23  ;;  %v1024_v27 = vadd.f32 %v1023_v0, %v511_v57  ;;  %v1156_v7 = vadd.f32 %v1155_v33, %v1093_v62 }
 0x112   :  { %v1641_v11 = vpop.f32.mrf.mxu0  ;;  %1552 = vst [vmem:[%s2560_s5 + $0xc8] sm:$0xff] %v1496_v52   ;;  %v1097_v30 = vmul.f32 %v522_v32, %v522_v32  ;;  %v1491_v43 = vpack.c.bf16 %v2361_v38, %v2352_v40  ;;  %v638_v48 = vpop.f32.mrf.mxu1  ;;  %v2372_v55 = vadd.f32 %v1669_v24, %v2198_v5 }
 0x113   :  { %1538 = vst [vmem:[%s2560_s5 + $0x58] sm:$0xff] %v1426_v58   ;;  %v1421_v20 = vpack.c.bf16 %v514_v1, %v511_v57  ;;  %v1095_v2 = vmul.f32 %v514_v1, %v514_v1  ;;  %v1157_v28 = vadd.f32 %v1156_v7, %v1094_v4  ;;  %v1025_v14 = vadd.f32 %v1024_v27, %v514_v1 }
 0x114   :  { %v526_v15 = vpop.f32.mrf.mxu0  ;;  %v535_v25 = vadd.f32 %v1641_v11, %v2198_v5  ;;  %1551 = vst [vmem:[%s2560_s5 + $0xc0] sm:$0xff] %v1491_v43   ;;  %v2384_v35 = vadd.f32 %v2198_v5, %v638_v48 }
 0x115   :  { %1537 = vst [vmem:[%s2560_s5 + $0x50] sm:$0xff] %v1421_v20   ;;  %v1026_v19 = vadd.f32 %v1025_v14, %v519_v49  ;;  %v1158_v41 = vadd.f32 %v1157_v28, %v1095_v2  ;;  %v527_v13 = vadd.f32 %v2198_v5, %v526_v15  ;;  %v1670_v49 = vpop.f32.mrf.mxu1 }
 0x116   :  { %v1642_v18 = vpop.f32.mrf.mxu0  ;;  %v2381_v33 = vadd.f32 %v1670_v49, %v2198_v5  ;;  %v1100_v1 = vmul.f32 %v535_v25, %v535_v25 }
 0x117   :  { %v538_v29 = vadd.f32 %v1642_v18, %v2198_v5  ;;  %v1159_v31 = vadd.f32 %v1158_v41, %v1096_v9  ;;  %v1027_v37 = vadd.f32 %v1026_v19, %v522_v32  ;;  %v1098_v57 = vmul.f32 %v527_v13, %v527_v13  ;;  %v641_v58 = vpop.f32.mrf.mxu1 }
 0x118   :  { %v529_v42 = vpop.f32.mrf.mxu0  ;;  %v1506_v27 = vpack.c.bf16 %v2381_v33, %v2372_v55  ;;  %v2393_v20 = vadd.f32 %v2198_v5, %v641_v58 }
 0x119   :  { %v1436_v51 = vpack.c.bf16 %v538_v29, %v535_v25  ;;  %v530_v53 = vadd.f32 %v2198_v5, %v529_v42  ;;  %v1028_v56 = vadd.f32 %v1027_v37, %v527_v13  ;;  %v1160_v59 = vadd.f32 %v1159_v31, %v1097_v30  ;;  %v1673_v2 = vpop.f32.mrf.mxu1 }
 0x11a   :  { %v1645_v45 = vpop.f32.mrf.mxu0  ;;  %1554 = vst [vmem:[%s2560_s5 + $0xd8] sm:$0xff] %v1506_v27   ;;  %v1101_v15 = vmul.f32 %v538_v29, %v538_v29  ;;  %v1501_v19 = vpack.c.bf16 %v2393_v20, %v2384_v35  ;;  %v2404_v24 = vadd.f32 %v1673_v2, %v2198_v5 }
 0x11b   :  { %1540 = vst [vmem:[%s2560_s5 + $0x68] sm:$0xff] %v1436_v51   ;;  %v1431_v32 = vpack.c.bf16 %v530_v53, %v527_v13  ;;  %v1099_v62 = vmul.f32 %v530_v53, %v530_v53  ;;  %v1161_v0 = vadd.f32 %v1160_v59, %v1098_v57  ;;  %v1029_v23 = vadd.f32 %v1028_v56, %v530_v53  ;;  %v654_v41 = vpop.f32.mrf.mxu1 }
 0x11c   :  { %v542_v34 = vpop.f32.mrf.mxu0  ;;  %v551_v28 = vadd.f32 %v1645_v45, %v2198_v5  ;;  %1553 = vst [vmem:[%s2560_s5 + $0xd0] sm:$0xff] %v1501_v19   ;;  %v2413_v43 = vadd.f32 %v2198_v5, %v654_v41  ;;  %v1108_v19 = vmul.f32 %v2214_v50, %v2214_v50 }
 0x11d   :  { %1539 = vst [vmem:[%s2560_s5 + $0x60] sm:$0xff] %v1431_v32   ;;  %v1030_v4 = vadd.f32 %v1029_v23, %v535_v25  ;;  %v1162_v7 = vadd.f32 %v1161_v0, %v1099_v62  ;;  %v543_v11 = vadd.f32 %v2198_v5, %v542_v34  ;;  %v1674_v37 = vpop.f32.mrf.mxu1 }
 0x11e   :  { %v1646_v12 = vpop.f32.mrf.mxu0  ;;  %v2416_v48 = vadd.f32 %v1674_v37, %v2198_v5  ;;  %v1104_v45 = vmul.f32 %v551_v28, %v551_v28 }
 0x11f   :  { %v554_v14 = vadd.f32 %v1646_v12, %v2198_v5  ;;  %v1163_v44 = vadd.f32 %v1162_v7, %v1100_v1  ;;  %v1031_v9 = vadd.f32 %v1030_v4, %v538_v29  ;;  %v1102_v30 = vmul.f32 %v543_v11, %v543_v11  ;;  %v657_v56 = vpop.f32.mrf.mxu1 }
 0x120   :  { %v545_v52 = vpop.f32.mrf.mxu0  ;;  %v1516_v57 = vpack.c.bf16 %v2416_v48, %v2404_v24  ;;  %v2424_v59 = vadd.f32 %v2198_v5, %v657_v56  ;;  %v1106_v4 = vmul.f32 %v2224_v54, %v2224_v54  ;;  %v1113_v56 = vmul.f32 %v2253_v22, %v2253_v22 }
 0x121   :  { %v1446_v13 = vpack.c.bf16 %v554_v14, %v551_v28  ;;  %v546_v18 = vadd.f32 %v2198_v5, %v545_v52  ;;  %v1032_v25 = vadd.f32 %v1031_v9, %v543_v11  ;;  %v1164_v31 = vadd.f32 %v1163_v44, %v1101_v15  ;;  %v1677_v62 = vpop.f32.mrf.mxu1 }
 0x122   :  { %1556 = vst [vmem:[%s2560_s5 + $0xe8] sm:$0xff] %v1516_v57   ;;  %v1511_v0 = vpack.c.bf16 %v2424_v59, %v2413_v43  ;;  %v1105_v23 = vmul.f32 %v554_v14, %v554_v14  ;;  %v2435_v27 = vadd.f32 %v1677_v62, %v2198_v5  ;;  %v1107_v15 = vmul.f32 %v2233_v10, %v2233_v10 }
 0x123   :  { %1542 = vst [vmem:[%s2560_s5 + $0x78] sm:$0xff] %v1446_v13   ;;  %v1441_v29 = vpack.c.bf16 %v546_v18, %v543_v11  ;;  %v1103_v42 = vmul.f32 %v546_v18, %v546_v18  ;;  %v1165_v51 = vadd.f32 %v1164_v31, %v1102_v30  ;;  %v1033_v53 = vadd.f32 %v1032_v25, %v546_v18  ;;  %v670_v1 = vpop.f32.mrf.mxu1 }
 0x124   :  { %1555 = vst [vmem:[%s2560_s5 + $0xe0] sm:$0xff] %v1511_v0   ;;  %v2441_v2 = vadd.f32 %v2198_v5, %v670_v1  ;;  %v1109_v18 = vmul.f32 %v2221_v16, %v2221_v16  ;;  %v1110_v30 = vmul.f32 %v2256_v26, %v2256_v26  ;;  %v1115_v0 = vmul.f32 %v2297_v63, %v2297_v63 }
 0x125   :  { %1541 = vst [vmem:[%s2560_s5 + $0x70] sm:$0xff] %v1441_v29   ;;  %v1034_v49 = vadd.f32 %v1033_v53, %v551_v28  ;;  %v1166_v32 = vadd.f32 %v1165_v51, %v1103_v42  ;;  %v1678_v12 = vpop.f32.mrf.mxu1  ;;  %v1111_v42 = vmul.f32 %v2265_v46, %v2265_v46  ;;  %v1112_v51 = vmul.f32 %v2244_v17, %v2244_v17 }
 0x126   :  { %v2444_v28 = vadd.f32 %v1678_v12, %v2198_v5  ;;  %v1119_v12 = vmul.f32 %v2329_v60, %v2329_v60 }
 0x127   :  { %v1167_v34 = vadd.f32 %v1166_v32, %v1104_v45  ;;  %v1035_v58 = vadd.f32 %v1034_v49, %v554_v14  ;;  %v673_v9 = vpop.f32.mrf.mxu1  ;;  %v1114_v49 = vmul.f32 %v2288_v6, %v2288_v6 }
 0x128   :  { %v1526_v52 = vpack.c.bf16 %v2444_v28, %v2435_v27 }
 0x129   :  { %v1036_v7 = vadd.f32 %v1035_v58, %v2224_v54  ;;  %v1168_v11 = vadd.f32 %v1167_v34, %v1105_v23  ;;  %v2452_v54 = vadd.f32 %v2198_v5, %v673_v9 }
 0x12a   :  { %1558 = vst [vmem:[%s2560_s5 + $0xf8] sm:$0xff] %v1526_v52   ;;  %v1122_v52 = vmul.f32 %v2352_v40, %v2352_v40 }
 0x12b   :  { %v1037_v14 = vadd.f32 %v1036_v7, %v2233_v10  ;;  %v1169_v44 = vadd.f32 %v1168_v11, %v1106_v4  ;;  %v1521_v10 = vpack.c.bf16 %v2452_v54, %v2441_v2  ;;  %v1118_v4 = vmul.f32 %v2320_v47, %v2320_v47 }
 0x12d   :  { %v1038_v41 = vadd.f32 %v1037_v14, %v2214_v50  ;;  %v1170_v13 = vadd.f32 %v1169_v44, %v1107_v15  ;;  %1557 = vst [vmem:[%s2560_s5 + $0xf0] sm:$0xff] %v1521_v10  }
 0x12f   :  { %v1171_v25 = vadd.f32 %v1170_v13, %v1108_v19  ;;  %v1039_v5 = vadd.f32 %v1038_v41, %v2221_v16  ;;  %v1123_v13 = vmul.f32 %v2361_v38, %v2361_v38 }
 0x131   :  { %v1040_v50 = vadd.f32 %v1039_v5, %v2256_v26  ;;  %v1172_v31 = vadd.f32 %v1171_v25, %v1109_v18 }
 0x133   :  { %v1173_v37 = vadd.f32 %v1172_v31, %v1110_v30  ;;  %v1041_v29 = vadd.f32 %v1040_v50, %v2265_v46  ;;  %v1126_v50 = vmul.f32 %v2384_v35, %v2384_v35 }
 0x135   :  { %v1042_v16 = vadd.f32 %v1041_v29, %v2244_v17  ;;  %v1174_v53 = vadd.f32 %v1173_v37, %v1111_v42  ;;  %v1116_v17 = vmul.f32 %v2276_v61, %v2276_v61  ;;  %v1127_v37 = vmul.f32 %v2393_v20, %v2393_v20 }
 0x137   :  { %v1175_v57 = vadd.f32 %v1174_v53, %v1112_v51  ;;  %v1043_v45 = vadd.f32 %v1042_v16, %v2253_v22  ;;  %v1117_v22 = vmul.f32 %v2285_v39, %v2285_v39  ;;  %v1130_v53 = vmul.f32 %v2413_v43, %v2413_v43 }
 0x139   :  { %v1044_v26 = vadd.f32 %v1043_v45, %v2288_v6  ;;  %v1176_v32 = vadd.f32 %v1175_v57, %v1113_v56  ;;  %v1131_v45 = vmul.f32 %v2424_v59, %v2424_v59 }
 0x13b   :  { %v1177_v62 = vadd.f32 %v1176_v32, %v1114_v49  ;;  %v1045_v46 = vadd.f32 %v1044_v26, %v2297_v63 }
 0x13d   :  { %v1046_v23 = vadd.f32 %v1045_v46, %v2276_v61  ;;  %v1178_v34 = vadd.f32 %v1177_v62, %v1115_v0  ;;  %v1120_v61 = vmul.f32 %v2308_v21, %v2308_v21  ;;  %v1134_v46 = vmul.f32 %v2441_v2, %v2441_v2 }
 0x13f   :  { %v1179_v58 = vadd.f32 %v1178_v34, %v1116_v17  ;;  %v1047_v1 = vadd.f32 %v1046_v23, %v2285_v39  ;;  %v1121_v39 = vmul.f32 %v2317_v36, %v2317_v36  ;;  %v1135_v23 = vmul.f32 %v2452_v54, %v2452_v54 }
 0x141   :  { %v1048_v6 = vadd.f32 %v1047_v1, %v2320_v47  ;;  %v1180_v7 = vadd.f32 %v1179_v58, %v1117_v22 }
 0x143   :  { %v1181_v11 = vadd.f32 %v1180_v7, %v1118_v4  ;;  %v1049_v63 = vadd.f32 %v1048_v6, %v2329_v60 }
 0x145   :  { %v1050_v14 = vadd.f32 %v1049_v63, %v2308_v21  ;;  %v1182_v15 = vadd.f32 %v1181_v11, %v1119_v12  ;;  %v1124_v21 = vmul.f32 %v2340_v3, %v2340_v3 }
 0x147   :  { %v1183_v44 = vadd.f32 %v1182_v15, %v1120_v61  ;;  %v1051_v9 = vadd.f32 %v1050_v14, %v2317_v36  ;;  %v1125_v36 = vmul.f32 %v2349_v8, %v2349_v8 }
 0x149   :  { %v1052_v47 = vadd.f32 %v1051_v9, %v2352_v40  ;;  %v1184_v19 = vadd.f32 %v1183_v44, %v1121_v39 }
 0x14b   :  { %v1185_v41 = vadd.f32 %v1184_v19, %v1122_v52  ;;  %v1053_v60 = vadd.f32 %v1052_v47, %v2361_v38 }
 0x14d   :  { %v1054_v10 = vadd.f32 %v1053_v60, %v2340_v3  ;;  %v1186_v18 = vadd.f32 %v1185_v41, %v1123_v13  ;;  %v1128_v3 = vmul.f32 %v2372_v55, %v2372_v55 }
 0x14f   :  { %v1187_v25 = vadd.f32 %v1186_v18, %v1124_v21  ;;  %v1055_v5 = vadd.f32 %v1054_v10, %v2349_v8  ;;  %v1129_v8 = vmul.f32 %v2381_v33, %v2381_v33 }
 0x151   :  { %v1056_v40 = vadd.f32 %v1055_v5, %v2384_v35  ;;  %v1188_v30 = vadd.f32 %v1187_v25, %v1125_v36 }
 0x153   :  { %v1189_v31 = vadd.f32 %v1188_v30, %v1126_v50  ;;  %v1057_v38 = vadd.f32 %v1056_v40, %v2393_v20 }
 0x155   :  { %v1058_v29 = vadd.f32 %v1057_v38, %v2372_v55  ;;  %v1190_v42 = vadd.f32 %v1189_v31, %v1127_v37  ;;  %v1132_v55 = vmul.f32 %v2404_v24, %v2404_v24 }
 0x157   :  { %v1191_v51 = vadd.f32 %v1190_v42, %v1128_v3  ;;  %v1059_v16 = vadd.f32 %v1058_v29, %v2381_v33  ;;  %v1133_v33 = vmul.f32 %v2416_v48, %v2416_v48 }
 0x159   :  { %v1060_v35 = vadd.f32 %v1059_v16, %v2413_v43  ;;  %v1192_v56 = vadd.f32 %v1191_v51, %v1129_v8 }
 0x15b   :  { %v1193_v57 = vadd.f32 %v1192_v56, %v1130_v53  ;;  %v1061_v20 = vadd.f32 %v1060_v35, %v2424_v59 }
 0x15d   :  { %v1062_v26 = vadd.f32 %v1061_v20, %v2404_v24  ;;  %v1194_v49 = vadd.f32 %v1193_v57, %v1131_v45  ;;  %v1136_v24 = vmul.f32 %v2435_v27, %v2435_v27 }
 0x15f   :  { %v1195_v32 = vadd.f32 %v1194_v49, %v1132_v55  ;;  %v1063_v62 = vadd.f32 %v1062_v26, %v2416_v48  ;;  %v1137_v48 = vmul.f32 %v2444_v28, %v2444_v28 }
 0x161   :  { %v1064_v43 = vadd.f32 %v1063_v62, %v2441_v2  ;;  %v1196_v0 = vadd.f32 %v1195_v32, %v1133_v33 }
 0x163   :  { %v1197_v17 = vadd.f32 %v1196_v0, %v1134_v46  ;;  %v1065_v59 = vadd.f32 %v1064_v43, %v2452_v54 }
 0x165   :  { %v1066_v34 = vadd.f32 %v1065_v59, %v2435_v27  ;;  %v1198_v22 = vadd.f32 %v1197_v17, %v1135_v23 }
 0x167   :  { %v1067_v58 = vadd.f32 %v1066_v34, %v2444_v28  ;;  %v1199_v1 = vadd.f32 %v1198_v22, %v1136_v24 }
 0x169   :  { %v1068_v2 = vrot.slane %v1067_v58, 4  ;;  %v1200_v6 = vadd.f32 %v1199_v1, %v1137_v48 }
 0x16b   :  { %v1069_v4 = vadd.f32 %v1068_v2, %v1067_v58  ;;  %v1201_v7 = vrot.slane %v1200_v6, 4 }
 0x16d   :  { %v1070_v11 = vrot.slane %v1069_v4, 2  ;;  %v1202_v63 = vadd.f32 %v1201_v7, %v1200_v6 }
 0x16f   :  { %v1071_v12 = vadd.f32 %v1070_v11, %v1069_v4  ;;  %v1203_v54 = vrot.slane %v1202_v63, 2 }
 0x171   :  { %v1072_v61 = vrot.slane %v1071_v12, 1  ;;  %v1204_v14 = vadd.f32 %v1203_v54, %v1202_v63 }
 0x173   :  { %v1205_v15 = vrot.slane %v1204_v14, 1  ;;  %v1073_v27 = vadd.f32 %v1072_v61, %v1071_v12 }
 0x175   :  { %v1206_v39 = vadd.f32 %v1205_v15, %v1204_v14 }
 0x177   :  { %v1208_v44 = vsel %vm1207_vm0, %v1073_v27, %v1206_v39 }
 0x178   :  { %1213 = vst [vmem:[%s2561_s6] sm:$0x3] %v1208_v44 }

// kernel: bottleneck_forward.5
= control target key start
LH: loop header
LB: loop body
LE: loop exit
PB: predicated region body
PF: predicated region fallthrough
CT: control target
= control target key end

     0   :  { %s2592_s18 = smov 0   ;;  %s2594_s19 = smov 0   ;;  %s3469_s0 = inlined_call_operand.vmem [shape: bf16[2,18,18,128], index: 0, kind: input, shape index: {}]   ;;  %s3470_s1 = inlined_call_operand.vmem [shape: f32[1,128], index: 1, kind: input, shape index: {}]   ;;  %s3471_s2 = inlined_call_operand.vmem [shape: f32[1,128], index: 2, kind: input, shape index: {}]   ;;  %s3472_s3 = inlined_call_operand.vmem [shape: bf16[1152,128], index: 3, kind: input, shape index: {}]   ;;  %s3473_s4 = inlined_call_operand.vmem [shape: f32[1,128], index: 4, kind: input, shape index: {}]   ;;  %s3474_s5 = inlined_call_operand.vmem [shape: f32[512,128], index: 5, kind: output, shape index: {}]  }
   0x1   :  { %s2596_s20 = smov 0   ;;  %s2598_s21 = smov 0  }
   0x2   :  { %s2600_s22 = smov 0  }
   0x3 LB: > { %s24_s23 = sadd.s32 1, %s2551_s20  ;;  %s27_s24 = sadd.s32 1, %s2555_s21  ;;  %s2559_s22 = sphi %s2600_s22, %s15_s22   ;;  %s2555_s21 = sphi %s2598_s21, %s3520_s21   ;;  %s2551_s20 = sphi %s2596_s20, %s3519_s20   ;;  %s2547_s19 = sphi %s2594_s19, %s3518_s19   ;;  %s2543_s18 = sphi %s2592_s18, %s3517_s18  }
   0x4   : > { %p25_p0 = scmp.ge.s32.totalorder %s24_s23, 2  ;;  %p1879_p1 = scmp.ge.s32.totalorder %s2559_s22, 1 }
   0x5   : > { %p203_p2 = scmp.lt.s32.totalorder %s2559_s22, 5 }
   0x6   : > { %s3522_s23 = smov (%p25_p0, %s24_s23), 0  ;;  %s3524_s24 = smov (!%p25_p0, %s27_s24), %s2555_s21 }
   0x7   : > { %p204_p3 = pnand %p1879_p1, %p203_p2  ;;  %p29_p4 = scmp.ge.s32.totalorder %s3524_s24, 2 }
   0x9   : > { %s3526_s24 = smov (%p29_p4, %s3524_s24), 0  ;;  %207 = sbr.rel (%p204_p3) target bundleno = 387 (0x183), region = 40 }
   0xe   : > { %v2449_v0 = vld [vmem:[%s3472_s3 + $0x78] sm:$0xff]   ;;  %v2453_v4 = vld [vmem:[%s3472_s3 + $0x70] sm:$0xff]   ;;  %v2457_v8 = vld [vmem:[%s3472_s3 + $0x68] sm:$0xff]   ;;  %p233_p5 = scmp.lt.s32.totalorder %s2547_s19, 1  ;;  %v419_v23 = vlaneseq  ;;  %s2062_s25 = smul.u32 96, %s2543_s18  ;;  %vm642_vm7 = vcmask 1046528  }
   0xf   : > { %v2450_v1 = vld [vmem:[%s3472_s3 + $0xf8] sm:$0xff]   ;;  %2087 = vmatprep.subr.bf16.mxu0 %v2449_v0  ;;  %v2454_v5 = vld [vmem:[%s3472_s3 + $0xf0] sm:$0xff]   ;;  %v2458_v9 = vld [vmem:[%s3472_s3 + $0xe8] sm:$0xff]   ;;  %p417_p6 = scmp.eq.s32.totalorder %s2543_s18, 0  ;;  %vm521_vm5 = vsmask.f32 7424 }
  0x10   : > { %v2451_v2 = vld [vmem:[%s3472_s3 + $0x38] sm:$0xff]   ;;  %2151 = vmatprep.subr.bf16.mxu1 %v2450_v1  ;;  %v2455_v6 = vld [vmem:[%s3472_s3 + $0x30] sm:$0xff]   ;;  %v2459_v10 = vld [vmem:[%s3472_s3 + $0x28] sm:$0xff]   ;;  %s234_s27 = scalar_select %p233_p5, %s2547_s19, 1  ;;  %v2713_v28 = vshrl.u32 %v419_v23, 7  ;;  %vm2561_vm8 = vmmov 1  }
  0x11   : > { %v2452_v3 = vld [vmem:[%s3472_s3 + $0xb8] sm:$0xff]   ;;  %2088 = vmatpush3.bf16.msra.mxu0 %v2451_v2  ;;  %v2456_v7 = vld [vmem:[%s3472_s3 + $0xb0] sm:$0xff]   ;;  %v2460_v11 = vld [vmem:[%s3472_s3 + $0xa8] sm:$0xff]   ;;  %s432_s26 = scalar_select %p417_p6, 1, 0 }
  0x12   : > { %2152 = vmatpush3.bf16.msra.mxu1 %v2452_v3  ;;  %2089 = vmatprep.subr.bf16.mxu0 %v2453_v4  ;;  %v2461_v12 = vld [vmem:[%s3472_s3 + $0x60] sm:$0xff]   ;;  %v2465_v16 = vld [vmem:[%s3472_s3 + $0x58] sm:$0xff]   ;;  %v2469_v20 = vld [vmem:[%s3472_s3 + $0x50] sm:$0xff]   ;;  %s2407_s11 = smul.u32 216, %s234_s27  ;;  %v2731_v33 = vadd.s32 16, %v2713_v28  ;;  %vm423_vm0 = vcmp.lt.s32.totalorder %v2713_v28, 1 }
  0x13   : > { %2153 = vmatprep.subr.bf16.mxu1 %v2454_v5  ;;  %v2462_v13 = vld [vmem:[%s3472_s3 + $0xe0] sm:$0xff]   ;;  %v2466_v17 = vld [vmem:[%s3472_s3 + $0xd8] sm:$0xff]   ;;  %v2470_v21 = vld [vmem:[%s3472_s3 + $0xd0] sm:$0xff]   ;;  %v433_v46 = vstv %s432_s26  ;;  %p418_p7 = scmp.eq.s32.totalorder %s2543_s18, 1  ;;  %s1881_s28 = sshll.u32 %s2547_s19, 1 }
  0x14   : > { %v2463_v14 = vld [vmem:[%s3472_s3 + $0x20] sm:$0xff]   ;;  %v2467_v18 = vld [vmem:[%s3472_s3 + $0x18] sm:$0xff]   ;;  %v2471_v22 = vld [vmem:[%s3472_s3 + $0x10] sm:$0xff]   ;;  %s237_s30 = scalar_lea.vmem %s3469_s0, %s2407_s11  ;;  %vm428_vm1 = vcmp.gt.s32.totalorder %v2731_v33, 16  ;;  %vm2759_vm2 = vcmp.eq.s32.totalorder %v433_v46, 1  ;;  %s239_s29 = sadd.s32 %s2543_s18, %s1881_s28 }
  0x15   : > { %2090 = vmatpush3.bf16.msra.mxu0 %v2455_v6  ;;  %v2464_v15 = vld [vmem:[%s3472_s3 + $0xa0] sm:$0xff]   ;;  %v2468_v19 = vld [vmem:[%s3472_s3 + $0x98] sm:$0xff]   ;;  %v2472_v24 = vld [vmem:[%s3472_s3 + $0x90] sm:$0xff]   ;;  %s2724_s13 = scalar_lea.vmem %s237_s30, %s2062_s25 }
  0x16   : > { %2154 = vmatpush3.bf16.msra.mxu1 %v2456_v7  ;;  %2091 = vmatprep.subr.bf16.mxu0 %v2457_v8  ;;  %v2473_v25 = vld [vmem:[%s3472_s3 + $0x48] sm:$0xff]   ;;  %v2477_v30 = vld [vmem:[%s3472_s3 + $0x40] sm:$0xff]   ;;  %v2481_v47 = vld [vmem:[%s3472_s3 + $0x178] sm:$0xff]   ;;  %s2928_s25 = scalar_select %p418_p7, 1, 0 }
  0x17   : > { %2155 = vmatprep.subr.bf16.mxu1 %v2458_v9  ;;  %v2474_v26 = vld [vmem:[%s3472_s3 + $0xc8] sm:$0xff]   ;;  %v2478_v31 = vld [vmem:[%s3472_s3 + $0xc0] sm:$0xff]   ;;  %v2482_v51 = vld [vmem:[%s3472_s3 + $0x1f8] sm:$0xff]  }
  0x18   : > { %v2475_v27 = vld [vmem:[%s3472_s3 + $0x8] sm:$0xff]   ;;  %v2479_v32 = vld [vmem:[%s3472_s3] sm:$0xff]   ;;  %vm2773_vm3 = vmor %vm423_vm0, %vm2759_vm2 }
  0x19   : > { %2092 = vmatpush3.bf16.msra.mxu0 %v2459_v10  ;;  %v2476_v29 = vld [vmem:[%s3472_s3 + $0x88] sm:$0xff]   ;;  %v2480_v34 = vld [vmem:[%s3472_s3 + $0x80] sm:$0xff]   ;;  %vm2781_vm4 = vmor %vm428_vm1, %vm2759_vm2 }
  0x1a   : > { %2156 = vmatpush3.bf16.msra.mxu1 %v2460_v11  ;;  %2093 = vmatprep.subr.bf16.mxu0 %v2461_v12  ;;  %v2064_v35 = vld [vmem:[%s2724_s13] sm:$0xff]   ;;  %v255_v36 = vld [vmem:[%s2724_s13 + $0x8] sm:$0x1]  ;;  %v256_v42 = vld [vmem:[%s2724_s13 + $0xc] sm:$0xff]  }
  0x1b   : > { %2157 = vmatprep.subr.bf16.mxu1 %v2462_v13  ;;  %v2741_v37 = vld [vmem:[%s3470_s1] ss:$0 sm:$0xff]  ;;  %v2065_v38 = vunpack.c.l.bf16 %v2064_v35  ;;  %v2066_v39 = vunpack.c.h.bf16 %v2064_v35  ;;  %v285_v40 = vunpack.c.l.bf16 %v255_v36  ;;  %v286_v49 = vunpack.c.l.bf16 %v256_v42  ;;  %v258_v62 = vld [vmem:[%s2724_s13 + $0x14] sm:$0x1]  ;;  %vm1967_vm6 = vmneg %vm423_vm0 }
  0x1c   : > { %v2749_v41 = vld [vmem:[%s3471_s2] ss:$0 sm:$0xff]  ;;  %v287_v50 = vunpack.c.h.bf16 %v256_v42  ;;  %v288_v1 = vunpack.c.l.bf16 %v258_v62  ;;  %v2083_v2 = vld [vmem:[%s2724_s13 + $0x18] sm:$0xff]   ;;  %vm2799_vm9 = vmpackc.low %vm2561_vm8, %vm1967_vm6 }
  0x1d   : > { %2094 = vmatpush3.bf16.msra.mxu0 %v2463_v14  ;;  %v320_v43 = vmul.f32 %v2065_v38, %v2741_v37  ;;  %v321_v44 = vmul.f32 %v2066_v39, %v2741_v37  ;;  %v322_v45 = vmul.f32 %v2741_v37, %v285_v40  ;;  %v323_v57 = vmul.f32 %v2741_v37, %v286_v49  ;;  %vm1962_vm10 = vmneg %vm2759_vm2  ;;  %v2490_v55 = vld [vmem:[%s3472_s3 + $0x1e8] sm:$0xff]   ;;  %v2084_v62 = vld [vmem:[%s2724_s13 + $0x30] sm:$0xff]  }
  0x1e   : > { %2158 = vmatpush3.bf16.msra.mxu1 %v2464_v15  ;;  %2095 = vmatprep.subr.bf16.mxu0 %v2465_v16  ;;  %v324_v58 = vmul.f32 %v2741_v37, %v287_v50  ;;  %v325_v12 = vmul.f32 %v2741_v37, %v288_v1  ;;  %v2069_v13 = vunpack.c.l.bf16 %v2083_v2  ;;  %v2070_v14 = vunpack.c.h.bf16 %v2083_v2  ;;  %vm1963_vm11 = vmneg %vm2773_vm3  ;;  %v2492_v2 = vld [vmem:[%s3472_s3 + $0x1a8] sm:$0xff]  }
  0x1f   : > { %2159 = vmatprep.subr.bf16.mxu1 %v2466_v17  ;;  %v357_v52 = vadd.f32 %v2749_v41, %v320_v43  ;;  %v358_v53 = vadd.f32 %v2749_v41, %v321_v44  ;;  %v359_v54 = vadd.f32 %v2749_v41, %v322_v45  ;;  %v360_v63 = vadd.f32 %v2749_v41, %v323_v57  ;;  %vm2840_vm12 = vmpackc.low %vm1962_vm10, %vm1963_vm11 }
  0x20   : > { %v361_v0 = vadd.f32 %v2749_v41, %v324_v58  ;;  %v327_v38 = vmul.f32 %v2070_v14, %v2741_v37 }
  0x21   : > { %2096 = vmatpush3.bf16.msra.mxu0 %v2467_v18  ;;  %v387_v59 = vmax.f32 %v357_v52, 0.0  ;;  %v388_v60 = vmax.f32 %v358_v53, 0.0  ;;  %v389_v61 = vmax.f32 %v359_v54, 0.0  ;;  %v390_v8 = vmax.f32 %v360_v63, 0.0  ;;  %v2485_v53 = vld [vmem:[%s3472_s3 + $0x170] sm:$0xff]  }
  0x22   : > { %2160 = vmatpush3.bf16.msra.mxu1 %v2468_v19  ;;  %2097 = vmatprep.subr.bf16.mxu0 %v2469_v20  ;;  %v391_v9 = vmax.f32 %v361_v0, 0.0  ;;  %v2484_v19 = vld [vmem:[%s3472_s3 + $0x1b8] sm:$0xff]   ;;  %v364_v46 = vadd.f32 %v2749_v41, %v327_v38 }
  0x23   : > { %2161 = vmatprep.subr.bf16.mxu1 %v2470_v21  ;;  %v471_v3 = vsel %vm2773_vm3, 0.0, %v387_v59  ;;  %v472_v4 = vsel %vm2759_vm2, 0.0, %v388_v60  ;;  %v473_v5 = vsel %vm2781_vm4, 0.0, %v389_v61  ;;  %v1965_v11 = vpack.c.bf16 %v388_v60, %v387_v59  ;;  %v2487_v59 = vld [vmem:[%s3472_s3 + $0x130] sm:$0xff]   ;;  %v264_v61 = vld [vmem:[%s2724_s13 + $0x2c] sm:$0x1] }
  0x24   : > { %v501_v6 = vpack.c.bf16 %v472_v4, %v471_v3  ;;  %v502_v7 = vpack.c.bf16 %v473_v5, %v473_v5  ;;  %v474_v18 = vsel %vm423_vm0, 0.0, %v390_v8  ;;  %v2813_v21 = vpack.c.bf16 %v391_v9, %v390_v8 }
  0x25   : > { %2098 = vmatpush3.bf16.msra.mxu0 %v2471_v22  ;;  %v2811_v20 = vpack.c.bf16 %v391_v9, %v474_v18  ;;  %v394_v58 = vmax.f32 %v364_v46, 0.0  ;;  %v294_v3 = vunpack.c.l.bf16 %v264_v61  ;;  %v2491_v18 = vld [vmem:[%s3472_s3 + $0x128] sm:$0xff]  }
  0x26   : > { %2162 = vmatpush3.bf16.msra.mxu1 %v2472_v24  ;;  %2099 = vmatprep.subr.bf16.mxu0 %v2473_v25  ;;  %v523_v15 = vshrl.u32 %v501_v6, 16  ;;  %v525_v16 = vshll.u32 %v501_v6, 16  ;;  %v530_v17 = vshll.u32 %v502_v7, 16  ;;  %v643_v22 = vrot.slane %v501_v6, 1 }
  0x27   : > { %2163 = vmatprep.subr.bf16.mxu1 %v2474_v26  ;;  %v644_v23 = vrot.slane %v502_v7, 1  ;;  %v362_v26 = vadd.f32 %v2749_v41, %v325_v12  ;;  %1998 = vmatprep.mubr.msk.bf16.mxu1 %vm2799_vm9, %v2813_v21  ;;  %v535_v35 = vshrl.u32 %v2811_v20, 16  ;;  %v537_v36 = vshll.u32 %v2811_v20, 16  ;;  %v2489_v12 = vld [vmem:[%s3472_s3 + $0x168] sm:$0xff]  }
  0x28   : > { %v527_v24 = vrot.slane %v525_v16, 1  ;;  %v532_v25 = vrot.slane %v530_v17, 1  ;;  %v646_v44 = vrot.slane %v2811_v20, 1 }
  0x29   : > { %2100 = vmatpush3.bf16.msra.mxu0 %v2475_v27  ;;  %v326_v27 = vmul.f32 %v2069_v13, %v2741_v37  ;;  %v392_v42 = vmax.f32 %v362_v26, 0.0  ;;  %v539_v45 = vrot.slane %v537_v36, 1  ;;  %v2073_v13 = vunpack.c.l.bf16 %v2084_v62 }
  0x2a   : > { %2164 = vmatpush3.bf16.msra.mxu1 %v2476_v29  ;;  %2101 = vmatprep.subr.bf16.mxu0 %v2477_v30  ;;  %v2486_v29 = vld [vmem:[%s3472_s3 + $0x1f0] sm:$0xff]   ;;  %v261_v30 = vld [vmem:[%s2724_s13 + $0x20] sm:$0x1]  ;;  %v528_v39 = vor.u32 %v527_v24, %v523_v15 }
  0x2b   : > { %2165 = vmatprep.subr.bf16.mxu1 %v2478_v31  ;;  %v262_v31 = vld [vmem:[%s2724_s13 + $0x24] sm:$0xff]   ;;  %v363_v43 = vadd.f32 %v2749_v41, %v326_v27  ;;  %v291_v48 = vunpack.c.l.bf16 %v261_v30  ;;  %v540_v57 = vor.u32 %v539_v45, %v535_v35  ;;  %v2074_v30 = vunpack.c.h.bf16 %v2084_v62 }
  0x2c   : > { %v292_v49 = vunpack.c.l.bf16 %v262_v31  ;;  %v533_v50 = vsel %vm521_vm5, %v528_v39, %v532_v25  ;;  %v293_v54 = vunpack.c.h.bf16 %v262_v31  ;;  %v2493_v25 = vld [vmem:[%s3472_s3 + $0x160] sm:$0xff]   ;;  %v332_v39 = vmul.f32 %v2073_v13, %v2741_v37 }
  0x2d   : > { %2102 = vmatpush3.bf16.msra.mxu0 %v2479_v32  ;;  %v645_v32 = vsel %vm642_vm7, %v643_v22, %v644_v23  ;;  %v393_v52 = vmax.f32 %v363_v43, 0.0  ;;  %1328 = vmatprep.mubr.bf16.mxu0 %v533_v50  ;;  %v328_v60 = vmul.f32 %v2741_v37, %v291_v48  ;;  %v2496_v31 = vld [vmem:[%s3472_s3 + $0x1a0] sm:$0xff]   ;;  %v333_v45 = vmul.f32 %v2074_v30, %v2741_v37 }
  0x2e   : > { %2166 = vmatpush3.bf16.msra.mxu1 %v2480_v34  ;;  %2215 = vmatprep.subr.bf16.mxu0 %v2481_v47  ;;  %v2483_v34 = vld [vmem:[%s3472_s3 + $0x138] sm:$0xff]   ;;  %v2488_v47 = vld [vmem:[%s3472_s3 + $0x1b0] sm:$0xff]   ;;  %v329_v0 = vmul.f32 %v2741_v37, %v292_v49  ;;  %v330_v1 = vmul.f32 %v2741_v37, %v293_v54  ;;  %v369_v46 = vadd.f32 %v2749_v41, %v332_v39 }
  0x2f   : > { %2279 = vmatprep.subr.bf16.mxu1 %v2482_v51  ;;  %v476_v51 = vsel %vm428_vm1, 0.0, %v392_v42  ;;  %v477_v63 = vsel %vm423_vm0, 0.0, %v393_v52  ;;  %v2876_v6 = vpack.c.bf16 %v394_v58, %v393_v52  ;;  %v365_v8 = vadd.f32 %v2749_v41, %v328_v60  ;;  %v2498_v49 = vld [vmem:[%s3472_s3 + $0x1d8] sm:$0xff]   ;;  %v2503_v39 = vld [vmem:[%s3472_s3 + $0x110] sm:$0xff]  }
  0x30   : > { %v504_v56 = vpack.c.bf16 %v476_v51, %v476_v51  ;;  %1966 = vmatmul.mubr.msk.bf16.vlgmr.msra.gmra.mxu0 %vm2840_vm12, %v1965_v11  ;;  %v2874_v5 = vpack.c.bf16 %v394_v58, %v477_v63  ;;  %v366_v9 = vadd.f32 %v2749_v41, %v329_v0  ;;  %v367_v11 = vadd.f32 %v2749_v41, %v330_v1  ;;  %v2500_v54 = vld [vmem:[%s3472_s3 + $0x198] sm:$0xff]  }
  0x31   : > { %1426 = vmatmul.mubr.bf16.vlgmr.msra.gmra.mxu1 %v645_v32  ;;  %2216 = vmatpush3.bf16.msra.mxu0 %v2483_v34  ;;  %v395_v20 = vmax.f32 %v365_v8, 0.0  ;;  %v267_v32 = vld [vmem:[%s2724_s13 + $0x38] sm:$0x1]  ;;  %v2913_v34 = vld [vmem:[%s2724_s13 + $0x3c] sm:$0xff]  }
  0x32   : > { %2280 = vmatpush3.bf16.msra.mxu1 %v2484_v19  ;;  %v542_v4 = vshll.u32 %v504_v56, 16  ;;  %v647_v7 = vrot.slane %v504_v56, 1  ;;  %2217 = vmatprep.subr.bf16.mxu0 %v2485_v53  ;;  %v547_v16 = vshrl.u32 %v2874_v5, 16  ;;  %v549_v17 = vshll.u32 %v2874_v5, 16  ;;  %v2494_v19 = vld [vmem:[%s3472_s3 + $0x1e0] sm:$0xff]   ;;  %v2499_v0 = vld [vmem:[%s3472_s3 + $0x118] sm:$0xff]  }
  0x33   : > { %2281 = vmatprep.subr.bf16.mxu1 %v2486_v29  ;;  %2002 = vmatprep.mubr.msk.bf16.mxu1 %vm2799_vm9, %v2876_v6  ;;  %v396_v22 = vmax.f32 %v366_v9, 0.0  ;;  %v397_v23 = vmax.f32 %v367_v11, 0.0  ;;  %v649_v24 = vrot.slane %v2874_v5, 1  ;;  %v331_v29 = vmul.f32 %v2741_v37, %v294_v3  ;;  %v2495_v53 = vld [vmem:[%s3472_s3 + $0x120] sm:$0xff]   ;;  %v2501_v5 = vld [vmem:[%s3472_s3 + $0x150] sm:$0xff]  }
  0x34   : > { %v544_v14 = vrot.slane %v542_v4, 1  ;;  %v2889_v15 = vsel %vm642_vm7, %v646_v44, %v647_v7  ;;  %v551_v27 = vrot.slane %v549_v17, 1  ;;  %v479_v35 = vsel %vm428_vm1, 0.0, %v395_v20 }
  0x35   : > { %2218 = vmatpush3.bf16.msra.mxu0 %v2487_v59  ;;  %v480_v36 = vsel %vm423_vm0, 0.0, %v396_v22  ;;  %v2920_v38 = vpack.c.bf16 %v397_v23, %v396_v22  ;;  %v506_v40 = vpack.c.bf16 %v479_v35, %v479_v35  ;;  %v368_v44 = vadd.f32 %v2749_v41, %v331_v29  ;;  %v2497_v59 = vld [vmem:[%s3472_s3 + $0x158] sm:$0xff]  }
  0x36   : > { %2282 = vmatpush3.bf16.msra.mxu1 %v2488_v47  ;;  %v2905_v26 = vsel %vm521_vm5, %v540_v57, %v544_v14  ;;  %2219 = vmatprep.subr.bf16.mxu0 %v2489_v12  ;;  %v552_v42 = vor.u32 %v551_v27, %v547_v16  ;;  %v2923_v43 = vpack.c.bf16 %v397_v23, %v480_v36  ;;  %v297_v47 = vunpack.c.l.bf16 %v267_v32  ;;  %v270_v12 = vld [vmem:[%s2724_s13 + $0x44] sm:$0x1] }
  0x37   : > { %2283 = vmatprep.subr.bf16.mxu1 %v2490_v55  ;;  %1336 = vmatprep.mubr.bf16.mxu0 %v2905_v26  ;;  %v298_v48 = vunpack.c.l.bf16 %v2913_v34  ;;  %v554_v50 = vshll.u32 %v506_v40, 16  ;;  %v650_v51 = vrot.slane %v506_v40, 1  ;;  %v398_v52 = vmax.f32 %v368_v44, 0.0  ;;  %v273_v40 = vld [vmem:[%s2724_s13 + $0x50] sm:$0x1] }
  0x38   : > { %1970 = vmatmul.mubr.msk.bf16.gmra.mxu0 %vm2799_vm9, %v2813_v21  ;;  %v559_v21 = vshrl.u32 %v2923_v43, 16  ;;  %v561_v55 = vshll.u32 %v2923_v43, 16  ;;  %v370_v56 = vadd.f32 %v2749_v41, %v333_v45  ;;  %v399_v57 = vmax.f32 %v369_v46, 0.0 }
  0x39   : > { %1434 = vmatmul.mubr.bf16.gmra.mxu1 %v2889_v15  ;;  %2220 = vmatpush3.bf16.msra.mxu0 %v2491_v18  ;;  %v652_v58 = vrot.slane %v2923_v43, 1  ;;  %v556_v60 = vrot.slane %v554_v50, 1  ;;  %v2956_v61 = vsel %vm642_vm7, %v649_v24, %v650_v51  ;;  %v482_v62 = vsel %vm428_vm1, 0.0, %v398_v52  ;;  %v2502_v18 = vld [vmem:[%s3472_s3 + $0x1d0] sm:$0xff]   ;;  %v2085_v24 = vld [vmem:[%s2724_s13 + $0x48] sm:$0xff]  }
  0x3a   : > { %2284 = vmatpush3.bf16.msra.mxu1 %v2492_v2  ;;  %2006 = vmatprep.mubr.msk.bf16.mxu1 %vm2799_vm9, %v2920_v38  ;;  %v334_v63 = vmul.f32 %v2741_v37, %v297_v47  ;;  %v508_v1 = vpack.c.bf16 %v482_v62, %v482_v62  ;;  %v563_v2 = vrot.slane %v561_v55, 1  ;;  %v400_v3 = vmax.f32 %v370_v56, 0.0  ;;  %v2506_v47 = vld [vmem:[%s3472_s3 + $0x1c8] sm:$0xff]  }
  0x3b   : > { %2285 = vmatprep.subr.bf16.mxu1 %v2494_v19  ;;  %2221 = vmatprep.subr.bf16.mxu0 %v2493_v25  ;;  %v483_v4 = vsel %vm423_vm0, 0.0, %v399_v57  ;;  %v2971_v7 = vsel %vm521_vm5, %v552_v42, %v556_v60  ;;  %v299_v9 = vunpack.c.h.bf16 %v2913_v34  ;;  %v335_v11 = vmul.f32 %v2741_v37, %v298_v48  ;;  %v2504_v25 = vld [vmem:[%s3472_s3 + $0x190] sm:$0xff]   ;;  %v2505_v42 = vld [vmem:[%s3472_s3 + $0x148] sm:$0xff]  }
  0x3c   : > { %v371_v8 = vadd.f32 %v2749_v41, %v334_v63  ;;  %1344 = vmatprep.mubr.bf16.mxu0 %v2971_v7  ;;  %v564_v13 = vor.u32 %v563_v2, %v559_v21  ;;  %v566_v14 = vshll.u32 %v508_v1, 16  ;;  %v509_v16 = vpack.c.bf16 %v400_v3, %v483_v4  ;;  %v2508_v2 = vld [vmem:[%s3472_s3 + $0x188] sm:$0xff]  }
  0x3d   : > { %2222 = vmatpush3.bf16.msra.mxu0 %v2495_v53  ;;  %v2978_v17 = vpack.c.bf16 %v400_v3, %v399_v57  ;;  %v653_v19 = vrot.slane %v508_v1, 1  ;;  %v336_v22 = vmul.f32 %v2741_v37, %v299_v9  ;;  %v372_v23 = vadd.f32 %v2749_v41, %v335_v11  ;;  %v274_v1 = vld [vmem:[%s2724_s13 + $0x54] sm:$0xff]   ;;  %v276_v3 = vld [vmem:[%s2724_s13 + $0x5c] sm:$0x1] }
  0x3e   : > { %2286 = vmatpush3.bf16.msra.mxu1 %v2496_v31  ;;  %2223 = vmatprep.subr.bf16.mxu0 %v2497_v59  ;;  %v401_v20 = vmax.f32 %v371_v8, 0.0  ;;  %v568_v27 = vrot.slane %v566_v14, 1  ;;  %v571_v29 = vshrl.u32 %v509_v16, 16  ;;  %v573_v30 = vshll.u32 %v509_v16, 16  ;;  %v2507_v59 = vld [vmem:[%s3472_s3 + $0x108] sm:$0xff]  }
  0x3f   : > { %2287 = vmatprep.subr.bf16.mxu1 %v2498_v49  ;;  %v655_v31 = vrot.slane %v509_v16, 1  ;;  %v2996_v32 = vsel %vm642_vm7, %v652_v58, %v653_v19  ;;  %v373_v35 = vadd.f32 %v2749_v41, %v336_v22  ;;  %v402_v36 = vmax.f32 %v372_v23, 0.0  ;;  %v2509_v16 = vld [vmem:[%s3472_s3 + $0x140] sm:$0xff]  }
  0x40   : > { %1974 = vmatmul.mubr.msk.bf16.gmra.mxu0 %vm2799_vm9, %v2876_v6  ;;  %v485_v34 = vsel %vm428_vm1, 0.0, %v401_v20  ;;  %v3009_v43 = vsel %vm521_vm5, %v564_v13, %v568_v27  ;;  %v575_v45 = vrot.slane %v573_v30, 1  ;;  %v300_v46 = vunpack.c.l.bf16 %v270_v12 }
  0x41   : > { %1442 = vmatmul.mubr.bf16.gmra.mxu1 %v2956_v61  ;;  %2224 = vmatpush3.bf16.msra.mxu0 %v2499_v0  ;;  %v510_v44 = vpack.c.bf16 %v485_v34, %v485_v34  ;;  %v403_v48 = vmax.f32 %v373_v35, 0.0  ;;  %v486_v49 = vsel %vm423_vm0, 0.0, %v402_v36  ;;  %v2077_v50 = vunpack.c.l.bf16 %v2085_v24 }
  0x42   : > { %2288 = vmatpush3.bf16.msra.mxu1 %v2500_v54  ;;  %2010 = vmatprep.mubr.msk.bf16.mxu1 %vm2799_vm9, %v2978_v17  ;;  %v2078_v51 = vunpack.c.h.bf16 %v2085_v24  ;;  %v576_v52 = vor.u32 %v575_v45, %v571_v29  ;;  %v337_v54 = vmul.f32 %v2741_v37, %v300_v46  ;;  %v303_v0 = vunpack.c.l.bf16 %v273_v40  ;;  %v2511_v24 = vld [vmem:[%s3472_s3 + $0x100] sm:$0xff]  }
  0x43   : > { %2289 = vmatprep.subr.bf16.mxu1 %v2502_v18  ;;  %2225 = vmatprep.subr.bf16.mxu0 %v2501_v5  ;;  %v578_v21 = vshll.u32 %v510_v44, 16  ;;  %v656_v53 = vrot.slane %v510_v44, 1  ;;  %v3019_v55 = vpack.c.bf16 %v403_v48, %v486_v49  ;;  %v3021_v56 = vpack.c.bf16 %v403_v48, %v402_v36  ;;  %v2510_v18 = vld [vmem:[%s3472_s3 + $0x1c0] sm:$0xff]  }
  0x44   : > { %1352 = vmatprep.mubr.bf16.mxu0 %v3009_v43  ;;  %v338_v57 = vmul.f32 %v2077_v50, %v2741_v37  ;;  %v339_v58 = vmul.f32 %v2078_v51, %v2741_v37  ;;  %v374_v63 = vadd.f32 %v2749_v41, %v337_v54  ;;  %v340_v14 = vmul.f32 %v2741_v37, %v303_v0  ;;  %v2086_v46 = vld [vmem:[%s2724_s13 + $0x60] sm:$0xff]  }
  0x45   : > { %2226 = vmatpush3.bf16.msra.mxu0 %v2503_v39  ;;  %v580_v60 = vrot.slane %v578_v21, 1  ;;  %v3029_v62 = vsel %vm642_vm7, %v655_v31, %v656_v53  ;;  %v583_v4 = vshrl.u32 %v3019_v55, 16  ;;  %v585_v5 = vshll.u32 %v3019_v55, 16  ;;  %v2512_v31 = vld [vmem:[%s3472_s3 + $0x180] sm:$0xff]   ;;  %v3075_v39 = vld [vmem:[%s3472_s3 + $0x238] sm:$0xff]  }
  0x46   : > { %2290 = vmatpush3.bf16.msra.mxu1 %v2504_v25  ;;  %2227 = vmatprep.subr.bf16.mxu0 %v2505_v42  ;;  %v375_v8 = vadd.f32 %v2749_v41, %v338_v57  ;;  %v376_v9 = vadd.f32 %v2749_v41, %v339_v58  ;;  %v404_v12 = vmax.f32 %v374_v63, 0.0  ;;  %v658_v13 = vrot.slane %v3019_v55, 1 }
  0x47   : > { %2291 = vmatprep.subr.bf16.mxu1 %v2506_v47  ;;  %v3048_v11 = vsel %vm521_vm5, %v576_v52, %v580_v60  ;;  %v587_v19 = vrot.slane %v585_v5, 1  ;;  %v304_v23 = vunpack.c.l.bf16 %v274_v1  ;;  %v377_v27 = vadd.f32 %v2749_v41, %v340_v14 }
  0x48   : > { %1978 = vmatmul.mubr.msk.bf16.gmra.mxu0 %vm2799_vm9, %v2920_v38  ;;  %v405_v20 = vmax.f32 %v375_v8, 0.0  ;;  %v406_v22 = vmax.f32 %v376_v9, 0.0  ;;  %v488_v25 = vsel %vm428_vm1, 0.0, %v404_v12  ;;  %v305_v29 = vunpack.c.h.bf16 %v274_v1 }
  0x49   : > { %1450 = vmatmul.mubr.bf16.gmra.mxu1 %v2996_v32  ;;  %1360 = vmatprep.mubr.bf16.mxu0 %v3048_v11  ;;  %v306_v30 = vunpack.c.l.bf16 %v276_v3  ;;  %v512_v34 = vpack.c.bf16 %v488_v25, %v488_v25  ;;  %v407_v42 = vmax.f32 %v377_v27, 0.0  ;;  %v341_v44 = vmul.f32 %v2741_v37, %v304_v23  ;;  %v280_v25 = vld [vmem:[%s2724_s13 + $0x6c] sm:$0xff]  }
  0x4a   : > { %2014 = vmatprep.mubr.msk.bf16.mxu1 %vm2799_vm9, %v3021_v56  ;;  %2292 = vmatpush3.bf16.msra.mxu1 %v2508_v2  ;;  %v489_v35 = vsel %vm423_vm0, 0.0, %v405_v20  ;;  %v3070_v36 = vpack.c.bf16 %v406_v22, %v405_v20  ;;  %v342_v45 = vmul.f32 %v2741_v37, %v305_v29  ;;  %v588_v47 = vor.u32 %v587_v19, %v583_v4 }
  0x4b   : > { %2228 = vmatpush3.bf16.msra.mxu0 %v2507_v59  ;;  %2293 = vmatprep.subr.bf16.mxu1 %v2510_v18  ;;  %v3078_v40 = vpack.c.bf16 %v406_v22, %v489_v35  ;;  %v590_v48 = vshll.u32 %v512_v34, 16  ;;  %v659_v49 = vrot.slane %v512_v34, 1  ;;  %v343_v50 = vmul.f32 %v2741_v37, %v306_v30 }
  0x4c   : > { %2229 = vmatprep.subr.bf16.mxu0 %v2509_v16  ;;  %v491_v51 = vsel %vm428_vm1, 0.0, %v407_v42  ;;  %v378_v53 = vadd.f32 %v2749_v41, %v341_v44  ;;  %v379_v57 = vadd.f32 %v2749_v41, %v342_v45  ;;  %v442_v58 = vstv %s2928_s25  ;;  %v282_v44 = vld [vmem:[%s2724_s13 + $0x74] sm:$0x1] }
  0x4d   : > { %v595_v52 = vshrl.u32 %v3078_v40, 16  ;;  %v597_v21 = vshll.u32 %v3078_v40, 16  ;;  %v592_v54 = vrot.slane %v590_v48, 1  ;;  %v514_v55 = vpack.c.bf16 %v491_v51, %v491_v51 }
  0x4e   : > { %2294 = vmatpush3.bf16.msra.mxu1 %v2512_v31  ;;  %v408_v60 = vmax.f32 %v378_v53, 0.0  ;;  %v380_v63 = vadd.f32 %v2749_v41, %v343_v50  ;;  %v2081_v0 = vunpack.c.l.bf16 %v2086_v46  ;;  %v3104_v2 = vsel %vm642_vm7, %v658_v13, %v659_v49  ;;  %v279_v13 = vld [vmem:[%s2724_s13 + $0x68] sm:$0x1]  ;;  %s1882_s13 = sshll.u32 %s239_s29, 4 }
  0x4f   : > { %2230 = vmatpush3.bf16.msra.mxu0 %v2511_v24  ;;  %2391 = vmatprep.subr.bf16.mxu1 %v3075_v39  ;;  %v599_v59 = vrot.slane %v597_v21, 1  ;;  %v3101_v1 = vsel %vm521_vm5, %v588_v47, %v592_v54  ;;  %v602_v3 = vshll.u32 %v514_v55, 16  ;;  %v409_v4 = vmax.f32 %v379_v57, 0.0  ;;  %p241_p8 = scmp.lt.s32.totalorder %s1882_s13, 63 }
  0x50   : > { %2359 = vmatprep.subr.bf16.mxu0 %v3075_v39  ;;  %1982 = vmatmul.mubr.msk.bf16.gmra.mxu0 %vm2799_vm9, %v2978_v17  ;;  %v492_v8 = vsel %vm423_vm0, 0.0, %v408_v60  ;;  %v410_v9 = vmax.f32 %v380_v63, 0.0  ;;  %v2082_v12 = vunpack.c.h.bf16 %v2086_v46  ;;  %v661_v19 = vrot.slane %v3078_v40, 1 }
  0x51   : > { %1458 = vmatmul.mubr.bf16.gmra.mxu1 %v3029_v62  ;;  %1368 = vmatprep.mubr.bf16.mxu0 %v3101_v1  ;;  %v600_v5 = vor.u32 %v599_v59, %v595_v52  ;;  %v604_v14 = vrot.slane %v602_v3, 1  ;;  %v3109_v16 = vpack.c.bf16 %v409_v4, %v492_v8  ;;  %v3111_v18 = vpack.c.bf16 %v409_v4, %v408_v60  ;;  %s3528_s13 = smov (!%p241_p8, %s1882_s13), 63 }
  0x52   : > { %2018 = vmatprep.mubr.msk.bf16.mxu1 %vm2799_vm9, %v3070_v36  ;;  %v494_v20 = vsel %vm428_vm1, 0.0, %v410_v9  ;;  %v344_v22 = vmul.f32 %v2081_v0, %v2741_v37  ;;  %v345_v23 = vmul.f32 %v2082_v12, %v2741_v37  ;;  %v309_v24 = vunpack.c.l.bf16 %v279_v13  ;;  %s1883_s18 = sshll.u32 %s3528_s13, 3 }
  0x53   : > { %v662_v27 = vrot.slane %v514_v55, 1  ;;  %v516_v29 = vpack.c.bf16 %v494_v20, %v494_v20  ;;  %v607_v30 = vshrl.u32 %v3109_v16, 16  ;;  %v609_v31 = vshll.u32 %v3109_v16, 16  ;;  %s3403_s30 = scalar_lea.vmem %s3474_s5, %s1883_s18 }
  0x54   : > { %v3127_v34 = vsel %vm521_vm5, %v600_v5, %v604_v14  ;;  %v381_v35 = vadd.f32 %v2749_v41, %v344_v22  ;;  %v382_v40 = vadd.f32 %v2749_v41, %v345_v23  ;;  %v346_v42 = vmul.f32 %v2741_v37, %v309_v24 }
  0x55   : > { %v611_v45 = vrot.slane %v609_v31, 1  ;;  %v614_v46 = vshll.u32 %v516_v29, 16  ;;  %v310_v47 = vunpack.c.l.bf16 %v280_v25  ;;  %vm3133_vm13 = vcmp.eq.s32.totalorder %v442_v58, 1 }
  0x56   : > { %v411_v49 = vmax.f32 %v381_v35, 0.0  ;;  %v412_v50 = vmax.f32 %v382_v40, 0.0  ;;  %v383_v51 = vadd.f32 %v2749_v41, %v346_v42  ;;  %v311_v52 = vunpack.c.h.bf16 %v280_v25  ;;  %vm3164_vm14 = vmor %vm423_vm0, %vm3133_vm13 }
  0x57   : > { %v3143_v21 = vsel %vm642_vm7, %v661_v19, %v662_v27  ;;  %v612_v53 = vor.u32 %v611_v45, %v607_v30  ;;  %v616_v54 = vrot.slane %v614_v46, 1  ;;  %v312_v55 = vunpack.c.l.bf16 %v282_v44  ;;  %vm452_vm15 = vmor %vm428_vm1, %vm3133_vm13 }
  0x58   : > { %1986 = vmatmul.mubr.msk.bf16.gmra.mxu0 %vm2799_vm9, %v3021_v56  ;;  %v495_v57 = vsel %vm423_vm0, 0.0, %v411_v49  ;;  %v3147_v58 = vpack.c.bf16 %v412_v50, %v411_v49  ;;  %v413_v59 = vmax.f32 %v383_v51, 0.0  ;;  %v347_v60 = vmul.f32 %v2741_v37, %v310_v47  ;;  %vm2055_vm0 = vmneg %vm3133_vm13 }
  0x59   : > { %1466 = vmatmul.mubr.bf16.gmra.mxu1 %v3104_v2  ;;  %1376 = vmatprep.mubr.bf16.mxu0 %v3127_v34  ;;  %v517_v63 = vpack.c.bf16 %v412_v50, %v495_v57  ;;  %v348_v0 = vmul.f32 %v2741_v37, %v311_v52  ;;  %v349_v3 = vmul.f32 %v2741_v37, %v312_v55  ;;  %v664_v4 = vrot.slane %v3109_v16, 1 }
  0x5a   : > { %2022 = vmatprep.mubr.msk.bf16.mxu1 %vm2799_vm9, %v3111_v18  ;;  %v665_v5 = vrot.slane %v516_v29, 1  ;;  %v497_v8 = vsel %vm428_vm1, 0.0, %v413_v59  ;;  %v384_v9 = vadd.f32 %v2749_v41, %v347_v60  ;;  %v3169_v16 = vsel %vm521_vm5, %v612_v53, %v616_v54  ;;  %v2514_v60 = vld [vmem:[%s3472_s3 + $0x230] sm:$0xff]   ;;  %vm2056_vm1 = vmneg %vm3164_vm14 }
  0x5b   : > { %v518_v12 = vpack.c.bf16 %v497_v8, %v497_v8  ;;  %v676_v14 = vshrl.u32 %v517_v63, 16  ;;  %v678_v19 = vshll.u32 %v517_v63, 16  ;;  %v690_v13 = vrot.slane %v517_v63, 1  ;;  %vm2057_vm2 = vmpackc.low %vm2055_vm0, %vm2056_vm1 }
  0x5c   : > { %v385_v20 = vadd.f32 %v2749_v41, %v348_v0  ;;  %v386_v22 = vadd.f32 %v2749_v41, %v349_v3  ;;  %v414_v23 = vmax.f32 %v384_v9, 0.0  ;;  %v3184_v41 = vsel %vm642_vm7, %v664_v4, %v665_v5 }
  0x5d   : > { %v680_v24 = vrot.slane %v678_v19, 1  ;;  %v683_v25 = vshll.u32 %v518_v12, 16  ;;  %v691_v27 = vrot.slane %v518_v12, 1 }
  0x5e   : > { %v415_v28 = vmax.f32 %v385_v20, 0.0  ;;  %v416_v29 = vmax.f32 %v386_v22, 0.0  ;;  %v498_v30 = vsel %vm3164_vm14, 0.0, %v414_v23 }
  0x5f   : > { %v681_v31 = vor.u32 %v680_v24, %v676_v14  ;;  %v685_v35 = vrot.slane %v683_v25, 1  ;;  %v3187_v40 = vsel %vm642_vm7, %v690_v13, %v691_v27 }
  0x60   : > { %1990 = vmatmul.mubr.msk.bf16.gmra.mxu0 %vm2799_vm9, %v3070_v36  ;;  %v499_v33 = vsel %vm3133_vm13, 0.0, %v415_v28  ;;  %v500_v42 = vsel %vm452_vm15, 0.0, %v416_v29  ;;  %v3191_v44 = vpack.c.bf16 %v415_v28, %v414_v23 }
  0x61   : > { %1474 = vmatmul.mubr.bf16.gmra.mxu1 %v3143_v21  ;;  %1384 = vmatprep.mubr.bf16.mxu0 %v3169_v16  ;;  %v3194_v45 = vsel %vm521_vm5, %v681_v31, %v685_v35  ;;  %v519_v46 = vpack.c.bf16 %v499_v33, %v498_v30  ;;  %v520_v47 = vpack.c.bf16 %v500_v42, %v500_v42 }
  0x62   : > { %2026 = vmatprep.mubr.msk.bf16.mxu1 %vm2799_vm9, %v3147_v58 }
  0x63   : > { %v695_v49 = vshrl.u32 %v519_v46, 16  ;;  %v697_v50 = vshll.u32 %v519_v46, 16  ;;  %v702_v51 = vshll.u32 %v520_v47, 16  ;;  %v709_v52 = vrot.slane %v519_v46, 1 }
  0x64   : > { %v710_v53 = vrot.slane %v520_v47, 1 }
  0x65   : > { %v699_v54 = vrot.slane %v697_v50, 1  ;;  %v704_v55 = vrot.slane %v702_v51, 1 }
  0x66   : > { %v3202_v57 = vsel %vm642_vm7, %v709_v52, %v710_v53 }
  0x67   : > { %v700_v59 = vor.u32 %v699_v54, %v695_v49 }
  0x68   : > { %1994 = vmatmul.mubr.msk.bf16.gmra.mxu0 %vm2799_vm9, %v3111_v18 }
  0x69   : > { %1482 = vmatmul.mubr.bf16.gmra.mxu1 %v3184_v41  ;;  %1522 = vmatprep.mubr.bf16.mxu0 %v2889_v15  ;;  %v705_v63 = vsel %vm521_vm5, %v700_v59, %v704_v55  ;;  %v2515_v15 = vld [vmem:[%s3472_s3 + $0x228] sm:$0xff]  }
  0x6a   : > { %1619 = vmatprep.mubr.bf16.mxu1 %v2971_v7 }
  0x70   : > { %1523 = vmatmul.mubr.bf16.vlgmr.msra.gmra.mxu0 %v2905_v26  ;;  %v2517_v26 = vld [vmem:[%s3472_s3 + $0x218] sm:$0xff]  }
  0x71   : > { %2030 = vmatmul.mubr.msk.bf16.vlgmr.msra.gmra.mxu1 %vm2799_vm9, %v2876_v6  ;;  %2360 = vmatpush3.bf16.msra.mxu0 %v3075_v39  ;;  %v2516_v6 = vld [vmem:[%s3472_s3 + $0x220] sm:$0xff]  }
  0x72   : > { %2399 = vmatpush3.bf16.msra.mxu1 %v3075_v39  ;;  %1627 = vmatprep.mubr.bf16.mxu1 %v3009_v43 }
  0x73   : > { %2392 = vmatprep.subr.bf16.mxu1 %v2514_v60  ;;  %1530 = vmatprep.mubr.bf16.mxu0 %v2956_v61 }
  0x74   : > { %2361 = vmatprep.subr.bf16.mxu0 %v2514_v60 }
  0x75   : > { %2362 = vmatpush3.bf16.msra.mxu0 %v2514_v60 }
  0x76   : > { %2400 = vmatpush3.bf16.msra.mxu1 %v2514_v60  ;;  %2363 = vmatprep.subr.bf16.mxu0 %v2515_v15 }
  0x77   : > { %2393 = vmatprep.subr.bf16.mxu1 %v2515_v15 }
  0x78   : > { %1531 = vmatmul.mubr.bf16.gmra.mxu0 %v2971_v7  ;;  %v2519_v7 = vld [vmem:[%s3472_s3 + $0x208] sm:$0xff]  }
  0x79   : > { %2034 = vmatmul.mubr.msk.bf16.gmra.mxu1 %vm2799_vm9, %v2920_v38  ;;  %1538 = vmatprep.mubr.bf16.mxu0 %v2996_v32  ;;  %v2518_v38 = vld [vmem:[%s3472_s3 + $0x210] sm:$0xff]  }
  0x7a   : > { %1635 = vmatprep.mubr.bf16.mxu1 %v3048_v11  ;;  %2401 = vmatpush3.bf16.msra.mxu1 %v2515_v15 }
  0x7b   : > { %2394 = vmatprep.subr.bf16.mxu1 %v2516_v6  ;;  %2364 = vmatpush3.bf16.msra.mxu0 %v2515_v15 }
  0x7c   : > { %2365 = vmatprep.subr.bf16.mxu0 %v2516_v6 }
  0x7e   : > { %2402 = vmatpush3.bf16.msra.mxu1 %v2516_v6 }
  0x7f   : > { %2395 = vmatprep.subr.bf16.mxu1 %v2517_v26  ;;  %2366 = vmatpush3.bf16.msra.mxu0 %v2516_v6 }
  0x80   : > { %2367 = vmatprep.subr.bf16.mxu0 %v2517_v26  ;;  %1539 = vmatmul.mubr.bf16.gmra.mxu0 %v3009_v43 }
  0x81   : > { %2038 = vmatmul.mubr.msk.bf16.gmra.mxu1 %vm2799_vm9, %v2978_v17  ;;  %1546 = vmatprep.mubr.bf16.mxu0 %v3029_v62  ;;  %v2520_v17 = vld [vmem:[%s3472_s3 + $0x200] sm:$0xff]  }
  0x82   : > { %1643 = vmatprep.mubr.bf16.mxu1 %v3101_v1  ;;  %2403 = vmatpush3.bf16.msra.mxu1 %v2517_v26 }
  0x83   : > { %2396 = vmatprep.subr.bf16.mxu1 %v2518_v38  ;;  %2368 = vmatpush3.bf16.msra.mxu0 %v2517_v26 }
  0x84   : > { %2369 = vmatprep.subr.bf16.mxu0 %v2518_v38 }
  0x86   : > { %2404 = vmatpush3.bf16.msra.mxu1 %v2518_v38 }
  0x87   : > { %2397 = vmatprep.subr.bf16.mxu1 %v2519_v7  ;;  %2370 = vmatpush3.bf16.msra.mxu0 %v2518_v38 }
  0x88   : > { %2371 = vmatprep.subr.bf16.mxu0 %v2519_v7  ;;  %1547 = vmatmul.mubr.bf16.gmra.mxu0 %v3048_v11 }
  0x89   : > { %2042 = vmatmul.mubr.msk.bf16.gmra.mxu1 %vm2799_vm9, %v3021_v56  ;;  %1554 = vmatprep.mubr.bf16.mxu0 %v3104_v2 }
  0x8a   : > { %1651 = vmatprep.mubr.bf16.mxu1 %v3127_v34  ;;  %2405 = vmatpush3.bf16.msra.mxu1 %v2519_v7 }
  0x8b   : > { %2398 = vmatprep.subr.bf16.mxu1 %v2520_v17  ;;  %2372 = vmatpush3.bf16.msra.mxu0 %v2519_v7 }
  0x8c   : > { %2373 = vmatprep.subr.bf16.mxu0 %v2520_v17 }
  0x8e   : > { %2406 = vmatpush3.bf16.msra.mxu1 %v2520_v17 }
  0x8f   : > { %2374 = vmatpush3.bf16.msra.mxu0 %v2520_v17 }
  0x90   : > { %1555 = vmatmul.mubr.bf16.gmra.mxu0 %v3101_v1 }
  0x91   : > { %2046 = vmatmul.mubr.msk.bf16.gmra.mxu1 %vm2799_vm9, %v3070_v36  ;;  %1562 = vmatprep.mubr.bf16.mxu0 %v3143_v21 }
  0x92   : > { %1659 = vmatprep.mubr.bf16.mxu1 %v3169_v16 }
  0x98   : > { %1563 = vmatmul.mubr.bf16.gmra.mxu0 %v3127_v34 }
  0x99   : > { %2050 = vmatmul.mubr.msk.bf16.gmra.mxu1 %vm2799_vm9, %v3111_v18  ;;  %1570 = vmatprep.mubr.bf16.mxu0 %v3184_v41 }
  0x9a   : > { %1667 = vmatprep.mubr.bf16.mxu1 %v3194_v45 }
  0xa0   : > { %1571 = vmatmul.mubr.bf16.gmra.mxu0 %v3169_v16 }
  0xa1   : > { %2054 = vmatmul.mubr.msk.bf16.gmra.mxu1 %vm2799_vm9, %v3147_v58  ;;  %1578 = vmatprep.mubr.bf16.mxu0 %v3187_v40 }
  0xa2   : > { %1675 = vmatprep.mubr.bf16.mxu1 %v705_v63 }
  0xa8   : > { %1579 = vmatmul.mubr.bf16.gmra.mxu0 %v3194_v45 }
  0xa9   : > { %2059 = vmatmul.mubr.msk.bf16.gmra.mxu1 %vm2057_vm2, %v3191_v44  ;;  %2375 = vmatprep.mubr.bf16.mxu0 %v2956_v61  ;;  %v3287_v61 = vld [vmem:[%s3473_s4] ss:$0 sm:$0xff] }
  0xaa   : > { %2383 = vmatprep.mubr.bf16.mxu1 %v3143_v21 }
  0xb0   : > { %2376 = vmatmul.mubr.bf16.vlgmr.msra.gmra.mxu0 %v2996_v32 }
  0xb1   : > { %2384 = vmatmul.mubr.bf16.vlgmr.msra.gmra.mxu1 %v3184_v41  ;;  %2379 = vmatprep.mubr.bf16.mxu0 %v3029_v62 }
  0xb2   : > { %2387 = vmatprep.mubr.bf16.mxu1 %v3187_v40 }
  0xb8   : > { %2380 = vmatmul.mubr.bf16.gmra.mxu0 %v3104_v2 }
  0xb9   : > { %2388 = vmatmul.mubr.bf16.gmra.mxu1 %v3202_v57 }
  0xf0   : > { %v2103_v11 = vpop.f32.mrf.mxu0 }
  0xf1   : > { %v2167_v10 = vpop.f32.mrf.mxu1 }
  0xf2   : > { %v2104_v39 = vpop.f32.mrf.mxu0 }
  0xf3   : > { %v2168_v43 = vpop.f32.mrf.mxu1  ;;  %v2105_v18 = vadd.f32 %v2104_v39, %v2103_v11 }
  0xf4   : > { %v2169_v56 = vadd.f32 %v2168_v43, %v2167_v10  ;;  %v2106_v34 = vpop.f32.mrf.mxu0 }
  0xf5   : > { %v2170_v36 = vpop.f32.mrf.mxu1  ;;  %v1331_v48 = vadd.f32 %v2105_v18, %v3287_v61 }
  0xf6   : > { %v2107_v21 = vpop.f32.mrf.mxu0 }
  0xf7   : > { %v2171_v1 = vpop.f32.mrf.mxu1  ;;  %v3290_v58 = vadd.f32 %v2169_v56, %v1331_v48  ;;  %v2108_v0 = vadd.f32 %v2107_v21, %v2106_v34 }
  0xf8   : > { %v2172_v32 = vadd.f32 %v2171_v1, %v2170_v36  ;;  %v2109_v4 = vpop.f32.mrf.mxu0 }
  0xf9   : > { %v2173_v62 = vpop.f32.mrf.mxu1  ;;  %v1334_v8 = vadd.f32 %v2108_v0, %v3287_v61 }
  0xfa   : > { %v2110_v9 = vpop.f32.mrf.mxu0 }
  0xfb   : > { %v2174_v2 = vpop.f32.mrf.mxu1  ;;  %v3293_v14 = vadd.f32 %v2172_v32, %v1334_v8  ;;  %v2111_v19 = vadd.f32 %v2110_v9, %v2109_v4 }
  0xfc   : > { %v2175_v3 = vadd.f32 %v2174_v2, %v2173_v62  ;;  %v2112_v37 = vpop.f32.mrf.mxu0 }
  0xfd   : > { %v2176_v5 = vpop.f32.mrf.mxu1  ;;  %v1339_v20 = vadd.f32 %v2111_v19, %v3287_v61 }
  0xfe   : > { %v2113_v22 = vpop.f32.mrf.mxu0 }
  0xff   : > { %v2177_v12 = vpop.f32.mrf.mxu1  ;;  %v3296_v24 = vadd.f32 %v2175_v3, %v1339_v20  ;;  %v2114_v25 = vadd.f32 %v2113_v22, %v2112_v37 }
 0x100   : > { %v2178_v13 = vadd.f32 %v2177_v12, %v2176_v5  ;;  %v2115_v28 = vpop.f32.mrf.mxu0 }
 0x101   : > { %v2179_v16 = vpop.f32.mrf.mxu1  ;;  %v1342_v30 = vadd.f32 %v2114_v25, %v3287_v61 }
 0x102   : > { %v2116_v41 = vpop.f32.mrf.mxu0 }
 0x103   : > { %v2180_v23 = vpop.f32.mrf.mxu1  ;;  %v3299_v35 = vadd.f32 %v2178_v13, %v1342_v30  ;;  %v2117_v40 = vadd.f32 %v2116_v41, %v2115_v28 }
 0x104   : > { %v2181_v27 = vadd.f32 %v2180_v23, %v2179_v16  ;;  %v2118_v42 = vpop.f32.mrf.mxu0 }
 0x105   : > { %v2182_v29 = vpop.f32.mrf.mxu1  ;;  %v1347_v45 = vadd.f32 %v2117_v40, %v3287_v61 }
 0x106   : > { %v2119_v46 = vpop.f32.mrf.mxu0 }
 0x107   : > { %v2183_v31 = vpop.f32.mrf.mxu1  ;;  %v3302_v49 = vadd.f32 %v2181_v27, %v1347_v45  ;;  %v2120_v50 = vadd.f32 %v2119_v46, %v2118_v42 }
 0x108   : > { %v2184_v33 = vadd.f32 %v2183_v31, %v2182_v29  ;;  %v2121_v52 = vpop.f32.mrf.mxu0 }
 0x109   : > { %v2185_v44 = vpop.f32.mrf.mxu1  ;;  %v1350_v54 = vadd.f32 %v2120_v50, %v3287_v61 }
 0x10a   : > { %v2122_v55 = vpop.f32.mrf.mxu0 }
 0x10b   : > { %v2186_v47 = vpop.f32.mrf.mxu1  ;;  %v3305_v59 = vadd.f32 %v2184_v33, %v1350_v54  ;;  %v2123_v60 = vadd.f32 %v2122_v55, %v2121_v52 }
 0x10c   : > { %v2187_v51 = vadd.f32 %v2186_v47, %v2185_v44  ;;  %v2124_v15 = vpop.f32.mrf.mxu0 }
 0x10d   : > { %v2188_v53 = vpop.f32.mrf.mxu1  ;;  %3489 = vst [vmem:[#allocation2_spill] sm:$0xff] %v3305_v59  ;;  %v1355_v26 = vadd.f32 %v2123_v60, %v3287_v61 }
 0x10e   : > { %v2125_v38 = vpop.f32.mrf.mxu0 }
 0x10f   : > { %v2189_v57 = vpop.f32.mrf.mxu1  ;;  %v3308_v17 = vadd.f32 %v2187_v51, %v1355_v26  ;;  %v2126_v10 = vadd.f32 %v2125_v38, %v2124_v15 }
 0x110   : > { %v2190_v63 = vadd.f32 %v2189_v57, %v2188_v53  ;;  %v2127_v56 = vpop.f32.mrf.mxu0 }
 0x111   : > { %v2191_v6 = vpop.f32.mrf.mxu1  ;;  %v1358_v36 = vadd.f32 %v2126_v10, %v3287_v61 }
 0x112   : > { %v2128_v39 = vpop.f32.mrf.mxu0 }
 0x113   : > { %v2192_v7 = vpop.f32.mrf.mxu1  ;;  %v3311_v18 = vadd.f32 %v2190_v63, %v1358_v36  ;;  %v2129_v32 = vadd.f32 %v2128_v39, %v2127_v56 }
 0x114   : > { %v2193_v43 = vadd.f32 %v2192_v7, %v2191_v6  ;;  %v2130_v62 = vpop.f32.mrf.mxu0 }
 0x115   : > { %v2194_v11 = vpop.f32.mrf.mxu1  ;;  %3490 = vst [vmem:[#allocation3_spill] sm:$0xff] %v3311_v18  ;;  %v1363_v21 = vadd.f32 %v2129_v32, %v3287_v61 }
 0x116   : > { %v2131_v2 = vpop.f32.mrf.mxu0 }
 0x117   : > { %v2195_v1 = vpop.f32.mrf.mxu1  ;;  %v3314_v3 = vadd.f32 %v2193_v43, %v1363_v21  ;;  %v2132_v4 = vadd.f32 %v2131_v2, %v2130_v62 }
 0x118   : > { %v2196_v34 = vadd.f32 %v2195_v1, %v2194_v11  ;;  %v2133_v8 = vpop.f32.mrf.mxu0 }
 0x119   : > { %v2197_v48 = vpop.f32.mrf.mxu1  ;;  %v1366_v12 = vadd.f32 %v2132_v4, %v3287_v61 }
 0x11a   : > { %v2134_v19 = vpop.f32.mrf.mxu0 }
 0x11b   : > { %v2198_v0 = vpop.f32.mrf.mxu1  ;;  %v3317_v37 = vadd.f32 %v2196_v34, %v1366_v12  ;;  %v2135_v16 = vadd.f32 %v2134_v19, %v2133_v8 }
 0x11c   : > { %v2199_v5 = vadd.f32 %v2198_v0, %v2197_v48  ;;  %v2136_v22 = vpop.f32.mrf.mxu0 }
 0x11d   : > { %v2200_v9 = vpop.f32.mrf.mxu1  ;;  %v1371_v25 = vadd.f32 %v2135_v16, %v3287_v61 }
 0x11e   : > { %v2137_v27 = vpop.f32.mrf.mxu0 }
 0x11f   : > { %v2201_v13 = vpop.f32.mrf.mxu1  ;;  %v3320_v29 = vadd.f32 %v2199_v5, %v1371_v25  ;;  %v2138_v30 = vadd.f32 %v2137_v27, %v2136_v22 }
 0x120   : > { %v2202_v20 = vadd.f32 %v2201_v13, %v2200_v9  ;;  %v2139_v31 = vpop.f32.mrf.mxu0 }
 0x121   : > { %v2203_v23 = vpop.f32.mrf.mxu1  ;;  %v1374_v33 = vadd.f32 %v2138_v30, %v3287_v61 }
 0x122   : > { %v2140_v42 = vpop.f32.mrf.mxu0 }
 0x123   : > { %v2204_v28 = vpop.f32.mrf.mxu1  ;;  %v3323_v45 = vadd.f32 %v2202_v20, %v1374_v33  ;;  %v2141_v46 = vadd.f32 %v2140_v42, %v2139_v31 }
 0x124   : > { %v2205_v41 = vadd.f32 %v2204_v28, %v2203_v23  ;;  %v2142_v50 = vpop.f32.mrf.mxu0 }
 0x125   : > { %v2206_v40 = vpop.f32.mrf.mxu1  ;;  %v1379_v52 = vadd.f32 %v2141_v46, %v3287_v61 }
 0x126   : > { %v2143_v53 = vpop.f32.mrf.mxu0 }
 0x127   : > { %v2207_v44 = vpop.f32.mrf.mxu1  ;;  %v3326_v55 = vadd.f32 %v2205_v41, %v1379_v52  ;;  %v2144_v57 = vadd.f32 %v2143_v53, %v2142_v50 }
 0x128   : > { %v2208_v47 = vadd.f32 %v2207_v44, %v2206_v40  ;;  %v2145_v63 = vpop.f32.mrf.mxu0 }
 0x129   : > { %v2209_v51 = vpop.f32.mrf.mxu1  ;;  %v1382_v6 = vadd.f32 %v2144_v57, %v3287_v61 }
 0x12a   : > { %v2146_v26 = vpop.f32.mrf.mxu0 }
 0x12b   : > { %v2210_v54 = vpop.f32.mrf.mxu1  ;;  %v3329_v7 = vadd.f32 %v2208_v47, %v1382_v6  ;;  %v2147_v10 = vadd.f32 %v2146_v26, %v2145_v63 }
 0x12c   : > { %v2211_v60 = vadd.f32 %v2210_v54, %v2209_v51  ;;  %v2148_v56 = vpop.f32.mrf.mxu0 }
 0x12d   : > { %v2212_v15 = vpop.f32.mrf.mxu1  ;;  %3491 = vst [vmem:[#allocation4_spill] sm:$0xff] %v3329_v7  ;;  %v1387_v36 = vadd.f32 %v2147_v10, %v3287_v61 }
 0x12e   : > { %v2149_v39 = vpop.f32.mrf.mxu0 }
 0x12f   : > { %v2213_v38 = vpop.f32.mrf.mxu1  ;;  %v3332_v32 = vadd.f32 %v2211_v60, %v1387_v36  ;;  %v2150_v34 = vadd.f32 %v2149_v39, %v2148_v56 }
 0x130   : > { %v2214_v43 = vadd.f32 %v2213_v38, %v2212_v15  ;;  %v2231_v48 = vpop.f32.mrf.mxu0 }
 0x131   : > { %v2295_v11 = vpop.f32.mrf.mxu1  ;;  %v1390_v2 = vadd.f32 %v2150_v34, %v3287_v61 }
 0x132   : > { %v2232_v0 = vpop.f32.mrf.mxu0 }
 0x133   : > { %v2296_v1 = vpop.f32.mrf.mxu1  ;;  %v3335_v5 = vadd.f32 %v2214_v43, %v1390_v2  ;;  %v2233_v8 = vadd.f32 %v2232_v0, %v2231_v48 }
 0x134   : > { %v2297_v62 = vadd.f32 %v2296_v1, %v2295_v11  ;;  %v2234_v12 = vpop.f32.mrf.mxu0 }
 0x135   : > { %v2298_v21 = vpop.f32.mrf.mxu1  ;;  %v1525_v13 = vadd.f32 %v2233_v8, %v3290_v58 }
 0x136   : > { %v2235_v16 = vpop.f32.mrf.mxu0 }
 0x137   : > { %v2299_v4 = vpop.f32.mrf.mxu1  ;;  %v2236_v22 = vadd.f32 %v2235_v16, %v2234_v12  ;;  %v3342_v23 = vadd.f32 %v2297_v62, %v1525_v13 }
 0x138   : > { %v2300_v9 = vadd.f32 %v2299_v4, %v2298_v21  ;;  %v2237_v25 = vpop.f32.mrf.mxu0 }
 0x139   : > { %v3337_v19 = vpop.f32.mrf.mxu1  ;;  %v1528_v61 = vadd.f32 %v2236_v22, %v3293_v14 }
 0x13a   : > { %v2238_v28 = vpop.f32.mrf.mxu0 }
 0x13b   : > { %v3340_v20 = vpop.f32.mrf.mxu1  ;;  %v3349_v41 = vadd.f32 %v2300_v9, %v1528_v61 }
 0x13c   : > { %v2240_v31 = vpop.f32.mrf.mxu0 }
 0x13d   : > { %v3344_v27 = vpop.f32.mrf.mxu1  ;;  %3492 = vst [vmem:[#allocation5_spill] sm:$0xff] %v3349_v41 }
 0x13e   : > { %v2241_v58 = vpop.f32.mrf.mxu0 }
 0x13f   : > { %v3347_v30 = vpop.f32.mrf.mxu1 }
 0x140   : > { %v3355_v42 = vpop.f32.mrf.mxu0 }
 0x141   : > { %v3351_v40 = vpop.f32.mrf.mxu1 }
 0x142   : > { %3493 = vst [vmem:[#allocation6_spill] sm:$0xff] %v3351_v40  ;;  %v3359_v46 = vpop.f32.mrf.mxu0 }
 0x143   : > { %v3353_v33 = vpop.f32.mrf.mxu1 }
 0x144   : > { %3494 = vst [vmem:[#allocation7_spill] sm:$0xff] %v3353_v33  ;;  %v3363_v14 = vpop.f32.mrf.mxu0 }
 0x145   : > { %v3357_v44 = vpop.f32.mrf.mxu1 }
 0x146   : > { %3495 = vst [vmem:[#allocation8_spill] sm:$0xff] %v3357_v44  ;;  %v3367_v51 = vpop.f32.mrf.mxu0 }
 0x147   : > { %v3361_v47 = vpop.f32.mrf.mxu1 }
 0x148   : > { %3496 = vst [vmem:[#allocation9_spill] sm:$0xff] %v3361_v47  ;;  %v3371_v53 = vpop.f32.mrf.mxu0 }
 0x149   : > { %v3365_v50 = vpop.f32.mrf.mxu1 }
 0x14a   : > { %3497 = vst [vmem:[#allocation10_spill] sm:$0xff] %v3365_v50  ;;  %v3375_v57 = vpop.f32.mrf.mxu0 }
 0x14b   : > { %v3369_v52 = vpop.f32.mrf.mxu1 }
 0x14c   : > { %3498 = vst [vmem:[#allocation11_spill] sm:$0xff] %v3369_v52  ;;  %v3379_v63 = vpop.f32.mrf.mxu0 }
 0x14d   : > { %v3373_v54 = vpop.f32.mrf.mxu1 }
 0x14e   : > { %3499 = vst [vmem:[#allocation12_spill] sm:$0xff] %v3373_v54  ;;  %v3381_v6 = vpop.f32.mrf.mxu0 }
 0x14f   : > { %v3377_v60 = vpop.f32.mrf.mxu1 }
 0x150   : > { %3500 = vst [vmem:[#allocation13_spill] sm:$0xff] %v3377_v60  ;;  %v2255_v38 = vpop.f32.mrf.mxu0  ;;  %v2239_v60 = vadd.f32 %v2238_v28, %v2237_v25 }
 0x151   : > { %v2319_v15 = vpop.f32.mrf.mxu1 }
 0x152   : > { %v2256_v43 = vpop.f32.mrf.mxu0 }
 0x153   : > { %v2320_v26 = vpop.f32.mrf.mxu1  ;;  %v2257_v44 = vadd.f32 %v2256_v43, %v2255_v38 }
 0x154   : > { %v2258_v11 = vpop.f32.mrf.mxu0  ;;  %v2321_v38 = vadd.f32 %v2320_v26, %v2319_v15 }
 0x155   : > { %v2322_v10 = vpop.f32.mrf.mxu1 }
 0x156   : > { %v2259_v39 = vpop.f32.mrf.mxu0 }
 0x157   : > { %v2323_v56 = vpop.f32.mrf.mxu1  ;;  %v2260_v33 = vadd.f32 %v2259_v39, %v2258_v11 }
 0x158   : > { %v2261_v34 = vpop.f32.mrf.mxu0 }
 0x159   : > { %v2325_v36 = vpop.f32.mrf.mxu1  ;;  %v1560_v11 = vadd.f32 %v2260_v33, %v3317_v37 }
 0x15a   : > { %v2262_v48 = vpop.f32.mrf.mxu0 }
 0x15b   : > { %v2326_v1 = vpop.f32.mrf.mxu1  ;;  %v2263_v22 = vadd.f32 %v2262_v48, %v2261_v34  ;;  %v2242_v34 = vadd.f32 %v2241_v58, %v2240_v31 }
 0x15c   : > { %v2264_v2 = vpop.f32.mrf.mxu0  ;;  %v2327_v52 = vadd.f32 %v2326_v1, %v2325_v36 }
 0x15d   : > { %v2328_v62 = vpop.f32.mrf.mxu1  ;;  %v1565_v41 = vadd.f32 %v2263_v22, %v3320_v29  ;;  %v2303_v29 = vadd.f32 %v3340_v20, %v3337_v19  ;;  %v2324_v19 = vadd.f32 %v2323_v56, %v2322_v10  ;;  %v3506_v22 = vld [vmem:[#allocation6_spill] sm:$0xff] }
 0x15e   : > { %v2265_v4 = vpop.f32.mrf.mxu0 }
 0x15f   : > { %v2329_v21 = vpop.f32.mrf.mxu1  ;;  %v2266_v18 = vadd.f32 %v2265_v4, %v2264_v2  ;;  %v1662_v43 = vadd.f32 %v2327_v52, %v1565_v41  ;;  %v1657_v26 = vadd.f32 %v2324_v19, %v1560_v11 }
 0x160   : > { %v2267_v9 = vpop.f32.mrf.mxu0 }
 0x161   : > { %v3385_v0 = vpop.f32.mrf.mxu1  ;;  %v1568_v25 = vadd.f32 %v2266_v18, %v3323_v45  ;;  %v1536_v18 = vadd.f32 %v2242_v34, %v3299_v35  ;;  %v2251_v45 = vadd.f32 %v3375_v57, %v3371_v53  ;;  %v2245_v35 = vadd.f32 %v3359_v46, %v3355_v42  ;;  %v3508_v34 = vld [vmem:[#allocation3_spill] sm:$0xff] }
 0x162   : > { %v2268_v13 = vpop.f32.mrf.mxu0 }
 0x163   : > { %v3387_v8 = vpop.f32.mrf.mxu1  ;;  %v2269_v39 = vadd.f32 %v2268_v13, %v2267_v9  ;;  %v1549_v1 = vadd.f32 %v2251_v45, %v3308_v17  ;;  %v1541_v17 = vadd.f32 %v2245_v35, %v3302_v49  ;;  %v3505_v9 = vld [vmem:[#allocation4_spill] sm:$0xff]  ;;  %v3507_v49 = vld [vmem:[#allocation7_spill] sm:$0xff] }
 0x164   : > { %v2270_v61 = vpop.f32.mrf.mxu0 }
 0x165   : > { %v3389_v12 = vpop.f32.mrf.mxu1  ;;  %v1573_v15 = vadd.f32 %v2269_v39, %v3326_v55  ;;  %v3512_v39 = vld [vmem:[#allocation2_spill] sm:$0xff] }
 0x166   : > { %3501 = vst [vmem:[#allocation14_spill] sm:$0xff] %v3389_v12  ;;  %v2271_v54 = vpop.f32.mrf.mxu0  ;;  %v1557_v12 = vadd.f32 %v2257_v44, %v3314_v3  ;;  %v2330_v3 = vadd.f32 %v2329_v21, %v2328_v62  ;;  %v3504_v21 = vld [vmem:[#allocation11_spill] sm:$0xff] }
 0x167   : > { %v3391_v16 = vpop.f32.mrf.mxu1  ;;  %v2272_v10 = vadd.f32 %v2271_v54, %v2270_v61  ;;  %v2309_v61 = vadd.f32 %v3507_v49, %v3506_v22 }
 0x168   : > { %3502 = vst [vmem:[#allocation15_spill] sm:$0xff] %v3391_v16  ;;  %v2273_v40 = vpop.f32.mrf.mxu0  ;;  %v1533_v16 = vadd.f32 %v2239_v60, %v3296_v24  ;;  %v1654_v58 = vadd.f32 %v2321_v38, %v1557_v12  ;;  %v1665_v52 = vadd.f32 %v2330_v3, %v1568_v25  ;;  %v2306_v60 = vadd.f32 %v3347_v30, %v3344_v27 }
 0x169   : > { %v2337_v47 = vpop.f32.mrf.mxu1  ;;  %v2254_v27 = vadd.f32 %v3381_v6, %v3379_v63  ;;  %v2333_v30 = vadd.f32 %v3387_v8, %v3385_v0  ;;  %v2248_v63 = vadd.f32 %v3367_v51, %v3363_v14  ;;  %v3503_v6 = vld [vmem:[#allocation10_spill] sm:$0xff]  ;;  %v1576_v12 = vadd.f32 %v2272_v10, %v3505_v9 }
 0x16a   : > { %v2274_v48 = vpop.f32.mrf.mxu0  ;;  %v1630_v37 = vadd.f32 %v2303_v29, %v1533_v16  ;;  %v1633_v55 = vadd.f32 %v2306_v60, %v1536_v18  ;;  %v2315_v0 = vadd.f32 %v3504_v21, %v3503_v6  ;;  %v3511_v29 = vld [vmem:[#allocation5_spill] sm:$0xff]  ;;  %v1638_v3 = vadd.f32 %v2309_v61, %v1541_v17 }
 0x16b   : > { %v2338_v59 = vpop.f32.mrf.mxu1  ;;  %v2275_v28 = vadd.f32 %v2274_v48, %v2273_v40  ;;  %v1552_v14 = vadd.f32 %v2254_v27, %v3508_v34  ;;  %v3514_v18 = vld [vmem:[#allocation13_spill] sm:$0xff] }
 0x16c   : > { %v2276_v2 = vpop.f32.mrf.mxu0  ;;  %v2339_v56 = vadd.f32 %v2338_v59, %v2337_v47  ;;  %v1646_v48 = vadd.f32 %v2315_v0, %v1549_v1 }
 0x16d   : > { %v2340_v7 = vpop.f32.mrf.mxu1  ;;  %v1581_v40 = vadd.f32 %v2275_v28, %v3332_v32  ;;  %v3509_v25 = vld [vmem:[#allocation14_spill] sm:$0xff] }
 0x16e   : > { %v2277_v20 = vpop.f32.mrf.mxu0 }
 0x16f   : > { %v2341_v50 = vpop.f32.mrf.mxu1  ;;  %v2278_v33 = vadd.f32 %v2277_v20, %v2276_v2  ;;  %v1678_v54 = vadd.f32 %v2339_v56, %v1581_v40  ;;  %v3510_v28 = vld [vmem:[#allocation15_spill] sm:$0xff]  ;;  %v1544_v2 = vadd.f32 %v2248_v63, %v3512_v39 }
 0x170   : > { %v2377_v53 = vpop.f32.mrf.mxu0  ;;  %v2342_v13 = vadd.f32 %v2341_v50, %v2340_v7 }
 0x171   : > { %v2385_v24 = vpop.f32.mrf.mxu1  ;;  %v1727_v32 = vadd.f32 %v2377_v53, %v1630_v37  ;;  %v1584_v62 = vadd.f32 %v2278_v33, %v3335_v5  ;;  %v1670_v5 = vadd.f32 %v2333_v30, %v1573_v15  ;;  %v3515_v33 = vld [vmem:[#allocation8_spill] sm:$0xff] }
 0x172   : > { %v1759_v31 = vadd.f32 %v2385_v24, %v1662_v43  ;;  %v1718_v42 = vpop.f32.mrf.mxu0  ;;  %v2336_v43 = vadd.f32 %v3510_v28, %v3509_v25 }
 0x173   : > { %v1750_v41 = vpop.f32.mrf.mxu1  ;;  %1783 = vst [vmem:[%s3403_s30 + $0x10] sm:$0xff] %v1727_v32  ;;  %v1719_v59 = vadd.f32 %v1718_v42, %v3342_v23  ;;  %v1681_v11 = vadd.f32 %v2342_v13, %v1584_v62 }
 0x174   : > { %1791 = vst [vmem:[%s3403_s30 + $0x50] sm:$0xff] %v1759_v31  ;;  %v1751_v44 = vadd.f32 %v1750_v41, %v1654_v58  ;;  %v2378_v4 = vpop.f32.mrf.mxu0  ;;  %v3513_v58 = vld [vmem:[#allocation12_spill] sm:$0xff]  ;;  %v1673_v37 = vadd.f32 %v2336_v43, %v1576_v12 }
 0x175   : > { %v2386_v57 = vpop.f32.mrf.mxu1  ;;  %1781 = vst [vmem:[%s3403_s30] sm:$0xff] %v1719_v59  ;;  %v1730_v23 = vadd.f32 %v2378_v4, %v1633_v55  ;;  %v2318_v45 = vadd.f32 %v3514_v18, %v3513_v58 }
 0x176   : > { %1789 = vst [vmem:[%s3403_s30 + $0x40] sm:$0xff] %v1751_v44  ;;  %v1762_v36 = vadd.f32 %v2386_v57, %v1665_v52  ;;  %v1721_v51 = vpop.f32.mrf.mxu0  ;;  %v3516_v44 = vld [vmem:[#allocation9_spill] sm:$0xff] }
 0x177   : > { %v1753_v46 = vpop.f32.mrf.mxu1  ;;  %1784 = vst [vmem:[%s3403_s30 + $0x18] sm:$0xff] %v1730_v23  ;;  %v1722_v7 = vadd.f32 %v1721_v51, %v3511_v29  ;;  %v2312_v52 = vadd.f32 %v3516_v44, %v3515_v33  ;;  %v1649_v35 = vadd.f32 %v2318_v45, %v1552_v14 }
 0x178   : > { %1792 = vst [vmem:[%s3403_s30 + $0x58] sm:$0xff] %v1762_v36  ;;  %v1754_v47 = vadd.f32 %v1753_v46, %v1657_v26  ;;  %v2381_v24 = vpop.f32.mrf.mxu0 }
 0x179   : > { %v2389_v8 = vpop.f32.mrf.mxu1  ;;  %1782 = vst [vmem:[%s3403_s30 + $0x8] sm:$0xff] %v1722_v7  ;;  %v1743_v19 = vadd.f32 %v2381_v24, %v1646_v48  ;;  %v1641_v26 = vadd.f32 %v2312_v52, %v1544_v2 }
 0x17a   : > { %1790 = vst [vmem:[%s3403_s30 + $0x48] sm:$0xff] %v1754_v47  ;;  %v1775_v16 = vadd.f32 %v2389_v8, %v1678_v54  ;;  %v1734_v41 = vpop.f32.mrf.mxu0 }
 0x17b   : > { %v1766_v38 = vpop.f32.mrf.mxu1  ;;  %1787 = vst [vmem:[%s3403_s30 + $0x30] sm:$0xff] %v1743_v19  ;;  %v1735_v60 = vadd.f32 %v1734_v41, %v1638_v3 }
 0x17c   : > { %1795 = vst [vmem:[%s3403_s30 + $0x70] sm:$0xff] %v1775_v16  ;;  %v1767_v50 = vadd.f32 %v1766_v38, %v1670_v5  ;;  %v2382_v53 = vpop.f32.mrf.mxu0 }
 0x17d   : > { %v2390_v31 = vpop.f32.mrf.mxu1  ;;  %1785 = vst [vmem:[%s3403_s30 + $0x20] sm:$0xff] %v1735_v60  ;;  %v1746_v57 = vadd.f32 %v2382_v53, %v1649_v35 }
 0x17e   : > { %1793 = vst [vmem:[%s3403_s30 + $0x60] sm:$0xff] %v1767_v50  ;;  %v1778_v20 = vadd.f32 %v2390_v31, %v1681_v11  ;;  %v1737_v10 = vpop.f32.mrf.mxu0 }
 0x17f   : > { %v1769_v40 = vpop.f32.mrf.mxu1  ;;  %1788 = vst [vmem:[%s3403_s30 + $0x38] sm:$0xff] %v1746_v57  ;;  %v1738_v56 = vadd.f32 %v1737_v10, %v1641_v26 }
 0x180   : > { %1796 = vst [vmem:[%s3403_s30 + $0x78] sm:$0xff] %v1778_v20  ;;  %v1770_v15 = vadd.f32 %v1769_v40, %v1673_v37 }
 0x181   : > { %1786 = vst [vmem:[%s3403_s30 + $0x28] sm:$0xff] %v1738_v56 }
 0x182   : > { %1794 = vst [vmem:[%s3403_s30 + $0x68] sm:$0xff] %v1770_v15 }
 0x183 PF: > { %s15_s22 = sadd.s32 1, %s2559_s22   ;;  %s3517_s18 = smov %s2551_s20 }
 0x184   : > { %p12_p9 = scmp.ge.s32.totalorder %s15_s22, 6   ;;  %s3518_s19 = smov %s2555_s21 }
 0x185   : > { %s3519_s20 = smov %s3522_s23  ;;  %s3520_s21 = smov %s3526_s24 }
 0x186   :  { %14 = sbr.rel (!%p12_p9) target bundleno = 3 (0x3), region = 71 }

</bundles_post_ra>
